<compile_context>
chip_gen: v5e
topology: v5e:2x2
jax: 0.10.0
libtpu: 0.0.40
codegen_flags: <defaults>
</compile_context>

<pallas_src>
import functools

import jax
import jax.numpy as jnp
from jax import lax
from jax.experimental import pallas as pl
from jax.experimental.pallas import tpu as pltpu

LN_EPS = 1e-5  # PyTorch nn.LayerNorm default


# --------------------------------------------------------------------------
# Fused kernel: stack1 (residual conv blocks) -> pointwise conv -> stack2
# --------------------------------------------------------------------------
def _fused_convnet_kernel(x_ref,
                          w1_ref, b1_ref, g1_ref, be1_ref,
                          mw_ref, mb_ref,
                          w2_ref, b2_ref, g2_ref, be2_ref,
                          o_ref,
                          *, ksize, n_stacks, n_blocks, seq_len):
    # x_ref:  (B*T, D)          both batch elements stacked along sublanes
    # wX_ref: (NB, K, D, D)     per-block, per-tap conv weights (d_in, d_out)
    # bX/gX/beX_ref: (NB,1,D)   conv bias / LN weight / LN bias per block
    # mw_ref: (D, D), mb_ref: (1, D)   middle pointwise conv
    R, D = x_ref.shape
    T = seq_len
    pad = (ksize - 1) // 2

    # Hoisted once, shared by all 8 blocks: after a sublane roll of the stacked
    # (B*T, D) activations, rows whose source crossed a batch-element boundary
    # (or wrapped) must read as "same"-padding zeros.  tau = row index within
    # its batch element.
    tau = lax.broadcasted_iota(jnp.int32, (R, D), 0) % T
    masks = []
    for k in range(ksize):
        s = pad - k
        if s > 0:
            masks.append((tau >= s).astype(jnp.float32))
        elif s < 0:
            masks.append((tau < T + s).astype(jnp.float32))
        else:
            masks.append(None)

    def conv_block(h, w_ref, blk, b, g, beta):
        # ReLU -> Dropout(eval: identity) -> Conv1d("same") -> LayerNorm(D)
        a = jnp.maximum(h, 0.0)
        # TODO(synk): nn.Dropout(0.1) modeled in eval mode (identity).
        acc = jnp.zeros((R, D), jnp.float32)
        for k in range(ksize):
            s = (pad - k) % R                       # static, non-negative
            ak = pltpu.roll(a, shift=s, axis=0) if s else a   # XLU sublane roll
            if masks[k] is not None:
                ak = ak * masks[k]                  # zero wrapped / seam rows
            acc = acc + jnp.dot(ak, w_ref[blk, k],
                                preferred_element_type=jnp.float32)
        y = acc + b
        # Two-pass LayerNorm statistics over channels (lane axis).
        mean = jnp.mean(y, axis=-1, keepdims=True)
        c = y - mean
        var = jnp.mean(c * c, axis=-1, keepdims=True)
        return c * lax.rsqrt(var + LN_EPS) * g + beta

    def residual_stage(h, w_ref, b_ref, g_ref, be_ref):
        blk = 0
        for _ in range(n_stacks):
            y = h
            for _ in range(n_blocks):
                y = conv_block(y, w_ref, blk, b_ref[blk], g_ref[blk], be_ref[blk])
                blk += 1
            h = h + y                               # residual, in-kernel
        return h

    h = x_ref[...]                                  # (B*T, D) float32
    h = residual_stage(h, w1_ref, b1_ref, g1_ref, be1_ref)
    # middle_layer (pointwise kernel_size=1 Conv1d) -> one matmul.
    h = jnp.dot(h, mw_ref[...], preferred_element_type=jnp.float32) + mb_ref[...]
    h = residual_stage(h, w2_ref, b2_ref, g2_ref, be2_ref)
    o_ref[...] = h.astype(o_ref.dtype)


# --------------------------------------------------------------------------
# One-time weight packing (outside the per-call jitted path)
# --------------------------------------------------------------------------
def pack_params(params, *, ksize, hidden_size):
    D = hidden_size

    def pack_stage(stage_blocks):
        flat = [p for blocks in stage_blocks for p in blocks]
        # Conv1d weight (C_out, C_in, K) -> per-tap (K, C_in, C_out)
        w = jnp.stack([jnp.transpose(p["conv_w"], (2, 1, 0)) for p in flat])
        b = jnp.stack([p["conv_b"].reshape(1, D) for p in flat])
        g = jnp.stack([p["ln_w"].reshape(1, D) for p in flat])
        be = jnp.stack([p["ln_b"].reshape(1, D) for p in flat])
        return (w.astype(jnp.float32), b.astype(jnp.float32),
                g.astype(jnp.float32), be.astype(jnp.float32))

    w1, b1, g1, be1 = pack_stage(params["stack1"])
    w2, b2, g2, be2 = pack_stage(params["stack2"])
    # middle pointwise Conv1d: weight (C_out, C_in, 1) -> (C_in, C_out)
    mw = jnp.transpose(params["middle_w"][:, :, 0], (1, 0)).astype(jnp.float32)
    mb = params["middle_b"].reshape(1, D).astype(jnp.float32)
    return (w1, b1, g1, be1, mw, mb, w2, b2, g2, be2)


# --------------------------------------------------------------------------
# Per-call wrapper: PyTorch layouts in, PyTorch layouts out
# --------------------------------------------------------------------------
@functools.partial(jax.jit, static_argnames=("ksize", "n_stacks", "n_blocks"))
def convnet_double_layer(x_bdt, packed, *, ksize, n_stacks, n_blocks):
    B, D, T = x_bdt.shape
    w1, b1, g1, be1, mw, mb, w2, b2, g2, be2 = packed

    # (B, D, T) -> (B*T, D): one fused XLA copy; batch stacked along sublanes.
    x_rows = jnp.transpose(x_bdt, (0, 2, 1)).reshape(B * T, D).astype(jnp.float32)

    kernel = functools.partial(_fused_convnet_kernel, ksize=ksize,
                               n_stacks=n_stacks, n_blocks=n_blocks, seq_len=T)
    vmem = pl.BlockSpec(memory_space=pltpu.MemorySpace.VMEM)

    out_rows = pl.pallas_call(
        kernel,
        out_shape=jax.ShapeDtypeStruct((B * T, D), jnp.float32),
        in_specs=[vmem] * 11,
        out_specs=vmem,
    )(x_rows, w1, b1, g1, be1, mw, mb, w2, b2, g2, be2)

    return jnp.transpose(out_rows.reshape(B, T, D), (0, 2, 1))   # (B, D, T)


# --------------------------------------------------------------------------
# Pure-JAX reference (faithful PyTorch semantics, PyTorch weight layouts)
# --------------------------------------------------------------------------
def _conv_block_ref(x_btd, p, ksize):
    pad = (ksize - 1) // 2
    B, T, D = x_btd.shape
    a = jnp.maximum(x_btd, 0.0)
    ap = jnp.pad(a, ((0, 0), (pad, pad), (0, 0)))
    y = jnp.zeros((B, T, D), jnp.float32) + p["conv_b"][None, None, :]
    for k in range(ksize):
        y = y + jnp.einsum("btc,dc->btd", ap[:, k:k + T, :], p["conv_w"][:, :, k])
    mean = jnp.mean(y, -1, keepdims=True)
    var = jnp.mean((y - mean) ** 2, -1, keepdims=True)
    return (y - mean) / jnp.sqrt(var + LN_EPS) * p["ln_w"] + p["ln_b"]


def _model_ref(x_bdt, params, ksize):
    x = jnp.transpose(x_bdt, (0, 2, 1))

    def stage(x, stage_blocks):
        for blocks in stage_blocks:
            y = x
            for p in blocks:
                y = _conv_block_ref(y, p, ksize)
            x = x + y
        return x

    x = stage(x, params["stack1"])
    x = (jnp.einsum("btc,dc->btd", x, params["middle_w"][:, :, 0])
         + params["middle_b"][None, None, :])
    x = stage(x, params["stack2"])
    return jnp.transpose(x, (0, 2, 1))


# --------------------------------------------------------------------------
if __name__ == "__main__":
    hidden_size = 32     # D
    seq_len = 16         # T
    batch = 2            # B
    n_stacks = 2
    n_blocks = 2
    kernel_size = 3
    # activation = "ReLU"

    root = jax.random.PRNGKey(0)
    kx, kp = jax.random.split(root)
    # PyTorch Conv1d input layout: (B, C=hidden, T)
    x = jax.random.normal(kx, (batch, hidden_size, seq_len), jnp.float32)

    def block_params(key):
        kw, kb, kg, kbe = jax.random.split(key, 4)
        fan = hidden_size * kernel_size
        return {
            # PyTorch Conv1d weight layout: (C_out, C_in, K)
            "conv_w": jax.random.normal(
                kw, (hidden_size, hidden_size, kernel_size),
                jnp.float32) / jnp.sqrt(fan),
            "conv_b": 0.02 * jax.random.normal(kb, (hidden_size,), jnp.float32),
            "ln_w": 1.0 + 0.1 * jax.random.normal(kg, (hidden_size,), jnp.float32),
            "ln_b": 0.1 * jax.random.normal(kbe, (hidden_size,), jnp.float32),
        }

    def make_stage(key):
        keys = jax.random.split(key, n_stacks * n_blocks)
        it = iter(keys)
        return [[block_params(next(it)) for _ in range(n_blocks)]
                for _ in range(n_stacks)]

    k1, k2, kmw, kmb = jax.random.split(kp, 4)
    params = {
        "stack1": make_stage(k1),
        "stack2": make_stage(k2),
        # TODO(synk): `middle_layer` is an arbitrary nn.Module in the spec;
        # a pointwise Conv1d(hidden, hidden, kernel_size=1) is used here.
        "middle_w": jax.random.normal(
            kmw, (hidden_size, hidden_size, 1),
            jnp.float32) / jnp.sqrt(hidden_size),
        "middle_b": 0.02 * jax.random.normal(kmb, (hidden_size,), jnp.float32),
    }

    # One-time setup: pack weights into kernel layouts (not in the call path).
    packed = jax.block_until_ready(
        pack_params(params, ksize=kernel_size, hidden_size=hidden_size))

    out = convnet_double_layer(x, packed, ksize=kernel_size,
                               n_stacks=n_stacks, n_blocks=n_blocks)
    out = jax.block_until_ready(out)

    ref = _model_ref(x, params, kernel_size)
    assert out.shape == x.shape, (out.shape, x.shape)
    max_err = float(jnp.max(jnp.abs(out - ref)))
    assert jnp.allclose(out, ref, atol=1e-4, rtol=1e-4), max_err

    print("KERNEL_OK")
</pallas_src>

<mosaic_0001>
module attributes {stable_mosaic.version = 11 : i64} {
  func.func @_fused_convnet_kernel(%arg0: memref<32x32xf32, #tpu.memory_space<vmem>>, %arg1: memref<4x3x32x32xf32, #tpu.memory_space<vmem>>, %arg2: memref<4x1x32xf32, #tpu.memory_space<vmem>>, %arg3: memref<4x1x32xf32, #tpu.memory_space<vmem>>, %arg4: memref<4x1x32xf32, #tpu.memory_space<vmem>>, %arg5: memref<32x32xf32, #tpu.memory_space<vmem>>, %arg6: memref<1x32xf32, #tpu.memory_space<vmem>>, %arg7: memref<4x3x32x32xf32, #tpu.memory_space<vmem>>, %arg8: memref<4x1x32xf32, #tpu.memory_space<vmem>>, %arg9: memref<4x1x32xf32, #tpu.memory_space<vmem>>, %arg10: memref<4x1x32xf32, #tpu.memory_space<vmem>>, %arg11: memref<32x32xf32, #tpu.memory_space<vmem>>) attributes {dimension_semantics = [], scalar_prefetch = 0 : i64, scratch_operands = 0 : i64, tpu.core_type = #tpu.core_type<tc>} {
    %0 = tpu.iota {dimensions = array<i32: 0>} : vector<32x32xi32>
    %c16_i32 = arith.constant 16 : i32
    %c0_i32 = arith.constant 0 : i32
    %1 = arith.cmpi eq, %c16_i32, %c0_i32 : i32
    %c1_i32 = arith.constant 1 : i32
    %2 = arith.select %1, %c1_i32, %c16_i32 : i32
    %3 = vector.broadcast %2 : i32 to vector<32x32xi32>
    %4 = arith.remsi %0, %3 : vector<32x32xi32>
    %c0_i32_0 = arith.constant 0 : i32
    %5 = vector.broadcast %c0_i32_0 : i32 to vector<32x32xi32>
    %6 = arith.cmpi ne, %4, %5 : vector<32x32xi32>
    %c0_i32_1 = arith.constant 0 : i32
    %7 = vector.broadcast %c0_i32_1 : i32 to vector<32x32xi32>
    %8 = arith.cmpi slt, %4, %7 : vector<32x32xi32>
    %c0_i32_2 = arith.constant 0 : i32
    %9 = arith.cmpi slt, %2, %c0_i32_2 : i32
    %10 = vector.broadcast %9 : i1 to vector<32x32xi1>
    %11 = vector.broadcast %10 : vector<32x32xi1> to vector<32x32xi1>
    %12 = arith.xori %8, %11 : vector<32x32xi1>
    %13 = arith.andi %12, %6 : vector<32x32xi1>
    %14 = vector.broadcast %2 : i32 to vector<32x32xi32>
    %15 = arith.addi %4, %14 : vector<32x32xi32>
    %16 = arith.select %13, %15, %4 : vector<32x32xi1>, vector<32x32xi32>
    %c1_i32_3 = arith.constant 1 : i32
    %17 = vector.broadcast %c1_i32_3 : i32 to vector<32x32xi32>
    %18 = arith.cmpi sge, %16, %17 : vector<32x32xi32>
    %19 = arith.extui %18 : vector<32x32xi1> to vector<32x32xi32>
    %20 = arith.sitofp %19 : vector<32x32xi32> to vector<32x32xf32>
    %c15_i32 = arith.constant 15 : i32
    %21 = vector.broadcast %c15_i32 : i32 to vector<32x32xi32>
    %22 = arith.cmpi slt, %16, %21 : vector<32x32xi32>
    %23 = arith.extui %22 : vector<32x32xi1> to vector<32x32xi32>
    %24 = arith.sitofp %23 : vector<32x32xi32> to vector<32x32xf32>
    %c0 = arith.constant 0 : index
    %c0_4 = arith.constant 0 : index
    %25 = vector.load %arg0[%c0, %c0_4] : memref<32x32xf32, #tpu.memory_space<vmem>>, vector<32x32xf32>
    %c0_5 = arith.constant 0 : index
    %c0_6 = arith.constant 0 : index
    %c0_7 = arith.constant 0 : index
    %26 = vector.load %arg2[%c0_5, %c0_6, %c0_7] : memref<4x1x32xf32, #tpu.memory_space<vmem>>, vector<1x1x32xf32>
    %27 = vector.shape_cast %26 : vector<1x1x32xf32> to vector<1x32xf32>
    %c0_8 = arith.constant 0 : index
    %c0_9 = arith.constant 0 : index
    %c0_10 = arith.constant 0 : index
    %28 = vector.load %arg3[%c0_8, %c0_9, %c0_10] : memref<4x1x32xf32, #tpu.memory_space<vmem>>, vector<1x1x32xf32>
    %29 = vector.shape_cast %28 : vector<1x1x32xf32> to vector<1x32xf32>
    %c0_11 = arith.constant 0 : index
    %c0_12 = arith.constant 0 : index
    %c0_13 = arith.constant 0 : index
    %30 = vector.load %arg4[%c0_11, %c0_12, %c0_13] : memref<4x1x32xf32, #tpu.memory_space<vmem>>, vector<1x1x32xf32>
    %31 = vector.shape_cast %30 : vector<1x1x32xf32> to vector<1x32xf32>
    %cst = arith.constant 0.000000e+00 : f32
    %32 = vector.broadcast %cst : f32 to vector<32x32xf32>
    %33 = arith.maximumf %25, %32 : vector<32x32xf32>
    %cst_14 = arith.constant 0.000000e+00 : f32
    %34 = vector.broadcast %cst_14 : f32 to vector<32x32xf32>
    %c1_i32_15 = arith.constant 1 : i32
    %35 = tpu.dynamic_rotate %33 by %c1_i32_15 dim 0 : vector<32x32xf32>, i32 -> vector<32x32xf32>
    %36 = arith.mulf %35, %20 : vector<32x32xf32>
    %c0_16 = arith.constant 0 : index
    %c0_17 = arith.constant 0 : index
    %c0_18 = arith.constant 0 : index
    %c0_19 = arith.constant 0 : index
    %37 = vector.load %arg1[%c0_16, %c0_17, %c0_18, %c0_19] : memref<4x3x32x32xf32, #tpu.memory_space<vmem>>, vector<1x1x32x32xf32>
    %38 = vector.shape_cast %37 : vector<1x1x32x32xf32> to vector<32x32xf32>
    %cst_20 = arith.constant dense<0.000000e+00> : vector<32x32xf32>
    %39 = tpu.matmul %36, %38, %cst_20 {dimension_numbers = #tpu.dot_dimension_numbers<[1], [0], [0], [1], [0, 0, 1, 1], [], []>} : vector<32x32xf32>, vector<32x32xf32>, vector<32x32xf32> -> vector<32x32xf32>
    %40 = arith.addf %34, %39 : vector<32x32xf32>
    %c0_21 = arith.constant 0 : index
    %c1 = arith.constant 1 : index
    %c0_22 = arith.constant 0 : index
    %c0_23 = arith.constant 0 : index
    %41 = vector.load %arg1[%c0_21, %c1, %c0_22, %c0_23] : memref<4x3x32x32xf32, #tpu.memory_space<vmem>>, vector<1x1x32x32xf32>
    %42 = vector.shape_cast %41 : vector<1x1x32x32xf32> to vector<32x32xf32>
    %cst_24 = arith.constant dense<0.000000e+00> : vector<32x32xf32>
    %43 = tpu.matmul %33, %42, %cst_24 {dimension_numbers = #tpu.dot_dimension_numbers<[1], [0], [0], [1], [0, 0, 1, 1], [], []>} : vector<32x32xf32>, vector<32x32xf32>, vector<32x32xf32> -> vector<32x32xf32>
    %44 = arith.addf %40, %43 : vector<32x32xf32>
    %c31_i32 = arith.constant 31 : i32
    %45 = tpu.dynamic_rotate %33 by %c31_i32 dim 0 : vector<32x32xf32>, i32 -> vector<32x32xf32>
    %46 = arith.mulf %45, %24 : vector<32x32xf32>
    %c0_25 = arith.constant 0 : index
    %c2 = arith.constant 2 : index
    %c0_26 = arith.constant 0 : index
    %c0_27 = arith.constant 0 : index
    %47 = vector.load %arg1[%c0_25, %c2, %c0_26, %c0_27] : memref<4x3x32x32xf32, #tpu.memory_space<vmem>>, vector<1x1x32x32xf32>
    %48 = vector.shape_cast %47 : vector<1x1x32x32xf32> to vector<32x32xf32>
    %cst_28 = arith.constant dense<0.000000e+00> : vector<32x32xf32>
    %49 = tpu.matmul %46, %48, %cst_28 {dimension_numbers = #tpu.dot_dimension_numbers<[1], [0], [0], [1], [0, 0, 1, 1], [], []>} : vector<32x32xf32>, vector<32x32xf32>, vector<32x32xf32> -> vector<32x32xf32>
    %50 = arith.addf %44, %49 : vector<32x32xf32>
    %51 = vector.broadcast %27 : vector<1x32xf32> to vector<32x32xf32>
    %52 = arith.addf %50, %51 : vector<32x32xf32>
    %cst_29 = arith.constant dense<0.000000e+00> : vector<32xf32>
    %53 = vector.multi_reduction <add>, %52, %cst_29 [1] : vector<32x32xf32> to vector<32xf32>
    %54 = vector.shape_cast %53 : vector<32xf32> to vector<32x1xf32>
    %cst_30 = arith.constant 3.200000e+01 : f32
    %55 = vector.broadcast %cst_30 : f32 to vector<32x1xf32>
    %56 = arith.divf %54, %55 : vector<32x1xf32>
    %57 = vector.broadcast %56 : vector<32x1xf32> to vector<32x32xf32>
    %58 = arith.subf %52, %57 : vector<32x32xf32>
    %59 = arith.mulf %58, %58 : vector<32x32xf32>
    %cst_31 = arith.constant dense<0.000000e+00> : vector<32xf32>
    %60 = vector.multi_reduction <add>, %59, %cst_31 [1] : vector<32x32xf32> to vector<32xf32>
    %61 = vector.shape_cast %60 : vector<32xf32> to vector<32x1xf32>
    %cst_32 = arith.constant 3.200000e+01 : f32
    %62 = vector.broadcast %cst_32 : f32 to vector<32x1xf32>
    %63 = arith.divf %61, %62 : vector<32x1xf32>
    %cst_33 = arith.constant 9.99999974E-6 : f32
    %64 = vector.broadcast %cst_33 : f32 to vector<32x1xf32>
    %65 = arith.addf %63, %64 : vector<32x1xf32>
    %66 = math.rsqrt %65 : vector<32x1xf32>
    %67 = vector.broadcast %66 : vector<32x1xf32> to vector<32x32xf32>
    %68 = arith.mulf %58, %67 : vector<32x32xf32>
    %69 = vector.broadcast %29 : vector<1x32xf32> to vector<32x32xf32>
    %70 = arith.mulf %68, %69 : vector<32x32xf32>
    %71 = vector.broadcast %31 : vector<1x32xf32> to vector<32x32xf32>
    %72 = arith.addf %70, %71 : vector<32x32xf32>
    %c1_34 = arith.constant 1 : index
    %c0_35 = arith.constant 0 : index
    %c0_36 = arith.constant 0 : index
    %73 = vector.load %arg2[%c1_34, %c0_35, %c0_36] : memref<4x1x32xf32, #tpu.memory_space<vmem>>, vector<1x1x32xf32>
    %74 = vector.shape_cast %73 : vector<1x1x32xf32> to vector<1x32xf32>
    %c1_37 = arith.constant 1 : index
    %c0_38 = arith.constant 0 : index
    %c0_39 = arith.constant 0 : index
    %75 = vector.load %arg3[%c1_37, %c0_38, %c0_39] : memref<4x1x32xf32, #tpu.memory_space<vmem>>, vector<1x1x32xf32>
    %76 = vector.shape_cast %75 : vector<1x1x32xf32> to vector<1x32xf32>
    %c1_40 = arith.constant 1 : index
    %c0_41 = arith.constant 0 : index
    %c0_42 = arith.constant 0 : index
    %77 = vector.load %arg4[%c1_40, %c0_41, %c0_42] : memref<4x1x32xf32, #tpu.memory_space<vmem>>, vector<1x1x32xf32>
    %78 = vector.shape_cast %77 : vector<1x1x32xf32> to vector<1x32xf32>
    %cst_43 = arith.constant 0.000000e+00 : f32
    %79 = vector.broadcast %cst_43 : f32 to vector<32x32xf32>
    %80 = arith.maximumf %72, %79 : vector<32x32xf32>
    %cst_44 = arith.constant 0.000000e+00 : f32
    %81 = vector.broadcast %cst_44 : f32 to vector<32x32xf32>
    %c1_i32_45 = arith.constant 1 : i32
    %82 = tpu.dynamic_rotate %80 by %c1_i32_45 dim 0 : vector<32x32xf32>, i32 -> vector<32x32xf32>
    %83 = arith.mulf %82, %20 : vector<32x32xf32>
    %c1_46 = arith.constant 1 : index
    %c0_47 = arith.constant 0 : index
    %c0_48 = arith.constant 0 : index
    %c0_49 = arith.constant 0 : index
    %84 = vector.load %arg1[%c1_46, %c0_47, %c0_48, %c0_49] : memref<4x3x32x32xf32, #tpu.memory_space<vmem>>, vector<1x1x32x32xf32>
    %85 = vector.shape_cast %84 : vector<1x1x32x32xf32> to vector<32x32xf32>
    %cst_50 = arith.constant dense<0.000000e+00> : vector<32x32xf32>
    %86 = tpu.matmul %83, %85, %cst_50 {dimension_numbers = #tpu.dot_dimension_numbers<[1], [0], [0], [1], [0, 0, 1, 1], [], []>} : vector<32x32xf32>, vector<32x32xf32>, vector<32x32xf32> -> vector<32x32xf32>
    %87 = arith.addf %81, %86 : vector<32x32xf32>
    %c1_51 = arith.constant 1 : index
    %c1_52 = arith.constant 1 : index
    %c0_53 = arith.constant 0 : index
    %c0_54 = arith.constant 0 : index
    %88 = vector.load %arg1[%c1_51, %c1_52, %c0_53, %c0_54] : memref<4x3x32x32xf32, #tpu.memory_space<vmem>>, vector<1x1x32x32xf32>
    %89 = vector.shape_cast %88 : vector<1x1x32x32xf32> to vector<32x32xf32>
    %cst_55 = arith.constant dense<0.000000e+00> : vector<32x32xf32>
    %90 = tpu.matmul %80, %89, %cst_55 {dimension_numbers = #tpu.dot_dimension_numbers<[1], [0], [0], [1], [0, 0, 1, 1], [], []>} : vector<32x32xf32>, vector<32x32xf32>, vector<32x32xf32> -> vector<32x32xf32>
    %91 = arith.addf %87, %90 : vector<32x32xf32>
    %c31_i32_56 = arith.constant 31 : i32
    %92 = tpu.dynamic_rotate %80 by %c31_i32_56 dim 0 : vector<32x32xf32>, i32 -> vector<32x32xf32>
    %93 = arith.mulf %92, %24 : vector<32x32xf32>
    %c1_57 = arith.constant 1 : index
    %c2_58 = arith.constant 2 : index
    %c0_59 = arith.constant 0 : index
    %c0_60 = arith.constant 0 : index
    %94 = vector.load %arg1[%c1_57, %c2_58, %c0_59, %c0_60] : memref<4x3x32x32xf32, #tpu.memory_space<vmem>>, vector<1x1x32x32xf32>
    %95 = vector.shape_cast %94 : vector<1x1x32x32xf32> to vector<32x32xf32>
    %cst_61 = arith.constant dense<0.000000e+00> : vector<32x32xf32>
    %96 = tpu.matmul %93, %95, %cst_61 {dimension_numbers = #tpu.dot_dimension_numbers<[1], [0], [0], [1], [0, 0, 1, 1], [], []>} : vector<32x32xf32>, vector<32x32xf32>, vector<32x32xf32> -> vector<32x32xf32>
    %97 = arith.addf %91, %96 : vector<32x32xf32>
    %98 = vector.broadcast %74 : vector<1x32xf32> to vector<32x32xf32>
    %99 = arith.addf %97, %98 : vector<32x32xf32>
    %cst_62 = arith.constant dense<0.000000e+00> : vector<32xf32>
    %100 = vector.multi_reduction <add>, %99, %cst_62 [1] : vector<32x32xf32> to vector<32xf32>
    %101 = vector.shape_cast %100 : vector<32xf32> to vector<32x1xf32>
    %cst_63 = arith.constant 3.200000e+01 : f32
    %102 = vector.broadcast %cst_63 : f32 to vector<32x1xf32>
    %103 = arith.divf %101, %102 : vector<32x1xf32>
    %104 = vector.broadcast %103 : vector<32x1xf32> to vector<32x32xf32>
    %105 = arith.subf %99, %104 : vector<32x32xf32>
    %106 = arith.mulf %105, %105 : vector<32x32xf32>
    %cst_64 = arith.constant dense<0.000000e+00> : vector<32xf32>
    %107 = vector.multi_reduction <add>, %106, %cst_64 [1] : vector<32x32xf32> to vector<32xf32>
    %108 = vector.shape_cast %107 : vector<32xf32> to vector<32x1xf32>
    %cst_65 = arith.constant 3.200000e+01 : f32
    %109 = vector.broadcast %cst_65 : f32 to vector<32x1xf32>
    %110 = arith.divf %108, %109 : vector<32x1xf32>
    %cst_66 = arith.constant 9.99999974E-6 : f32
    %111 = vector.broadcast %cst_66 : f32 to vector<32x1xf32>
    %112 = arith.addf %110, %111 : vector<32x1xf32>
    %113 = math.rsqrt %112 : vector<32x1xf32>
    %114 = vector.broadcast %113 : vector<32x1xf32> to vector<32x32xf32>
    %115 = arith.mulf %105, %114 : vector<32x32xf32>
    %116 = vector.broadcast %76 : vector<1x32xf32> to vector<32x32xf32>
    %117 = arith.mulf %115, %116 : vector<32x32xf32>
    %118 = vector.broadcast %78 : vector<1x32xf32> to vector<32x32xf32>
    %119 = arith.addf %117, %118 : vector<32x32xf32>
    %120 = arith.addf %25, %119 : vector<32x32xf32>
    %c2_67 = arith.constant 2 : index
    %c0_68 = arith.constant 0 : index
    %c0_69 = arith.constant 0 : index
    %121 = vector.load %arg2[%c2_67, %c0_68, %c0_69] : memref<4x1x32xf32, #tpu.memory_space<vmem>>, vector<1x1x32xf32>
    %122 = vector.shape_cast %121 : vector<1x1x32xf32> to vector<1x32xf32>
    %c2_70 = arith.constant 2 : index
    %c0_71 = arith.constant 0 : index
    %c0_72 = arith.constant 0 : index
    %123 = vector.load %arg3[%c2_70, %c0_71, %c0_72] : memref<4x1x32xf32, #tpu.memory_space<vmem>>, vector<1x1x32xf32>
    %124 = vector.shape_cast %123 : vector<1x1x32xf32> to vector<1x32xf32>
    %c2_73 = arith.constant 2 : index
    %c0_74 = arith.constant 0 : index
    %c0_75 = arith.constant 0 : index
    %125 = vector.load %arg4[%c2_73, %c0_74, %c0_75] : memref<4x1x32xf32, #tpu.memory_space<vmem>>, vector<1x1x32xf32>
    %126 = vector.shape_cast %125 : vector<1x1x32xf32> to vector<1x32xf32>
    %cst_76 = arith.constant 0.000000e+00 : f32
    %127 = vector.broadcast %cst_76 : f32 to vector<32x32xf32>
    %128 = arith.maximumf %120, %127 : vector<32x32xf32>
    %cst_77 = arith.constant 0.000000e+00 : f32
    %129 = vector.broadcast %cst_77 : f32 to vector<32x32xf32>
    %c1_i32_78 = arith.constant 1 : i32
    %130 = tpu.dynamic_rotate %128 by %c1_i32_78 dim 0 : vector<32x32xf32>, i32 -> vector<32x32xf32>
    %131 = arith.mulf %130, %20 : vector<32x32xf32>
    %c2_79 = arith.constant 2 : index
    %c0_80 = arith.constant 0 : index
    %c0_81 = arith.constant 0 : index
    %c0_82 = arith.constant 0 : index
    %132 = vector.load %arg1[%c2_79, %c0_80, %c0_81, %c0_82] : memref<4x3x32x32xf32, #tpu.memory_space<vmem>>, vector<1x1x32x32xf32>
    %133 = vector.shape_cast %132 : vector<1x1x32x32xf32> to vector<32x32xf32>
    %cst_83 = arith.constant dense<0.000000e+00> : vector<32x32xf32>
    %134 = tpu.matmul %131, %133, %cst_83 {dimension_numbers = #tpu.dot_dimension_numbers<[1], [0], [0], [1], [0, 0, 1, 1], [], []>} : vector<32x32xf32>, vector<32x32xf32>, vector<32x32xf32> -> vector<32x32xf32>
    %135 = arith.addf %129, %134 : vector<32x32xf32>
    %c2_84 = arith.constant 2 : index
    %c1_85 = arith.constant 1 : index
    %c0_86 = arith.constant 0 : index
    %c0_87 = arith.constant 0 : index
    %136 = vector.load %arg1[%c2_84, %c1_85, %c0_86, %c0_87] : memref<4x3x32x32xf32, #tpu.memory_space<vmem>>, vector<1x1x32x32xf32>
    %137 = vector.shape_cast %136 : vector<1x1x32x32xf32> to vector<32x32xf32>
    %cst_88 = arith.constant dense<0.000000e+00> : vector<32x32xf32>
    %138 = tpu.matmul %128, %137, %cst_88 {dimension_numbers = #tpu.dot_dimension_numbers<[1], [0], [0], [1], [0, 0, 1, 1], [], []>} : vector<32x32xf32>, vector<32x32xf32>, vector<32x32xf32> -> vector<32x32xf32>
    %139 = arith.addf %135, %138 : vector<32x32xf32>
    %c31_i32_89 = arith.constant 31 : i32
    %140 = tpu.dynamic_rotate %128 by %c31_i32_89 dim 0 : vector<32x32xf32>, i32 -> vector<32x32xf32>
    %141 = arith.mulf %140, %24 : vector<32x32xf32>
    %c2_90 = arith.constant 2 : index
    %c2_91 = arith.constant 2 : index
    %c0_92 = arith.constant 0 : index
    %c0_93 = arith.constant 0 : index
    %142 = vector.load %arg1[%c2_90, %c2_91, %c0_92, %c0_93] : memref<4x3x32x32xf32, #tpu.memory_space<vmem>>, vector<1x1x32x32xf32>
    %143 = vector.shape_cast %142 : vector<1x1x32x32xf32> to vector<32x32xf32>
    %cst_94 = arith.constant dense<0.000000e+00> : vector<32x32xf32>
    %144 = tpu.matmul %141, %143, %cst_94 {dimension_numbers = #tpu.dot_dimension_numbers<[1], [0], [0], [1], [0, 0, 1, 1], [], []>} : vector<32x32xf32>, vector<32x32xf32>, vector<32x32xf32> -> vector<32x32xf32>
    %145 = arith.addf %139, %144 : vector<32x32xf32>
    %146 = vector.broadcast %122 : vector<1x32xf32> to vector<32x32xf32>
    %147 = arith.addf %145, %146 : vector<32x32xf32>
    %cst_95 = arith.constant dense<0.000000e+00> : vector<32xf32>
    %148 = vector.multi_reduction <add>, %147, %cst_95 [1] : vector<32x32xf32> to vector<32xf32>
    %149 = vector.shape_cast %148 : vector<32xf32> to vector<32x1xf32>
    %cst_96 = arith.constant 3.200000e+01 : f32
    %150 = vector.broadcast %cst_96 : f32 to vector<32x1xf32>
    %151 = arith.divf %149, %150 : vector<32x1xf32>
    %152 = vector.broadcast %151 : vector<32x1xf32> to vector<32x32xf32>
    %153 = arith.subf %147, %152 : vector<32x32xf32>
    %154 = arith.mulf %153, %153 : vector<32x32xf32>
    %cst_97 = arith.constant dense<0.000000e+00> : vector<32xf32>
    %155 = vector.multi_reduction <add>, %154, %cst_97 [1] : vector<32x32xf32> to vector<32xf32>
    %156 = vector.shape_cast %155 : vector<32xf32> to vector<32x1xf32>
    %cst_98 = arith.constant 3.200000e+01 : f32
    %157 = vector.broadcast %cst_98 : f32 to vector<32x1xf32>
    %158 = arith.divf %156, %157 : vector<32x1xf32>
    %cst_99 = arith.constant 9.99999974E-6 : f32
    %159 = vector.broadcast %cst_99 : f32 to vector<32x1xf32>
    %160 = arith.addf %158, %159 : vector<32x1xf32>
    %161 = math.rsqrt %160 : vector<32x1xf32>
    %162 = vector.broadcast %161 : vector<32x1xf32> to vector<32x32xf32>
    %163 = arith.mulf %153, %162 : vector<32x32xf32>
    %164 = vector.broadcast %124 : vector<1x32xf32> to vector<32x32xf32>
    %165 = arith.mulf %163, %164 : vector<32x32xf32>
    %166 = vector.broadcast %126 : vector<1x32xf32> to vector<32x32xf32>
    %167 = arith.addf %165, %166 : vector<32x32xf32>
    %c3 = arith.constant 3 : index
    %c0_100 = arith.constant 0 : index
    %c0_101 = arith.constant 0 : index
    %168 = vector.load %arg2[%c3, %c0_100, %c0_101] : memref<4x1x32xf32, #tpu.memory_space<vmem>>, vector<1x1x32xf32>
    %169 = vector.shape_cast %168 : vector<1x1x32xf32> to vector<1x32xf32>
    %c3_102 = arith.constant 3 : index
    %c0_103 = arith.constant 0 : index
    %c0_104 = arith.constant 0 : index
    %170 = vector.load %arg3[%c3_102, %c0_103, %c0_104] : memref<4x1x32xf32, #tpu.memory_space<vmem>>, vector<1x1x32xf32>
    %171 = vector.shape_cast %170 : vector<1x1x32xf32> to vector<1x32xf32>
    %c3_105 = arith.constant 3 : index
    %c0_106 = arith.constant 0 : index
    %c0_107 = arith.constant 0 : index
    %172 = vector.load %arg4[%c3_105, %c0_106, %c0_107] : memref<4x1x32xf32, #tpu.memory_space<vmem>>, vector<1x1x32xf32>
    %173 = vector.shape_cast %172 : vector<1x1x32xf32> to vector<1x32xf32>
    %cst_108 = arith.constant 0.000000e+00 : f32
    %174 = vector.broadcast %cst_108 : f32 to vector<32x32xf32>
    %175 = arith.maximumf %167, %174 : vector<32x32xf32>
    %cst_109 = arith.constant 0.000000e+00 : f32
    %176 = vector.broadcast %cst_109 : f32 to vector<32x32xf32>
    %c1_i32_110 = arith.constant 1 : i32
    %177 = tpu.dynamic_rotate %175 by %c1_i32_110 dim 0 : vector<32x32xf32>, i32 -> vector<32x32xf32>
    %178 = arith.mulf %177, %20 : vector<32x32xf32>
    %c3_111 = arith.constant 3 : index
    %c0_112 = arith.constant 0 : index
    %c0_113 = arith.constant 0 : index
    %c0_114 = arith.constant 0 : index
    %179 = vector.load %arg1[%c3_111, %c0_112, %c0_113, %c0_114] : memref<4x3x32x32xf32, #tpu.memory_space<vmem>>, vector<1x1x32x32xf32>
    %180 = vector.shape_cast %179 : vector<1x1x32x32xf32> to vector<32x32xf32>
    %cst_115 = arith.constant dense<0.000000e+00> : vector<32x32xf32>
    %181 = tpu.matmul %178, %180, %cst_115 {dimension_numbers = #tpu.dot_dimension_numbers<[1], [0], [0], [1], [0, 0, 1, 1], [], []>} : vector<32x32xf32>, vector<32x32xf32>, vector<32x32xf32> -> vector<32x32xf32>
    %182 = arith.addf %176, %181 : vector<32x32xf32>
    %c3_116 = arith.constant 3 : index
    %c1_117 = arith.constant 1 : index
    %c0_118 = arith.constant 0 : index
    %c0_119 = arith.constant 0 : index
    %183 = vector.load %arg1[%c3_116, %c1_117, %c0_118, %c0_119] : memref<4x3x32x32xf32, #tpu.memory_space<vmem>>, vector<1x1x32x32xf32>
    %184 = vector.shape_cast %183 : vector<1x1x32x32xf32> to vector<32x32xf32>
    %cst_120 = arith.constant dense<0.000000e+00> : vector<32x32xf32>
    %185 = tpu.matmul %175, %184, %cst_120 {dimension_numbers = #tpu.dot_dimension_numbers<[1], [0], [0], [1], [0, 0, 1, 1], [], []>} : vector<32x32xf32>, vector<32x32xf32>, vector<32x32xf32> -> vector<32x32xf32>
    %186 = arith.addf %182, %185 : vector<32x32xf32>
    %c31_i32_121 = arith.constant 31 : i32
    %187 = tpu.dynamic_rotate %175 by %c31_i32_121 dim 0 : vector<32x32xf32>, i32 -> vector<32x32xf32>
    %188 = arith.mulf %187, %24 : vector<32x32xf32>
    %c3_122 = arith.constant 3 : index
    %c2_123 = arith.constant 2 : index
    %c0_124 = arith.constant 0 : index
    %c0_125 = arith.constant 0 : index
    %189 = vector.load %arg1[%c3_122, %c2_123, %c0_124, %c0_125] : memref<4x3x32x32xf32, #tpu.memory_space<vmem>>, vector<1x1x32x32xf32>
    %190 = vector.shape_cast %189 : vector<1x1x32x32xf32> to vector<32x32xf32>
    %cst_126 = arith.constant dense<0.000000e+00> : vector<32x32xf32>
    %191 = tpu.matmul %188, %190, %cst_126 {dimension_numbers = #tpu.dot_dimension_numbers<[1], [0], [0], [1], [0, 0, 1, 1], [], []>} : vector<32x32xf32>, vector<32x32xf32>, vector<32x32xf32> -> vector<32x32xf32>
    %192 = arith.addf %186, %191 : vector<32x32xf32>
    %193 = vector.broadcast %169 : vector<1x32xf32> to vector<32x32xf32>
    %194 = arith.addf %192, %193 : vector<32x32xf32>
    %cst_127 = arith.constant dense<0.000000e+00> : vector<32xf32>
    %195 = vector.multi_reduction <add>, %194, %cst_127 [1] : vector<32x32xf32> to vector<32xf32>
    %196 = vector.shape_cast %195 : vector<32xf32> to vector<32x1xf32>
    %cst_128 = arith.constant 3.200000e+01 : f32
    %197 = vector.broadcast %cst_128 : f32 to vector<32x1xf32>
    %198 = arith.divf %196, %197 : vector<32x1xf32>
    %199 = vector.broadcast %198 : vector<32x1xf32> to vector<32x32xf32>
    %200 = arith.subf %194, %199 : vector<32x32xf32>
    %201 = arith.mulf %200, %200 : vector<32x32xf32>
    %cst_129 = arith.constant dense<0.000000e+00> : vector<32xf32>
    %202 = vector.multi_reduction <add>, %201, %cst_129 [1] : vector<32x32xf32> to vector<32xf32>
    %203 = vector.shape_cast %202 : vector<32xf32> to vector<32x1xf32>
    %cst_130 = arith.constant 3.200000e+01 : f32
    %204 = vector.broadcast %cst_130 : f32 to vector<32x1xf32>
    %205 = arith.divf %203, %204 : vector<32x1xf32>
    %cst_131 = arith.constant 9.99999974E-6 : f32
    %206 = vector.broadcast %cst_131 : f32 to vector<32x1xf32>
    %207 = arith.addf %205, %206 : vector<32x1xf32>
    %208 = math.rsqrt %207 : vector<32x1xf32>
    %209 = vector.broadcast %208 : vector<32x1xf32> to vector<32x32xf32>
    %210 = arith.mulf %200, %209 : vector<32x32xf32>
    %211 = vector.broadcast %171 : vector<1x32xf32> to vector<32x32xf32>
    %212 = arith.mulf %210, %211 : vector<32x32xf32>
    %213 = vector.broadcast %173 : vector<1x32xf32> to vector<32x32xf32>
    %214 = arith.addf %212, %213 : vector<32x32xf32>
    %215 = arith.addf %120, %214 : vector<32x32xf32>
    %c0_132 = arith.constant 0 : index
    %c0_133 = arith.constant 0 : index
    %216 = vector.load %arg5[%c0_132, %c0_133] : memref<32x32xf32, #tpu.memory_space<vmem>>, vector<32x32xf32>
    %cst_134 = arith.constant dense<0.000000e+00> : vector<32x32xf32>
    %217 = tpu.matmul %215, %216, %cst_134 {dimension_numbers = #tpu.dot_dimension_numbers<[1], [0], [0], [1], [0, 0, 1, 1], [], []>} : vector<32x32xf32>, vector<32x32xf32>, vector<32x32xf32> -> vector<32x32xf32>
    %c0_135 = arith.constant 0 : index
    %c0_136 = arith.constant 0 : index
    %218 = vector.load %arg6[%c0_135, %c0_136] : memref<1x32xf32, #tpu.memory_space<vmem>>, vector<1x32xf32>
    %219 = vector.broadcast %218 : vector<1x32xf32> to vector<32x32xf32>
    %220 = arith.addf %217, %219 : vector<32x32xf32>
    %c0_137 = arith.constant 0 : index
    %c0_138 = arith.constant 0 : index
    %c0_139 = arith.constant 0 : index
    %221 = vector.load %arg8[%c0_137, %c0_138, %c0_139] : memref<4x1x32xf32, #tpu.memory_space<vmem>>, vector<1x1x32xf32>
    %222 = vector.shape_cast %221 : vector<1x1x32xf32> to vector<1x32xf32>
    %c0_140 = arith.constant 0 : index
    %c0_141 = arith.constant 0 : index
    %c0_142 = arith.constant 0 : index
    %223 = vector.load %arg9[%c0_140, %c0_141, %c0_142] : memref<4x1x32xf32, #tpu.memory_space<vmem>>, vector<1x1x32xf32>
    %224 = vector.shape_cast %223 : vector<1x1x32xf32> to vector<1x32xf32>
    %c0_143 = arith.constant 0 : index
    %c0_144 = arith.constant 0 : index
    %c0_145 = arith.constant 0 : index
    %225 = vector.load %arg10[%c0_143, %c0_144, %c0_145] : memref<4x1x32xf32, #tpu.memory_space<vmem>>, vector<1x1x32xf32>
    %226 = vector.shape_cast %225 : vector<1x1x32xf32> to vector<1x32xf32>
    %cst_146 = arith.constant 0.000000e+00 : f32
    %227 = vector.broadcast %cst_146 : f32 to vector<32x32xf32>
    %228 = arith.maximumf %220, %227 : vector<32x32xf32>
    %cst_147 = arith.constant 0.000000e+00 : f32
    %229 = vector.broadcast %cst_147 : f32 to vector<32x32xf32>
    %c1_i32_148 = arith.constant 1 : i32
    %230 = tpu.dynamic_rotate %228 by %c1_i32_148 dim 0 : vector<32x32xf32>, i32 -> vector<32x32xf32>
    %231 = arith.mulf %230, %20 : vector<32x32xf32>
    %c0_149 = arith.constant 0 : index
    %c0_150 = arith.constant 0 : index
    %c0_151 = arith.constant 0 : index
    %c0_152 = arith.constant 0 : index
    %232 = vector.load %arg7[%c0_149, %c0_150, %c0_151, %c0_152] : memref<4x3x32x32xf32, #tpu.memory_space<vmem>>, vector<1x1x32x32xf32>
    %233 = vector.shape_cast %232 : vector<1x1x32x32xf32> to vector<32x32xf32>
    %cst_153 = arith.constant dense<0.000000e+00> : vector<32x32xf32>
    %234 = tpu.matmul %231, %233, %cst_153 {dimension_numbers = #tpu.dot_dimension_numbers<[1], [0], [0], [1], [0, 0, 1, 1], [], []>} : vector<32x32xf32>, vector<32x32xf32>, vector<32x32xf32> -> vector<32x32xf32>
    %235 = arith.addf %229, %234 : vector<32x32xf32>
    %c0_154 = arith.constant 0 : index
    %c1_155 = arith.constant 1 : index
    %c0_156 = arith.constant 0 : index
    %c0_157 = arith.constant 0 : index
    %236 = vector.load %arg7[%c0_154, %c1_155, %c0_156, %c0_157] : memref<4x3x32x32xf32, #tpu.memory_space<vmem>>, vector<1x1x32x32xf32>
    %237 = vector.shape_cast %236 : vector<1x1x32x32xf32> to vector<32x32xf32>
    %cst_158 = arith.constant dense<0.000000e+00> : vector<32x32xf32>
    %238 = tpu.matmul %228, %237, %cst_158 {dimension_numbers = #tpu.dot_dimension_numbers<[1], [0], [0], [1], [0, 0, 1, 1], [], []>} : vector<32x32xf32>, vector<32x32xf32>, vector<32x32xf32> -> vector<32x32xf32>
    %239 = arith.addf %235, %238 : vector<32x32xf32>
    %c31_i32_159 = arith.constant 31 : i32
    %240 = tpu.dynamic_rotate %228 by %c31_i32_159 dim 0 : vector<32x32xf32>, i32 -> vector<32x32xf32>
    %241 = arith.mulf %240, %24 : vector<32x32xf32>
    %c0_160 = arith.constant 0 : index
    %c2_161 = arith.constant 2 : index
    %c0_162 = arith.constant 0 : index
    %c0_163 = arith.constant 0 : index
    %242 = vector.load %arg7[%c0_160, %c2_161, %c0_162, %c0_163] : memref<4x3x32x32xf32, #tpu.memory_space<vmem>>, vector<1x1x32x32xf32>
    %243 = vector.shape_cast %242 : vector<1x1x32x32xf32> to vector<32x32xf32>
    %cst_164 = arith.constant dense<0.000000e+00> : vector<32x32xf32>
    %244 = tpu.matmul %241, %243, %cst_164 {dimension_numbers = #tpu.dot_dimension_numbers<[1], [0], [0], [1], [0, 0, 1, 1], [], []>} : vector<32x32xf32>, vector<32x32xf32>, vector<32x32xf32> -> vector<32x32xf32>
    %245 = arith.addf %239, %244 : vector<32x32xf32>
    %246 = vector.broadcast %222 : vector<1x32xf32> to vector<32x32xf32>
    %247 = arith.addf %245, %246 : vector<32x32xf32>
    %cst_165 = arith.constant dense<0.000000e+00> : vector<32xf32>
    %248 = vector.multi_reduction <add>, %247, %cst_165 [1] : vector<32x32xf32> to vector<32xf32>
    %249 = vector.shape_cast %248 : vector<32xf32> to vector<32x1xf32>
    %cst_166 = arith.constant 3.200000e+01 : f32
    %250 = vector.broadcast %cst_166 : f32 to vector<32x1xf32>
    %251 = arith.divf %249, %250 : vector<32x1xf32>
    %252 = vector.broadcast %251 : vector<32x1xf32> to vector<32x32xf32>
    %253 = arith.subf %247, %252 : vector<32x32xf32>
    %254 = arith.mulf %253, %253 : vector<32x32xf32>
    %cst_167 = arith.constant dense<0.000000e+00> : vector<32xf32>
    %255 = vector.multi_reduction <add>, %254, %cst_167 [1] : vector<32x32xf32> to vector<32xf32>
    %256 = vector.shape_cast %255 : vector<32xf32> to vector<32x1xf32>
    %cst_168 = arith.constant 3.200000e+01 : f32
    %257 = vector.broadcast %cst_168 : f32 to vector<32x1xf32>
    %258 = arith.divf %256, %257 : vector<32x1xf32>
    %cst_169 = arith.constant 9.99999974E-6 : f32
    %259 = vector.broadcast %cst_169 : f32 to vector<32x1xf32>
    %260 = arith.addf %258, %259 : vector<32x1xf32>
    %261 = math.rsqrt %260 : vector<32x1xf32>
    %262 = vector.broadcast %261 : vector<32x1xf32> to vector<32x32xf32>
    %263 = arith.mulf %253, %262 : vector<32x32xf32>
    %264 = vector.broadcast %224 : vector<1x32xf32> to vector<32x32xf32>
    %265 = arith.mulf %263, %264 : vector<32x32xf32>
    %266 = vector.broadcast %226 : vector<1x32xf32> to vector<32x32xf32>
    %267 = arith.addf %265, %266 : vector<32x32xf32>
    %c1_170 = arith.constant 1 : index
    %c0_171 = arith.constant 0 : index
    %c0_172 = arith.constant 0 : index
    %268 = vector.load %arg8[%c1_170, %c0_171, %c0_172] : memref<4x1x32xf32, #tpu.memory_space<vmem>>, vector<1x1x32xf32>
    %269 = vector.shape_cast %268 : vector<1x1x32xf32> to vector<1x32xf32>
    %c1_173 = arith.constant 1 : index
    %c0_174 = arith.constant 0 : index
    %c0_175 = arith.constant 0 : index
    %270 = vector.load %arg9[%c1_173, %c0_174, %c0_175] : memref<4x1x32xf32, #tpu.memory_space<vmem>>, vector<1x1x32xf32>
    %271 = vector.shape_cast %270 : vector<1x1x32xf32> to vector<1x32xf32>
    %c1_176 = arith.constant 1 : index
    %c0_177 = arith.constant 0 : index
    %c0_178 = arith.constant 0 : index
    %272 = vector.load %arg10[%c1_176, %c0_177, %c0_178] : memref<4x1x32xf32, #tpu.memory_space<vmem>>, vector<1x1x32xf32>
    %273 = vector.shape_cast %272 : vector<1x1x32xf32> to vector<1x32xf32>
    %cst_179 = arith.constant 0.000000e+00 : f32
    %274 = vector.broadcast %cst_179 : f32 to vector<32x32xf32>
    %275 = arith.maximumf %267, %274 : vector<32x32xf32>
    %cst_180 = arith.constant 0.000000e+00 : f32
    %276 = vector.broadcast %cst_180 : f32 to vector<32x32xf32>
    %c1_i32_181 = arith.constant 1 : i32
    %277 = tpu.dynamic_rotate %275 by %c1_i32_181 dim 0 : vector<32x32xf32>, i32 -> vector<32x32xf32>
    %278 = arith.mulf %277, %20 : vector<32x32xf32>
    %c1_182 = arith.constant 1 : index
    %c0_183 = arith.constant 0 : index
    %c0_184 = arith.constant 0 : index
    %c0_185 = arith.constant 0 : index
    %279 = vector.load %arg7[%c1_182, %c0_183, %c0_184, %c0_185] : memref<4x3x32x32xf32, #tpu.memory_space<vmem>>, vector<1x1x32x32xf32>
    %280 = vector.shape_cast %279 : vector<1x1x32x32xf32> to vector<32x32xf32>
    %cst_186 = arith.constant dense<0.000000e+00> : vector<32x32xf32>
    %281 = tpu.matmul %278, %280, %cst_186 {dimension_numbers = #tpu.dot_dimension_numbers<[1], [0], [0], [1], [0, 0, 1, 1], [], []>} : vector<32x32xf32>, vector<32x32xf32>, vector<32x32xf32> -> vector<32x32xf32>
    %282 = arith.addf %276, %281 : vector<32x32xf32>
    %c1_187 = arith.constant 1 : index
    %c1_188 = arith.constant 1 : index
    %c0_189 = arith.constant 0 : index
    %c0_190 = arith.constant 0 : index
    %283 = vector.load %arg7[%c1_187, %c1_188, %c0_189, %c0_190] : memref<4x3x32x32xf32, #tpu.memory_space<vmem>>, vector<1x1x32x32xf32>
    %284 = vector.shape_cast %283 : vector<1x1x32x32xf32> to vector<32x32xf32>
    %cst_191 = arith.constant dense<0.000000e+00> : vector<32x32xf32>
    %285 = tpu.matmul %275, %284, %cst_191 {dimension_numbers = #tpu.dot_dimension_numbers<[1], [0], [0], [1], [0, 0, 1, 1], [], []>} : vector<32x32xf32>, vector<32x32xf32>, vector<32x32xf32> -> vector<32x32xf32>
    %286 = arith.addf %282, %285 : vector<32x32xf32>
    %c31_i32_192 = arith.constant 31 : i32
    %287 = tpu.dynamic_rotate %275 by %c31_i32_192 dim 0 : vector<32x32xf32>, i32 -> vector<32x32xf32>
    %288 = arith.mulf %287, %24 : vector<32x32xf32>
    %c1_193 = arith.constant 1 : index
    %c2_194 = arith.constant 2 : index
    %c0_195 = arith.constant 0 : index
    %c0_196 = arith.constant 0 : index
    %289 = vector.load %arg7[%c1_193, %c2_194, %c0_195, %c0_196] : memref<4x3x32x32xf32, #tpu.memory_space<vmem>>, vector<1x1x32x32xf32>
    %290 = vector.shape_cast %289 : vector<1x1x32x32xf32> to vector<32x32xf32>
    %cst_197 = arith.constant dense<0.000000e+00> : vector<32x32xf32>
    %291 = tpu.matmul %288, %290, %cst_197 {dimension_numbers = #tpu.dot_dimension_numbers<[1], [0], [0], [1], [0, 0, 1, 1], [], []>} : vector<32x32xf32>, vector<32x32xf32>, vector<32x32xf32> -> vector<32x32xf32>
    %292 = arith.addf %286, %291 : vector<32x32xf32>
    %293 = vector.broadcast %269 : vector<1x32xf32> to vector<32x32xf32>
    %294 = arith.addf %292, %293 : vector<32x32xf32>
    %cst_198 = arith.constant dense<0.000000e+00> : vector<32xf32>
    %295 = vector.multi_reduction <add>, %294, %cst_198 [1] : vector<32x32xf32> to vector<32xf32>
    %296 = vector.shape_cast %295 : vector<32xf32> to vector<32x1xf32>
    %cst_199 = arith.constant 3.200000e+01 : f32
    %297 = vector.broadcast %cst_199 : f32 to vector<32x1xf32>
    %298 = arith.divf %296, %297 : vector<32x1xf32>
    %299 = vector.broadcast %298 : vector<32x1xf32> to vector<32x32xf32>
    %300 = arith.subf %294, %299 : vector<32x32xf32>
    %301 = arith.mulf %300, %300 : vector<32x32xf32>
    %cst_200 = arith.constant dense<0.000000e+00> : vector<32xf32>
    %302 = vector.multi_reduction <add>, %301, %cst_200 [1] : vector<32x32xf32> to vector<32xf32>
    %303 = vector.shape_cast %302 : vector<32xf32> to vector<32x1xf32>
    %cst_201 = arith.constant 3.200000e+01 : f32
    %304 = vector.broadcast %cst_201 : f32 to vector<32x1xf32>
    %305 = arith.divf %303, %304 : vector<32x1xf32>
    %cst_202 = arith.constant 9.99999974E-6 : f32
    %306 = vector.broadcast %cst_202 : f32 to vector<32x1xf32>
    %307 = arith.addf %305, %306 : vector<32x1xf32>
    %308 = math.rsqrt %307 : vector<32x1xf32>
    %309 = vector.broadcast %308 : vector<32x1xf32> to vector<32x32xf32>
    %310 = arith.mulf %300, %309 : vector<32x32xf32>
    %311 = vector.broadcast %271 : vector<1x32xf32> to vector<32x32xf32>
    %312 = arith.mulf %310, %311 : vector<32x32xf32>
    %313 = vector.broadcast %273 : vector<1x32xf32> to vector<32x32xf32>
    %314 = arith.addf %312, %313 : vector<32x32xf32>
    %315 = arith.addf %220, %314 : vector<32x32xf32>
    %c2_203 = arith.constant 2 : index
    %c0_204 = arith.constant 0 : index
    %c0_205 = arith.constant 0 : index
    %316 = vector.load %arg8[%c2_203, %c0_204, %c0_205] : memref<4x1x32xf32, #tpu.memory_space<vmem>>, vector<1x1x32xf32>
    %317 = vector.shape_cast %316 : vector<1x1x32xf32> to vector<1x32xf32>
    %c2_206 = arith.constant 2 : index
    %c0_207 = arith.constant 0 : index
    %c0_208 = arith.constant 0 : index
    %318 = vector.load %arg9[%c2_206, %c0_207, %c0_208] : memref<4x1x32xf32, #tpu.memory_space<vmem>>, vector<1x1x32xf32>
    %319 = vector.shape_cast %318 : vector<1x1x32xf32> to vector<1x32xf32>
    %c2_209 = arith.constant 2 : index
    %c0_210 = arith.constant 0 : index
    %c0_211 = arith.constant 0 : index
    %320 = vector.load %arg10[%c2_209, %c0_210, %c0_211] : memref<4x1x32xf32, #tpu.memory_space<vmem>>, vector<1x1x32xf32>
    %321 = vector.shape_cast %320 : vector<1x1x32xf32> to vector<1x32xf32>
    %cst_212 = arith.constant 0.000000e+00 : f32
    %322 = vector.broadcast %cst_212 : f32 to vector<32x32xf32>
    %323 = arith.maximumf %315, %322 : vector<32x32xf32>
    %cst_213 = arith.constant 0.000000e+00 : f32
    %324 = vector.broadcast %cst_213 : f32 to vector<32x32xf32>
    %c1_i32_214 = arith.constant 1 : i32
    %325 = tpu.dynamic_rotate %323 by %c1_i32_214 dim 0 : vector<32x32xf32>, i32 -> vector<32x32xf32>
    %326 = arith.mulf %325, %20 : vector<32x32xf32>
    %c2_215 = arith.constant 2 : index
    %c0_216 = arith.constant 0 : index
    %c0_217 = arith.constant 0 : index
    %c0_218 = arith.constant 0 : index
    %327 = vector.load %arg7[%c2_215, %c0_216, %c0_217, %c0_218] : memref<4x3x32x32xf32, #tpu.memory_space<vmem>>, vector<1x1x32x32xf32>
    %328 = vector.shape_cast %327 : vector<1x1x32x32xf32> to vector<32x32xf32>
    %cst_219 = arith.constant dense<0.000000e+00> : vector<32x32xf32>
    %329 = tpu.matmul %326, %328, %cst_219 {dimension_numbers = #tpu.dot_dimension_numbers<[1], [0], [0], [1], [0, 0, 1, 1], [], []>} : vector<32x32xf32>, vector<32x32xf32>, vector<32x32xf32> -> vector<32x32xf32>
    %330 = arith.addf %324, %329 : vector<32x32xf32>
    %c2_220 = arith.constant 2 : index
    %c1_221 = arith.constant 1 : index
    %c0_222 = arith.constant 0 : index
    %c0_223 = arith.constant 0 : index
    %331 = vector.load %arg7[%c2_220, %c1_221, %c0_222, %c0_223] : memref<4x3x32x32xf32, #tpu.memory_space<vmem>>, vector<1x1x32x32xf32>
    %332 = vector.shape_cast %331 : vector<1x1x32x32xf32> to vector<32x32xf32>
    %cst_224 = arith.constant dense<0.000000e+00> : vector<32x32xf32>
    %333 = tpu.matmul %323, %332, %cst_224 {dimension_numbers = #tpu.dot_dimension_numbers<[1], [0], [0], [1], [0, 0, 1, 1], [], []>} : vector<32x32xf32>, vector<32x32xf32>, vector<32x32xf32> -> vector<32x32xf32>
    %334 = arith.addf %330, %333 : vector<32x32xf32>
    %c31_i32_225 = arith.constant 31 : i32
    %335 = tpu.dynamic_rotate %323 by %c31_i32_225 dim 0 : vector<32x32xf32>, i32 -> vector<32x32xf32>
    %336 = arith.mulf %335, %24 : vector<32x32xf32>
    %c2_226 = arith.constant 2 : index
    %c2_227 = arith.constant 2 : index
    %c0_228 = arith.constant 0 : index
    %c0_229 = arith.constant 0 : index
    %337 = vector.load %arg7[%c2_226, %c2_227, %c0_228, %c0_229] : memref<4x3x32x32xf32, #tpu.memory_space<vmem>>, vector<1x1x32x32xf32>
    %338 = vector.shape_cast %337 : vector<1x1x32x32xf32> to vector<32x32xf32>
    %cst_230 = arith.constant dense<0.000000e+00> : vector<32x32xf32>
    %339 = tpu.matmul %336, %338, %cst_230 {dimension_numbers = #tpu.dot_dimension_numbers<[1], [0], [0], [1], [0, 0, 1, 1], [], []>} : vector<32x32xf32>, vector<32x32xf32>, vector<32x32xf32> -> vector<32x32xf32>
    %340 = arith.addf %334, %339 : vector<32x32xf32>
    %341 = vector.broadcast %317 : vector<1x32xf32> to vector<32x32xf32>
    %342 = arith.addf %340, %341 : vector<32x32xf32>
    %cst_231 = arith.constant dense<0.000000e+00> : vector<32xf32>
    %343 = vector.multi_reduction <add>, %342, %cst_231 [1] : vector<32x32xf32> to vector<32xf32>
    %344 = vector.shape_cast %343 : vector<32xf32> to vector<32x1xf32>
    %cst_232 = arith.constant 3.200000e+01 : f32
    %345 = vector.broadcast %cst_232 : f32 to vector<32x1xf32>
    %346 = arith.divf %344, %345 : vector<32x1xf32>
    %347 = vector.broadcast %346 : vector<32x1xf32> to vector<32x32xf32>
    %348 = arith.subf %342, %347 : vector<32x32xf32>
    %349 = arith.mulf %348, %348 : vector<32x32xf32>
    %cst_233 = arith.constant dense<0.000000e+00> : vector<32xf32>
    %350 = vector.multi_reduction <add>, %349, %cst_233 [1] : vector<32x32xf32> to vector<32xf32>
    %351 = vector.shape_cast %350 : vector<32xf32> to vector<32x1xf32>
    %cst_234 = arith.constant 3.200000e+01 : f32
    %352 = vector.broadcast %cst_234 : f32 to vector<32x1xf32>
    %353 = arith.divf %351, %352 : vector<32x1xf32>
    %cst_235 = arith.constant 9.99999974E-6 : f32
    %354 = vector.broadcast %cst_235 : f32 to vector<32x1xf32>
    %355 = arith.addf %353, %354 : vector<32x1xf32>
    %356 = math.rsqrt %355 : vector<32x1xf32>
    %357 = vector.broadcast %356 : vector<32x1xf32> to vector<32x32xf32>
    %358 = arith.mulf %348, %357 : vector<32x32xf32>
    %359 = vector.broadcast %319 : vector<1x32xf32> to vector<32x32xf32>
    %360 = arith.mulf %358, %359 : vector<32x32xf32>
    %361 = vector.broadcast %321 : vector<1x32xf32> to vector<32x32xf32>
    %362 = arith.addf %360, %361 : vector<32x32xf32>
    %c3_236 = arith.constant 3 : index
    %c0_237 = arith.constant 0 : index
    %c0_238 = arith.constant 0 : index
    %363 = vector.load %arg8[%c3_236, %c0_237, %c0_238] : memref<4x1x32xf32, #tpu.memory_space<vmem>>, vector<1x1x32xf32>
    %364 = vector.shape_cast %363 : vector<1x1x32xf32> to vector<1x32xf32>
    %c3_239 = arith.constant 3 : index
    %c0_240 = arith.constant 0 : index
    %c0_241 = arith.constant 0 : index
    %365 = vector.load %arg9[%c3_239, %c0_240, %c0_241] : memref<4x1x32xf32, #tpu.memory_space<vmem>>, vector<1x1x32xf32>
    %366 = vector.shape_cast %365 : vector<1x1x32xf32> to vector<1x32xf32>
    %c3_242 = arith.constant 3 : index
    %c0_243 = arith.constant 0 : index
    %c0_244 = arith.constant 0 : index
    %367 = vector.load %arg10[%c3_242, %c0_243, %c0_244] : memref<4x1x32xf32, #tpu.memory_space<vmem>>, vector<1x1x32xf32>
    %368 = vector.shape_cast %367 : vector<1x1x32xf32> to vector<1x32xf32>
    %cst_245 = arith.constant 0.000000e+00 : f32
    %369 = vector.broadcast %cst_245 : f32 to vector<32x32xf32>
    %370 = arith.maximumf %362, %369 : vector<32x32xf32>
    %cst_246 = arith.constant 0.000000e+00 : f32
    %371 = vector.broadcast %cst_246 : f32 to vector<32x32xf32>
    %c1_i32_247 = arith.constant 1 : i32
    %372 = tpu.dynamic_rotate %370 by %c1_i32_247 dim 0 : vector<32x32xf32>, i32 -> vector<32x32xf32>
    %373 = arith.mulf %372, %20 : vector<32x32xf32>
    %c3_248 = arith.constant 3 : index
    %c0_249 = arith.constant 0 : index
    %c0_250 = arith.constant 0 : index
    %c0_251 = arith.constant 0 : index
    %374 = vector.load %arg7[%c3_248, %c0_249, %c0_250, %c0_251] : memref<4x3x32x32xf32, #tpu.memory_space<vmem>>, vector<1x1x32x32xf32>
    %375 = vector.shape_cast %374 : vector<1x1x32x32xf32> to vector<32x32xf32>
    %cst_252 = arith.constant dense<0.000000e+00> : vector<32x32xf32>
    %376 = tpu.matmul %373, %375, %cst_252 {dimension_numbers = #tpu.dot_dimension_numbers<[1], [0], [0], [1], [0, 0, 1, 1], [], []>} : vector<32x32xf32>, vector<32x32xf32>, vector<32x32xf32> -> vector<32x32xf32>
    %377 = arith.addf %371, %376 : vector<32x32xf32>
    %c3_253 = arith.constant 3 : index
    %c1_254 = arith.constant 1 : index
    %c0_255 = arith.constant 0 : index
    %c0_256 = arith.constant 0 : index
    %378 = vector.load %arg7[%c3_253, %c1_254, %c0_255, %c0_256] : memref<4x3x32x32xf32, #tpu.memory_space<vmem>>, vector<1x1x32x32xf32>
    %379 = vector.shape_cast %378 : vector<1x1x32x32xf32> to vector<32x32xf32>
    %cst_257 = arith.constant dense<0.000000e+00> : vector<32x32xf32>
    %380 = tpu.matmul %370, %379, %cst_257 {dimension_numbers = #tpu.dot_dimension_numbers<[1], [0], [0], [1], [0, 0, 1, 1], [], []>} : vector<32x32xf32>, vector<32x32xf32>, vector<32x32xf32> -> vector<32x32xf32>
    %381 = arith.addf %377, %380 : vector<32x32xf32>
    %c31_i32_258 = arith.constant 31 : i32
    %382 = tpu.dynamic_rotate %370 by %c31_i32_258 dim 0 : vector<32x32xf32>, i32 -> vector<32x32xf32>
    %383 = arith.mulf %382, %24 : vector<32x32xf32>
    %c3_259 = arith.constant 3 : index
    %c2_260 = arith.constant 2 : index
    %c0_261 = arith.constant 0 : index
    %c0_262 = arith.constant 0 : index
    %384 = vector.load %arg7[%c3_259, %c2_260, %c0_261, %c0_262] : memref<4x3x32x32xf32, #tpu.memory_space<vmem>>, vector<1x1x32x32xf32>
    %385 = vector.shape_cast %384 : vector<1x1x32x32xf32> to vector<32x32xf32>
    %cst_263 = arith.constant dense<0.000000e+00> : vector<32x32xf32>
    %386 = tpu.matmul %383, %385, %cst_263 {dimension_numbers = #tpu.dot_dimension_numbers<[1], [0], [0], [1], [0, 0, 1, 1], [], []>} : vector<32x32xf32>, vector<32x32xf32>, vector<32x32xf32> -> vector<32x32xf32>
    %387 = arith.addf %381, %386 : vector<32x32xf32>
    %388 = vector.broadcast %364 : vector<1x32xf32> to vector<32x32xf32>
    %389 = arith.addf %387, %388 : vector<32x32xf32>
    %cst_264 = arith.constant dense<0.000000e+00> : vector<32xf32>
    %390 = vector.multi_reduction <add>, %389, %cst_264 [1] : vector<32x32xf32> to vector<32xf32>
    %391 = vector.shape_cast %390 : vector<32xf32> to vector<32x1xf32>
    %cst_265 = arith.constant 3.200000e+01 : f32
    %392 = vector.broadcast %cst_265 : f32 to vector<32x1xf32>
    %393 = arith.divf %391, %392 : vector<32x1xf32>
    %394 = vector.broadcast %393 : vector<32x1xf32> to vector<32x32xf32>
    %395 = arith.subf %389, %394 : vector<32x32xf32>
    %396 = arith.mulf %395, %395 : vector<32x32xf32>
    %cst_266 = arith.constant dense<0.000000e+00> : vector<32xf32>
    %397 = vector.multi_reduction <add>, %396, %cst_266 [1] : vector<32x32xf32> to vector<32xf32>
    %398 = vector.shape_cast %397 : vector<32xf32> to vector<32x1xf32>
    %cst_267 = arith.constant 3.200000e+01 : f32
    %399 = vector.broadcast %cst_267 : f32 to vector<32x1xf32>
    %400 = arith.divf %398, %399 : vector<32x1xf32>
    %cst_268 = arith.constant 9.99999974E-6 : f32
    %401 = vector.broadcast %cst_268 : f32 to vector<32x1xf32>
    %402 = arith.addf %400, %401 : vector<32x1xf32>
    %403 = math.rsqrt %402 : vector<32x1xf32>
    %404 = vector.broadcast %403 : vector<32x1xf32> to vector<32x32xf32>
    %405 = arith.mulf %395, %404 : vector<32x32xf32>
    %406 = vector.broadcast %366 : vector<1x32xf32> to vector<32x32xf32>
    %407 = arith.mulf %405, %406 : vector<32x32xf32>
    %408 = vector.broadcast %368 : vector<1x32xf32> to vector<32x32xf32>
    %409 = arith.addf %407, %408 : vector<32x32xf32>
    %410 = arith.addf %315, %409 : vector<32x32xf32>
    %c0_269 = arith.constant 0 : index
    %c0_270 = arith.constant 0 : index
    %411 = vector.load %arg11[%c0_269, %c0_270] : memref<32x32xf32, #tpu.memory_space<vmem>>, vector<32x32xf32>
    tpu.vector_store %arg11[%c0_269, %c0_270], %410 {strides = array<i32>} : memref<32x32xf32, #tpu.memory_space<vmem>>, vector<32x32xf32>,
    return
  }
}

</mosaic_0001>

<bundles_post_ra>
// kernel: convnet_double_layer.1
= control target key start
LH: loop header
LB: loop body
LE: loop exit
PB: predicated region body
PF: predicated region fallthrough
CT: control target
= control target key end

     0   :  { %16 = vsyncpa [#allocation3], 0  ;;  %s3917_s0 = inlined_call_operand.hbm [shape: f32[32,32], index: 0, kind: input, shape index: {}]   ;;  %s3918_s1 = inlined_call_operand.hbm [shape: f32[4,3,32,32], index: 1, kind: input, shape index: {}]   ;;  %s3919_s2 = inlined_call_operand.hbm [shape: f32[4,1,32], index: 2, kind: input, shape index: {}]   ;;  %s3920_s3 = inlined_call_operand.hbm [shape: f32[4,1,32], index: 3, kind: input, shape index: {}]   ;;  %s3921_s4 = inlined_call_operand.vmem [shape: f32[4,1,32], index: 4, kind: input, shape index: {}]   ;;  %s3922_s5 = inlined_call_operand.hbm [shape: f32[32,32], index: 5, kind: input, shape index: {}]   ;;  %s3923_s6 = inlined_call_operand.hbm [shape: f32[1,32], index: 6, kind: input, shape index: {}]   ;;  %s3924_s7 = inlined_call_operand.hbm [shape: f32[4,3,32,32], index: 7, kind: input, shape index: {}]   ;;  %s3925_s8 = inlined_call_operand.vmem [shape: f32[4,1,32], index: 8, kind: input, shape index: {}]   ;;  %s3926_s9 = inlined_call_operand.hbm [shape: f32[4,1,32], index: 9, kind: input, shape index: {}]   ;;  %s3927_s10 = inlined_call_operand.hbm [shape: f32[4,1,32], index: 10, kind: input, shape index: {}]   ;;  %s3928_s11 = inlined_call_operand.hbm [shape: f32[32,32], index: 11, kind: output, shape index: {}]  }
   0x1   :  { %17 = vsyncpa [#allocation6], 0 }
   0x2   :  { %18 = vsyncpa [#allocation9], 0 }
   0x3   :  { %19 = vsyncpa [#allocation12], 0 }
   0x4   :  { %20 = vsyncpa [#allocation15], 0 }
   0x5   :  { %21 = vsyncpa [#allocation4], 0  ;;  %s39_s19 = sshll.u32 %s3918_s1, 4  ;;  %s3113_s20 = smov [#allocation5]   ;;  %s40_s19 = int_to_ptr.hbm [resolvable:$true] %s39_s19 }
   0x6   :  { %s41_s21 = sshll.u32 %s3113_s20, 4  ;;  %s3114_s22 = smov 128   ;;  %s42_s21 = int_to_ptr.vmem [resolvable:$true] %s41_s21 }
   0x7   :  { %s3115_s23 = smov 8   ;;  %s65_s26 = sshll.u32 %s3920_s3, 4  ;;  %s66_s26 = int_to_ptr.hbm [resolvable:$true] %s65_s26 }
   0x8   :  { %47 = dma.hbm_to_vmem [thread:$0]  %s40_s19, 6144, %s42_s21, [#allocation6], %s3114_s22, %s3114_s22, %s3115_s23  }
   0x9   :  { %s3116_s27 = smov [#allocation8]   ;;  %s94_s1 = sshll.u32 %s3923_s6, 4  ;;  %s95_s1 = int_to_ptr.hbm [resolvable:$true] %s94_s1 }
   0xa   :  { %s67_s28 = sshll.u32 %s3116_s27, 4  ;;  %s3117_s12 = smov 16   ;;  %s68_s28 = int_to_ptr.vmem [resolvable:$true] %s67_s28 }
   0xb   :  { %s3118_s13 = smov 1   ;;  %s119_s16 = sshll.u32 %s3926_s9, 4  ;;  %s120_s16 = int_to_ptr.hbm [resolvable:$true] %s119_s16 }
   0xc   :  { %73 = dma.hbm_to_vmem [thread:$0]  %s66_s26, 64, %s68_s28, [#allocation9], %s3117_s12, %s3117_s12, %s3118_s13  }
   0xd   :  { %s3119_s3 = smov [#allocation11]   ;;  %s3120_s18 = smov [#allocation14]  }
   0xe   :  { %s96_s17 = sshll.u32 %s3119_s3, 4  ;;  %s121_s19 = sshll.u32 %s3120_s18, 4  ;;  %s97_s17 = int_to_ptr.vmem [resolvable:$true] %s96_s17  ;;  %s122_s19 = int_to_ptr.vmem [resolvable:$true] %s121_s19 }
   0xf   :  { %99 = dma.hbm_to_vmem [thread:$0]  %s95_s1, 16, %s97_s17, [#allocation12]  }
  0x10   :  { %s26_s21 = sshll.u32 %s3917_s0, 4  ;;  %s52_s9 = sshll.u32 %s3919_s2, 4  ;;  %s27_s21 = int_to_ptr.hbm [resolvable:$true] %s26_s21  ;;  %s53_s9 = int_to_ptr.hbm [resolvable:$true] %s52_s9 }
  0x11   :  { %127 = dma.hbm_to_vmem [thread:$0]  %s120_s16, 64, %s122_s19, [#allocation15], %s3117_s12, %s3117_s12, %s3118_s13  }
  0x12   :  { %s3121_s26 = smov [#allocation2]   ;;  %s3122_s28 = smov [#allocation7]  }
  0x13   :  { %s28_s27 = sshll.u32 %s3121_s26, 4  ;;  %s54_s0 = sshll.u32 %s3122_s28, 4  ;;  %s29_s27 = int_to_ptr.vmem [resolvable:$true] %s28_s27  ;;  %s55_s0 = int_to_ptr.vmem [resolvable:$true] %s54_s0 }
  0x14   :  { %34 = dma.hbm_to_vmem [thread:$0]  %s27_s21, 512, %s29_s27, [#allocation3], %s3114_s22, %s3114_s22, %s3115_s23  }
  0x15   :  { %s80_s1 = sshll.u32 %s3922_s5, 4  ;;  %s104_s15 = sshll.u32 %s3924_s7, 4  ;;  %s81_s1 = int_to_ptr.hbm [resolvable:$true] %s80_s1  ;;  %s105_s15 = int_to_ptr.hbm [resolvable:$true] %s104_s15 }
  0x16   :  { %60 = dma.hbm_to_vmem [thread:$0]  %s53_s9, 64, %s55_s0, [#allocation6], %s3117_s12, %s3117_s12, %s3118_s13  }
  0x17   :  { %s3123_s16 = smov [#allocation10]   ;;  %s3124_s17 = smov [#allocation13]  }
  0x18   :  { %s82_s3 = sshll.u32 %s3123_s16, 4  ;;  %s106_s5 = sshll.u32 %s3124_s17, 4  ;;  %s83_s3 = int_to_ptr.vmem [resolvable:$true] %s82_s3  ;;  %s107_s5 = int_to_ptr.vmem [resolvable:$true] %s106_s5 }
  0x19   :  { %88 = dma.hbm_to_vmem [thread:$0]  %s81_s1, 512, %s83_s3, [#allocation9], %s3114_s22, %s3114_s22, %s3115_s23  }
  0x1a   :  { %s132_s6 = sshll.u32 %s3927_s10, 4  ;;  %s3125_s7 = smov [#allocation16]   ;;  %s133_s6 = int_to_ptr.hbm [resolvable:$true] %s132_s6 }
  0x1b   :  { %112 = dma.hbm_to_vmem [thread:$0]  %s105_s15, 6144, %s107_s5, [#allocation12], %s3114_s22, %s3114_s22, %s3115_s23  }
  0x1c   :  { %s134_s20 = sshll.u32 %s3125_s7, 4  ;;  %s135_s20 = int_to_ptr.vmem [resolvable:$true] %s134_s20 }
  0x1d   :  { %140 = dma.hbm_to_vmem [thread:$0]  %s133_s6, 64, %s135_s20, [#allocation15], %s3117_s12, %s3117_s12, %s3118_s13  }
  0x1e   :  { %3101 = dma.done.wait [#allocation3], 512  }
  0x1f   :  { %3102 = vsyncadd [#allocation3], 4294966784 }
  0x20   :  { %3103 = dma.done.wait [#allocation6], 6208  }
  0x21   :  { %3104 = vsyncadd [#allocation6], 4294961088 }
  0x22   :  { %3105 = dma.done.wait [#allocation9], 576  }
  0x23   :  { %3106 = vsyncadd [#allocation9], 4294966720 }
  0x24   :  { %3107 = dma.done.wait [#allocation12], 6160  }
  0x25   :  { %3108 = vsyncadd [#allocation12], 4294961136 }
  0x26   :  { %3109 = dma.done.wait [#allocation15], 128  }
  0x27   :  { %3110 = vsyncadd [#allocation15], 4294967168  ;;  %v177_v0 = vlaneseq  ;;  %v286_v4 = vld [vmem:[#allocation5 + $0x38] sm:$0xff]  ;;  %v285_v5 = vld [vmem:[#allocation5 + $0x30] sm:$0xff]  ;;  %vm287_vm1 = vcmask 261120   ;;  %v3126_v17 = vmov 0.0  }
  0x28   :  { %2742 = vmatpush.msra.mxu1 %v286_v4  ;;  %2743 = vmatpush.msra.mxu2 %v286_v4  ;;  %v3244_v6 = vld [vmem:[#allocation2 + $0x8] sm:$0xff]  ;;  %v3246_v7 = vld [vmem:[#allocation2 + $0x10] sm:$0xff]  ;;  %v283_v11 = vld [vmem:[#allocation5 + $0x20] sm:$0xff]  ;;  %s2615_s3 = sshll.u32 %s3928_s11, 4  ;;  %s2616_s3 = int_to_ptr.hbm [resolvable:$true] %s2615_s3 }
  0x29   :  { %v3240_v1 = vshrl.u32 %v177_v0, 7  ;;  %v284_v8 = vld [vmem:[#allocation5 + $0x28] sm:$0xff]  ;;  %312 = vmatpush.msra.mxu0 %v286_v4  ;;  %2744 = vmatpush.msra.mxu3 %v286_v4  ;;  %v3253_v12 = vmax.f32 %v3244_v6, 0.0  ;;  %v3256_v13 = vmax.f32 %v3246_v7, 0.0  ;;  %v3258_v14 = vld [vmem:[#allocation2] sm:$0xff]  ;;  %v387_v15 = vld [vmem:[#allocation5 + $0x58] sm:$0xff] }
  0x2a   :  { %2745 = vmatpush.msra.mxu1 %v285_v5  ;;  %2746 = vmatpush.msra.mxu2 %v285_v5  ;;  %v281_v16 = vld [vmem:[#allocation5 + $0x18] sm:$0xff]  ;;  %v261_v20 = vmax.f32 %v3258_v14, 0.0  ;;  %v386_v23 = vld [vmem:[#allocation5 + $0x50] sm:$0xff]  ;;  %v385_v29 = vld [vmem:[#allocation5 + $0x48] sm:$0xff] }
  0x2b   :  { %v186_v2 = vand.u32 15, %v3240_v1  ;;  %v179_v3 = vadd.s32 8, %v3240_v1  ;;  %313 = vmatpush.msra.mxu0 %v285_v5  ;;  %vm269_vm2 = vcmp.lt.s32.totalorder %v3240_v1, 1  ;;  %vm374_vm3 = vcmp.lt.s32.totalorder %v3240_v1, 7  ;;  %2747 = vmatpush.msra.mxu3 %v285_v5  ;;  %v3266_v19 = vld [vmem:[#allocation2 + $0x18] sm:$0xff]  ;;  %v280_v24 = vld [vmem:[#allocation5 + $0x10] sm:$0xff] }
  0x2c   :  { %2748 = vmatpush.msra.mxu1 %v284_v8  ;;  %2749 = vmatpush.msra.mxu2 %v284_v8  ;;  %v180_v21 = vadd.s32 16, %v3240_v1  ;;  %v372_v22 = vrot.slane %v3256_v13, 1  ;;  %v264_v25 = vmax.f32 %v3266_v19, 0.0  ;;  %v265_v27 = vrot.slane %v261_v20, 7  ;;  %v279_v30 = vld [vmem:[#allocation5 + $0x8] sm:$0xff]  ;;  %v384_v33 = vld [vmem:[#allocation5 + $0x40] sm:$0xff] }
  0x2d   :  { %vm3248_vm0 = vcmp.ge.s32.totalorder %v186_v2, 1  ;;  %v193_v10 = vand.u32 15, %v179_v3  ;;  %314 = vmatpush.msra.mxu0 %v284_v8  ;;  %2750 = vmatpush.msra.mxu3 %v284_v8  ;;  %v371_v28 = vrot.slane %v3253_v12, 1  ;;  %v370_v32 = vrot.slane %v261_v20, 1  ;;  %v278_v34 = vld [vmem:[#allocation5] sm:$0xff] }
  0x2e   :  { %v3264_v18 = vsel %vm3248_vm0, 1.0, %v3126_v17  ;;  %2751 = vmatpush.msra.mxu1 %v283_v11  ;;  %2752 = vmatpush.msra.mxu2 %v283_v11  ;;  %v268_v31 = vrot.slane %v264_v25, 7  ;;  %v266_v38 = vrot.slane %v3253_v12, 7  ;;  %v200_v41 = vand.u32 15, %v180_v21  ;;  %v2770_v61 = vld [vmem:[#allocation7] ss:$0 sm:$0xff] }
  0x2f   :  { %vm3272_vm4 = vcmp.lt.s32.totalorder %v193_v10, 15  ;;  %2637 = vmatmul.msk.f32.vlgmr.msra.gmra.mxu1 %vm287_vm1, %v3253_v12  ;;  %2638 = vmatmul.msk.f32.vlgmr.msra.gmra.mxu2 %vm287_vm1, %v3256_v13  ;;  %v377_v37 = vsel %vm374_vm3, %v370_v32, %v371_v28  ;;  %v376_v40 = vsel %vm374_vm3, %v371_v28, %v372_v22  ;;  %v267_v43 = vrot.slane %v3256_v13, 7 }
  0x30   :  { %412 = vmatpush.msrb.mxu2 %v387_v15  ;;  %353 = vmatpush.msrb.mxu1 %v281_v16  ;;  %v273_v35 = vsel %vm269_vm2, %v268_v31, %v265_v27  ;;  %v3293_v39 = vsel %vm3272_vm4, 1.0, %v3126_v17  ;;  %v272_v44 = vsel %vm269_vm2, %v265_v27, %v266_v38  ;;  %vm232_vm5 = vcmp.ge.s32.totalorder %v200_v41, 1 }
  0x31   :  { %315 = vmatpush.msra.mxu0 %v283_v11  ;;  %2753 = vmatpush.msra.mxu3 %v283_v11  ;;  %v274_v36 = vmul.f32 %v3264_v18, %v273_v35  ;;  %v380_v42 = vmul.f32 %v3293_v39, %v376_v40  ;;  %v181_v45 = vadd.s32 24, %v3240_v1  ;;  %v3304_v46 = vsel %vm232_vm5, 1.0, %v3126_v17 }
  0x32   :  { %413 = vmatpush.msrb.mxu2 %v386_v23  ;;  %354 = vmatpush.msrb.mxu1 %v280_v24  ;;  %v271_v47 = vsel %vm269_vm2, %v266_v38, %v267_v43  ;;  %v373_v48 = vrot.slane %v264_v25, 1  ;;  %v270_v55 = vsel %vm269_vm2, %v267_v43, %v268_v31  ;;  %v3127_v27 = vmov 32.0  }
  0x33   :  { %2636 = vmatmul.msk.f32.vlgmr.msra.gmra.mxu0 %vm287_vm1, %v261_v20  ;;  %2639 = vmatmul.msk.f32.vlgmr.msra.gmra.mxu3 %vm287_vm1, %v264_v25  ;;  %v207_v49 = vand.u32 15, %v181_v45  ;;  %v276_v50 = vmul.f32 %v3304_v46, %v271_v47  ;;  %2795 = vrcp.f32 %v3127_v27 }
  0x34   :  { %414 = vmatpush.msrb.mxu2 %v385_v29  ;;  %355 = vmatpush.msrb.mxu1 %v279_v30  ;;  %v375_v51 = vsel %vm374_vm3, %v372_v22, %v373_v48  ;;  %v378_v53 = vsel %vm374_vm3, %v373_v48, %v370_v32 }
  0x35   :  { %vm245_vm6 = vcmp.lt.s32.totalorder %v207_v49, 15 }
  0x36   :  { %415 = vmatpush.msrb.mxu2 %v384_v33  ;;  %356 = vmatpush.msrb.mxu1 %v278_v34  ;;  %v3313_v52 = vsel %vm245_vm6, 1.0, %v3126_v17 }
  0x37   :  { %2640 = vmatmul.msk.f32.vlgmr.msrb.gmra.mxu1 %vm287_vm1, %v274_v36  ;;  %2644 = vmatmul.msk.f32.vlgmr.msrb.gmra.mxu2 %vm287_vm1, %v377_v37  ;;  %v382_v54 = vmul.f32 %v3313_v52, %v378_v53 }
  0x39   :  { %v2796_v28 = vpop.eup %2795 }
  0x3a   :  { %v453_v29 = vmul.f32 32.0, %v2796_v28  ;;  %vm457_vm7 = vweird.f32 %v2796_v28 }
  0x3c   :  { %v454_v30 = vsub.f32 1.0, %v453_v29 }
  0x3e   :  { %v455_v31 = vmul.f32 %v2796_v28, %v454_v30  ;;  %v2772_v30 = vld [vmem:[%s3921_s4] ss:$0 sm:$0xff] }
  0x3f   :  { %2641 = vmatmul.msk.f32.gmra.mxu1 %vm287_vm1, %v272_v44  ;;  %2645 = vmatmul.msk.f32.gmra.mxu2 %vm287_vm1, %v380_v42 }
  0x40   :  { %v456_v32 = vadd.f32 %v2796_v28, %v455_v31  ;;  %v573_v31 = vld [vmem:[#allocation5 + $0x68] sm:$0xff] }
  0x42   :  { %v3326_v33 = vsel %vm457_vm7, %v2796_v28, %v456_v32  ;;  %v572_v32 = vld [vmem:[#allocation5 + $0x60] sm:$0xff] }
  0x47   :  { %2642 = vmatmul.msk.f32.gmra.mxu1 %vm287_vm1, %v276_v50  ;;  %2646 = vmatmul.msk.f32.gmra.mxu2 %vm287_vm1, %v375_v51 }
  0x4f   :  { %2647 = vmatmul.msk.f32.gmra.mxu2 %vm287_vm1, %v382_v54  ;;  %2643 = vmatmul.msk.f32.gmra.mxu1 %vm287_vm1, %v270_v55 }
  0xac   :  { %v320_v56 = vpop.f32.mrf.mxu1 }
  0xb0   :  { %v317_v59 = vpop.f32.mrf.mxu0 }
  0xb2   :  { %v323_v57 = vpop.f32.mrf.mxu2 }
  0xb4   :  { %v358_v58 = vpop.f32.mrf.mxu1 }
  0xb5   :  { %v359_v60 = vadd.f32 %v358_v58, %v317_v59  ;;  %v579_v58 = vld [vmem:[#allocation5 + $0x90] sm:$0xff]  ;;  %v578_v59 = vld [vmem:[#allocation5 + $0x88] sm:$0xff] }
  0xb6   :  { %v326_v16 = vpop.f32.mrf.mxu3 }
  0xba   :  { %v417_v62 = vpop.f32.mrf.mxu2 }
  0xbb   :  { %v429_v63 = vadd.f32 %v417_v62, %v359_v60  ;;  %v577_v60 = vld [vmem:[#allocation5 + $0x80] sm:$0xff] }
  0xbc   :  { %v361_v0 = vpop.f32.mrf.mxu1 }
  0xbd   :  { %v436_v2 = vadd.f32 %v2770_v61, %v429_v63  ;;  %v362_v4 = vadd.f32 %v361_v0, %v320_v56  ;;  %v679_v63 = vld [vmem:[#allocation5 + $0xb8] sm:$0xff] }
  0xbe   :  { %704 = vmatpush.msra.mxu1 %v679_v63 }
  0xbf   :  { %v440_v3 = vsel %vm287_vm1, %v436_v2, 0.0 }
  0xc0   :  { %441 = vadd.xlane.f32.xlu0 %v440_v3  ;;  %v677_v3 = vld [vmem:[#allocation5 + $0xa8] sm:$0xff] }
  0xc2   :  { %v420_v5 = vpop.f32.mrf.mxu2 }
  0xc3   :  { %v430_v8 = vadd.f32 %v420_v5, %v362_v4  ;;  %v676_v5 = vld [vmem:[#allocation5 + $0xa0] sm:$0xff] }
  0xc4   :  { %v364_v9 = vpop.f32.mrf.mxu1 }
  0xc5   :  { %v437_v10 = vadd.f32 %v2770_v61, %v430_v8  ;;  %v365_v12 = vadd.f32 %v364_v9, %v323_v57  ;;  %v580_v57 = vld [vmem:[#allocation5 + $0x98] sm:$0xff] }
  0xc6   :  { %605 = vmatpush.msrb.mxu3 %v580_v57 }
  0xc7   :  { %v443_v11 = vsel %vm287_vm1, %v437_v10, 0.0 }
  0xc8   :  { %444 = vadd.xlane.f32.xlu1 %v443_v11  ;;  %606 = vmatpush.msrb.mxu3 %v579_v58 }
  0xca   :  { %v423_v13 = vpop.f32.mrf.mxu2  ;;  %607 = vmatpush.msrb.mxu3 %v578_v59 }
  0xcb   :  { %v431_v15 = vadd.f32 %v423_v13, %v365_v12  ;;  %v575_v13 = vld [vmem:[#allocation5 + $0x78] sm:$0xff] }
  0xcc   :  { %v367_v17 = vpop.f32.mrf.mxu1  ;;  %608 = vmatpush.msrb.mxu3 %v577_v60  ;;  %646 = vmatpush.msrb.mxu0 %v575_v13 }
  0xcd   :  { %v438_v20 = vadd.f32 %v2770_v61, %v431_v15  ;;  %v368_v21 = vadd.f32 %v367_v17, %v326_v16 }
  0xcf   :  { %v446_v22 = vsel %vm287_vm1, %v438_v20, 0.0 }
  0xd0   :  { %447 = vadd.xlane.f32.xlu1 %v446_v22 }
  0xd2   :  { %v426_v23 = vpop.f32.mrf.mxu2 }
  0xd3   :  { %v432_v24 = vadd.f32 %v426_v23, %v368_v21 }
  0xd5   :  { %v439_v25 = vadd.f32 %v2770_v61, %v432_v24 }
  0xd7   :  { %v449_v26 = vsel %vm287_vm1, %v439_v25, 0.0 }
  0xd8   :  { %450 = vadd.xlane.f32.xlu0 %v449_v26  ;;  %v3355_v26 = vld [vmem:[#allocation8] ss:$0 sm:$0xff] }
 0x133   :  { %v442_v34 = vpop.xlane.xlu0 %441 }
 0x134   :  { %v459_v35 = vmul.f32 %v3326_v33, %v442_v34 }
 0x136   :  { %v3329_v36 = vsub.f32 %v436_v2, %v459_v35  ;;  %v678_v2 = vld [vmem:[#allocation5 + $0xb0] sm:$0xff] }
 0x137   :  { %705 = vmatpush.msra.mxu1 %v678_v2 }
 0x138   :  { %v467_v37 = vmul.f32 %v3329_v36, %v3329_v36 }
 0x139   :  { %706 = vmatpush.msra.mxu1 %v677_v3 }
 0x13a   :  { %v471_v38 = vsel %vm287_vm1, %v467_v37, 0.0 }
 0x13b   :  { %472 = vadd.xlane.f32.xlu2 %v471_v38  ;;  %v445_v40 = vpop.xlane.xlu1 %444  ;;  %707 = vmatpush.msra.mxu1 %v676_v5 }
 0x13c   :  { %v460_v41 = vmul.f32 %v3326_v33, %v445_v40 }
 0x13e   :  { %v3335_v42 = vsub.f32 %v437_v10, %v460_v41 }
 0x140   :  { %v468_v43 = vmul.f32 %v3335_v42, %v3335_v42 }
 0x142   :  { %v474_v44 = vsel %vm287_vm1, %v468_v43, 0.0 }
 0x143   :  { %475 = vadd.xlane.f32.xlu0 %v474_v44  ;;  %v448_v45 = vpop.xlane.xlu1 %447 }
 0x144   :  { %v461_v47 = vmul.f32 %v3326_v33, %v448_v45 }
 0x146   :  { %v3341_v48 = vsub.f32 %v438_v20, %v461_v47 }
 0x148   :  { %v469_v49 = vmul.f32 %v3341_v48, %v3341_v48 }
 0x14a   :  { %v477_v50 = vsel %vm287_vm1, %v469_v49, 0.0 }
 0x14b   :  { %v451_v51 = vpop.xlane.xlu0 %450  ;;  %478 = vadd.xlane.f32.xlu1 %v477_v50 }
 0x14c   :  { %v462_v53 = vmul.f32 %v3326_v33, %v451_v51 }
 0x14e   :  { %v3347_v54 = vsub.f32 %v439_v25, %v462_v53  ;;  %v574_v25 = vld [vmem:[#allocation5 + $0x70] sm:$0xff] }
 0x14f   :  { %647 = vmatpush.msrb.mxu0 %v574_v25 }
 0x150   :  { %v470_v55 = vmul.f32 %v3347_v54, %v3347_v54 }
 0x151   :  { %648 = vmatpush.msrb.mxu0 %v573_v31 }
 0x152   :  { %v480_v56 = vsel %vm287_vm1, %v470_v55, 0.0 }
 0x153   :  { %481 = vadd.xlane.f32.xlu2 %v480_v56  ;;  %649 = vmatpush.msrb.mxu0 %v572_v32 }
 0x1ae   :  { %v473_v61 = vpop.xlane.xlu2 %472 }
 0x1af   :  { %v483_v62 = vmul.f32 %v473_v61, %v3326_v33 }
 0x1b1   :  { %v487_v0 = vadd.f32 1e-05, %v483_v62 }
 0x1b3   :  { %2797 = vrsqrt.f32 %v487_v0  ;;  %vm497_vm9 = vweird.f32 %v487_v0 }
 0x1b6   :  { %v476_v4 = vpop.xlane.xlu0 %475 }
 0x1b7   :  { %v484_v8 = vmul.f32 %v476_v4, %v3326_v33 }
 0x1b9   :  { %v2798_v9 = vpop.eup %2797  ;;  %v488_v10 = vadd.f32 1e-05, %v484_v8 }
 0x1ba   :  { %v492_v11 = vmul.f32 %v2798_v9, %v487_v0  ;;  %vm498_vm8 = vweird.f32 %v2798_v9 }
 0x1bb   :  { %2799 = vrsqrt.f32 %v488_v10  ;;  %vm499_vm10 = vmor %vm497_vm9, %vm498_vm8  ;;  %vm507_vm12 = vweird.f32 %v488_v10 }
 0x1bc   :  { %v493_v12 = vmul.f32 %v2798_v9, %v492_v11 }
 0x1be   :  { %v494_v15 = vmul.f32 0.5, %v493_v12  ;;  %v479_v16 = vpop.xlane.xlu1 %478 }
 0x1bf   :  { %v485_v17 = vmul.f32 %v479_v16, %v3326_v33 }
 0x1c0   :  { %v495_v20 = vsub.f32 1.5, %v494_v15 }
 0x1c1   :  { %v2800_v21 = vpop.eup %2799  ;;  %v489_v22 = vadd.f32 1e-05, %v485_v17 }
 0x1c2   :  { %v496_v23 = vmul.f32 %v2798_v9, %v495_v20  ;;  %v502_v24 = vmul.f32 %v2800_v21, %v488_v10  ;;  %vm508_vm11 = vweird.f32 %v2800_v21 }
 0x1c3   :  { %2801 = vrsqrt.f32 %v489_v22  ;;  %vm509_vm13 = vmor %vm507_vm12, %vm508_vm11  ;;  %vm517_vm15 = vweird.f32 %v489_v22 }
 0x1c4   :  { %v500_v27 = vsel %vm499_vm10, %v2798_v9, %v496_v23  ;;  %v503_v28 = vmul.f32 %v2800_v21, %v502_v24 }
 0x1c5   :  { %v531_v29 = vmul.f32 %v500_v27, %v3329_v36 }
 0x1c6   :  { %v504_v34 = vmul.f32 0.5, %v503_v28  ;;  %v482_v35 = vpop.xlane.xlu2 %481 }
 0x1c7   :  { %v486_v37 = vmul.f32 %v482_v35, %v3326_v33  ;;  %v538_v38 = vmul.f32 %v3355_v26, %v531_v29 }
 0x1c8   :  { %v505_v40 = vsub.f32 1.5, %v504_v34 }
 0x1c9   :  { %v2802_v41 = vpop.eup %2801  ;;  %v490_v43 = vadd.f32 1e-05, %v486_v37  ;;  %v545_v44 = vadd.f32 %v2772_v30, %v538_v38 }
 0x1ca   :  { %v506_v36 = vmul.f32 %v2800_v21, %v505_v40  ;;  %v512_v45 = vmul.f32 %v2802_v41, %v489_v22  ;;  %vm518_vm14 = vweird.f32 %v2802_v41 }
 0x1cb   :  { %2803 = vrsqrt.f32 %v490_v43  ;;  %v555_v47 = vmax.f32 %v545_v44, 0.0  ;;  %vm519_vm0 = vmor %vm517_vm15, %vm518_vm14  ;;  %vm527_vm5 = vweird.f32 %v490_v43 }
 0x1cc   :  { %v510_v49 = vsel %vm509_vm13, %v2800_v21, %v506_v36  ;;  %v513_v50 = vmul.f32 %v2802_v41, %v512_v45 }
 0x1cd   :  { %2649 = vmatmul.msk.f32.vlgmr.msrb.gmra.mxu3 %vm287_vm1, %v555_v47  ;;  %v532_v51 = vmul.f32 %v510_v49, %v3335_v42  ;;  %v663_v2 = vrot.slane %v555_v47, 1  ;;  %v559_v22 = vrot.slane %v555_v47, 7 }
 0x1ce   :  { %v514_v53 = vmul.f32 0.5, %v513_v50 }
 0x1cf   :  { %v539_v55 = vmul.f32 %v3355_v26, %v532_v51 }
 0x1d0   :  { %v515_v56 = vsub.f32 1.5, %v514_v53 }
 0x1d1   :  { %v2804_v57 = vpop.eup %2803  ;;  %v546_v58 = vadd.f32 %v2772_v30, %v539_v55 }
 0x1d2   :  { %v516_v59 = vmul.f32 %v2802_v41, %v515_v56  ;;  %v522_v60 = vmul.f32 %v2804_v57, %v490_v43  ;;  %vm528_vm4 = vweird.f32 %v2804_v57  ;;  %v2773_v43 = vld [vmem:[#allocation7 + $0x1] ss:$0 sm:$0xff] }
 0x1d3   :  { %v556_v61 = vmax.f32 %v546_v58, 0.0  ;;  %vm529_vm6 = vmor %vm527_vm5, %vm528_vm4 }
 0x1d4   :  { %v520_v62 = vsel %vm519_vm0, %v2802_v41, %v516_v59  ;;  %v523_v63 = vmul.f32 %v2804_v57, %v522_v60 }
 0x1d5   :  { %2650 = vmatmul.msk.f32.gmra.mxu3 %vm287_vm1, %v556_v61  ;;  %v664_v0 = vrot.slane %v556_v61, 1  ;;  %v533_v42 = vmul.f32 %v520_v62, %v3341_v48 }
 0x1d6   :  { %v524_v3 = vmul.f32 0.5, %v523_v63 }
 0x1d7   :  { %v669_v4 = vsel %vm374_vm3, %v663_v2, %v664_v0  ;;  %v540_v5 = vmul.f32 %v3355_v26, %v533_v42 }
 0x1d8   :  { %v525_v8 = vsub.f32 1.5, %v524_v3  ;;  %2657 = vmatmul.msk.f32.vlgmr.msra.gmra.mxu1 %vm287_vm1, %v669_v4 }
 0x1d9   :  { %v547_v9 = vadd.f32 %v2772_v30, %v540_v5 }
 0x1da   :  { %v526_v10 = vmul.f32 %v2804_v57, %v525_v8 }
 0x1db   :  { %v557_v11 = vmax.f32 %v547_v9, 0.0 }
 0x1dc   :  { %v530_v12 = vsel %vm529_vm6, %v2804_v57, %v526_v10 }
 0x1dd   :  { %2651 = vmatmul.msk.f32.gmra.mxu3 %vm287_vm1, %v557_v11  ;;  %v665_v13 = vrot.slane %v557_v11, 1  ;;  %v534_v48 = vmul.f32 %v530_v12, %v3347_v54 }
 0x1df   :  { %v668_v15 = vsel %vm374_vm3, %v664_v0, %v665_v13  ;;  %v541_v16 = vmul.f32 %v3355_v26, %v534_v48  ;;  %v560_v26 = vrot.slane %v556_v61, 7 }
 0x1e0   :  { %v672_v17 = vmul.f32 %v3293_v39, %v668_v15 }
 0x1e1   :  { %v548_v20 = vadd.f32 %v2772_v30, %v541_v16  ;;  %v561_v30 = vrot.slane %v557_v11, 7  ;;  %v565_v31 = vsel %vm269_vm2, %v559_v22, %v560_v26 }
 0x1e2   :  { %2658 = vmatmul.msk.f32.gmra.mxu1 %vm287_vm1, %v672_v17 }
 0x1e3   :  { %v558_v21 = vmax.f32 %v548_v20, 0.0  ;;  %v564_v32 = vsel %vm269_vm2, %v560_v26, %v561_v30 }
 0x1e4   :  { %v569_v34 = vmul.f32 %v3304_v46, %v564_v32  ;;  %v867_v32 = vld [vmem:[#allocation5 + $0xe8] sm:$0xff] }
 0x1e5   :  { %v562_v23 = vrot.slane %v558_v21, 7  ;;  %2652 = vmatmul.msk.f32.gmra.mxu3 %vm287_vm1, %v558_v21  ;;  %v666_v24 = vrot.slane %v558_v21, 1 }
 0x1e7   :  { %v566_v25 = vsel %vm269_vm2, %v562_v23, %v559_v22  ;;  %v667_v27 = vsel %vm374_vm3, %v665_v13, %v666_v24  ;;  %v670_v28 = vsel %vm374_vm3, %v666_v24, %v663_v2  ;;  %v563_v35 = vsel %vm269_vm2, %v561_v30, %v562_v23  ;;  %v869_v30 = vld [vmem:[#allocation5 + $0xf8] sm:$0xff] }
 0x1e8   :  { %v567_v54 = vmul.f32 %v3264_v18, %v566_v25  ;;  %v674_v29 = vmul.f32 %v3313_v52, %v670_v28  ;;  %894 = vmatpush.msra.mxu2 %v869_v30 }
 0x1ea   :  { %2653 = vmatmul.msk.f32.vlgmr.msrb.gmra.mxu0 %vm287_vm1, %v567_v54  ;;  %2659 = vmatmul.msk.f32.gmra.mxu1 %vm287_vm1, %v667_v27 }
 0x1f2   :  { %2654 = vmatmul.msk.f32.gmra.mxu0 %vm287_vm1, %v565_v31  ;;  %2660 = vmatmul.msk.f32.gmra.mxu1 %vm287_vm1, %v674_v29  ;;  %v868_v31 = vld [vmem:[#allocation5 + $0xf0] sm:$0xff] }
 0x1f3   :  { %895 = vmatpush.msra.mxu2 %v868_v31 }
 0x1f5   :  { %896 = vmatpush.msra.mxu2 %v867_v32 }
 0x1fa   :  { %2655 = vmatmul.msk.f32.gmra.mxu0 %vm287_vm1, %v569_v34  ;;  %v866_v34 = vld [vmem:[#allocation5 + $0xe0] sm:$0xff] }
 0x1fb   :  { %897 = vmatpush.msra.mxu2 %v866_v34 }
 0x202   :  { %2656 = vmatmul.msk.f32.gmra.mxu0 %vm287_vm1, %v563_v35 }
 0x250   :  { %v610_v37 = vpop.f32.mrf.mxu3 }
 0x255   :  { %v709_v38 = vpop.f32.mrf.mxu1 }
 0x258   :  { %v613_v36 = vpop.f32.mrf.mxu3 }
 0x25f   :  { %v712_v47 = vpop.f32.mrf.mxu1 }
 0x260   :  { %v616_v56 = vpop.f32.mrf.mxu3 }
 0x267   :  { %v651_v40 = vpop.f32.mrf.mxu0  ;;  %v715_v58 = vpop.f32.mrf.mxu1 }
 0x268   :  { %v652_v41 = vadd.f32 %v651_v40, %v610_v37  ;;  %v619_v0 = vpop.f32.mrf.mxu3  ;;  %v968_v40 = vld [vmem:[#allocation5 + $0x118] sm:$0xff] }
 0x269   :  { %993 = vmatpush.msra.mxu0 %v968_v40 }
 0x26a   :  { %v721_v44 = vadd.f32 %v709_v38, %v652_v41  ;;  %v967_v41 = vld [vmem:[#allocation5 + $0x110] sm:$0xff] }
 0x26b   :  { %994 = vmatpush.msra.mxu0 %v967_v41 }
 0x26c   :  { %v728_v45 = vadd.f32 %v2773_v43, %v721_v44  ;;  %v966_v44 = vld [vmem:[#allocation5 + $0x108] sm:$0xff] }
 0x26d   :  { %995 = vmatpush.msra.mxu0 %v966_v44 }
 0x26e   :  { %v732_v49 = vsel %vm287_vm1, %v728_v45, 0.0 }
 0x26f   :  { %733 = vadd.xlane.f32.xlu2 %v732_v49  ;;  %v654_v50 = vpop.f32.mrf.mxu0  ;;  %v718_v3 = vpop.f32.mrf.mxu1 }
 0x270   :  { %v655_v51 = vadd.f32 %v654_v50, %v613_v36 }
 0x272   :  { %v722_v53 = vadd.f32 %v712_v47, %v655_v51 }
 0x274   :  { %v729_v55 = vadd.f32 %v2773_v43, %v722_v53  ;;  %v864_v53 = vld [vmem:[#allocation5 + $0xd8] sm:$0xff] }
 0x275   :  { %935 = vmatpush.msra.mxu3 %v864_v53 }
 0x276   :  { %v735_v57 = vsel %vm287_vm1, %v729_v55, 0.0 }
 0x277   :  { %736 = vadd.xlane.f32.xlu1 %v735_v57  ;;  %v657_v59 = vpop.f32.mrf.mxu0 }
 0x278   :  { %v658_v60 = vadd.f32 %v657_v59, %v616_v56  ;;  %v862_v59 = vld [vmem:[#allocation5 + $0xc8] sm:$0xff] }
 0x27a   :  { %v723_v61 = vadd.f32 %v715_v58, %v658_v60 }
 0x27c   :  { %v730_v62 = vadd.f32 %v2773_v43, %v723_v61 }
 0x27e   :  { %v738_v63 = vsel %vm287_vm1, %v730_v62, 0.0 }
 0x27f   :  { %739 = vadd.xlane.f32.xlu2 %v738_v63  ;;  %v660_v2 = vpop.f32.mrf.mxu0  ;;  %v861_v63 = vld [vmem:[#allocation5 + $0xc0] sm:$0xff] }
 0x280   :  { %v661_v42 = vadd.f32 %v660_v2, %v619_v0 }
 0x282   :  { %v724_v4 = vadd.f32 %v718_v3, %v661_v42  ;;  %v2774_v42 = vld [vmem:[#allocation8 + $0x1] ss:$0 sm:$0xff] }
 0x284   :  { %v731_v5 = vadd.f32 %v2773_v43, %v724_v4 }
 0x286   :  { %v741_v8 = vsel %vm287_vm1, %v731_v5, 0.0 }
 0x287   :  { %742 = vadd.xlane.f32.xlu0 %v741_v8 }
 0x2e2   :  { %v734_v9 = vpop.xlane.xlu2 %733 }
 0x2e3   :  { %v744_v10 = vmul.f32 %v734_v9, %v3326_v33 }
 0x2e5   :  { %v3406_v11 = vsub.f32 %v728_v45, %v744_v10  ;;  %v965_v45 = vld [vmem:[#allocation5 + $0x100] sm:$0xff] }
 0x2e6   :  { %996 = vmatpush.msra.mxu0 %v965_v45 }
 0x2e7   :  { %v752_v12 = vmul.f32 %v3406_v11, %v3406_v11 }
 0x2e9   :  { %v756_v13 = vsel %vm287_vm1, %v752_v12, 0.0 }
 0x2ea   :  { %v737_v48 = vpop.xlane.xlu1 %736  ;;  %757 = vadd.xlane.f32.xlu0 %v756_v13 }
 0x2eb   :  { %v745_v15 = vmul.f32 %v737_v48, %v3326_v33 }
 0x2ed   :  { %v3412_v16 = vsub.f32 %v729_v55, %v745_v15  ;;  %v863_v55 = vld [vmem:[#allocation5 + $0xd0] sm:$0xff] }
 0x2ee   :  { %936 = vmatpush.msra.mxu3 %v863_v55 }
 0x2ef   :  { %v753_v17 = vmul.f32 %v3412_v16, %v3412_v16 }
 0x2f0   :  { %937 = vmatpush.msra.mxu3 %v862_v59 }
 0x2f1   :  { %v759_v20 = vsel %vm287_vm1, %v753_v17, 0.0 }
 0x2f2   :  { %760 = vadd.xlane.f32.xlu2 %v759_v20  ;;  %v740_v21 = vpop.xlane.xlu2 %739  ;;  %938 = vmatpush.msra.mxu3 %v861_v63 }
 0x2f3   :  { %v746_v22 = vmul.f32 %v740_v21, %v3326_v33 }
 0x2f5   :  { %v3418_v23 = vsub.f32 %v730_v62, %v746_v22 }
 0x2f7   :  { %v754_v24 = vmul.f32 %v3418_v23, %v3418_v23 }
 0x2f9   :  { %v762_v25 = vsel %vm287_vm1, %v754_v24, 0.0 }
 0x2fa   :  { %763 = vadd.xlane.f32.xlu0 %v762_v25  ;;  %v743_v54 = vpop.xlane.xlu0 %742 }
 0x2fb   :  { %v747_v27 = vmul.f32 %v743_v54, %v3326_v33 }
 0x2fd   :  { %v3424_v26 = vsub.f32 %v731_v5, %v747_v27  ;;  %v2775_v5 = vld [vmem:[%s3921_s4 + $0x1] ss:$0 sm:$0xff] }
 0x2ff   :  { %v755_v28 = vmul.f32 %v3424_v26, %v3424_v26 }
 0x301   :  { %v765_v29 = vsel %vm287_vm1, %v755_v28, 0.0 }
 0x302   :  { %766 = vadd.xlane.f32.xlu1 %v765_v29 }
 0x35d   :  { %v758_v35 = vpop.xlane.xlu0 %757 }
 0x35e   :  { %v768_v37 = vmul.f32 %v758_v35, %v3326_v33 }
 0x360   :  { %v772_v38 = vadd.f32 1e-05, %v768_v37 }
 0x362   :  { %2805 = vrsqrt.f32 %v772_v38  ;;  %vm782_vm8 = vweird.f32 %v772_v38 }
 0x365   :  { %v761_v43 = vpop.xlane.xlu2 %760 }
 0x366   :  { %v769_v36 = vmul.f32 %v761_v43, %v3326_v33 }
 0x368   :  { %v2806_v47 = vpop.eup %2805  ;;  %v773_v49 = vadd.f32 1e-05, %v769_v36 }
 0x369   :  { %v777_v50 = vmul.f32 %v2806_v47, %v772_v38  ;;  %vm783_vm7 = vweird.f32 %v2806_v47 }
 0x36a   :  { %2807 = vrsqrt.f32 %v773_v49  ;;  %vm784_vm9 = vmor %vm782_vm8, %vm783_vm7  ;;  %vm792_vm11 = vweird.f32 %v773_v49 }
 0x36b   :  { %v778_v51 = vmul.f32 %v2806_v47, %v777_v50 }
 0x36d   :  { %v779_v56 = vmul.f32 0.5, %v778_v51  ;;  %v764_v57 = vpop.xlane.xlu0 %763 }
 0x36e   :  { %v770_v58 = vmul.f32 %v764_v57, %v3326_v33 }
 0x36f   :  { %v780_v60 = vsub.f32 1.5, %v779_v56 }
 0x370   :  { %v2808_v61 = vpop.eup %2807  ;;  %v774_v62 = vadd.f32 1e-05, %v770_v58 }
 0x371   :  { %v781_v0 = vmul.f32 %v2806_v47, %v780_v60  ;;  %v787_v2 = vmul.f32 %v2808_v61, %v773_v49  ;;  %vm793_vm10 = vweird.f32 %v2808_v61 }
 0x372   :  { %2809 = vrsqrt.f32 %v774_v62  ;;  %vm794_vm12 = vmor %vm792_vm11, %vm793_vm10  ;;  %vm802_vm14 = vweird.f32 %v774_v62 }
 0x373   :  { %v785_v3 = vsel %vm784_vm9, %v2806_v47, %v781_v0  ;;  %v788_v4 = vmul.f32 %v2808_v61, %v787_v2 }
 0x374   :  { %v816_v8 = vmul.f32 %v785_v3, %v3406_v11 }
 0x375   :  { %v789_v9 = vmul.f32 0.5, %v788_v4  ;;  %v767_v10 = vpop.xlane.xlu1 %766 }
 0x376   :  { %v823_v12 = vmul.f32 %v2774_v42, %v816_v8  ;;  %v771_v13 = vmul.f32 %v767_v10, %v3326_v33 }
 0x377   :  { %v790_v48 = vsub.f32 1.5, %v789_v9 }
 0x378   :  { %v2810_v15 = vpop.eup %2809  ;;  %v830_v17 = vadd.f32 %v2775_v5, %v823_v12  ;;  %v775_v20 = vadd.f32 1e-05, %v771_v13 }
 0x379   :  { %v791_v21 = vmul.f32 %v2808_v61, %v790_v48  ;;  %v797_v22 = vmul.f32 %v2810_v15, %v774_v62  ;;  %vm803_vm13 = vweird.f32 %v2810_v15 }
 0x37a   :  { %2811 = vrsqrt.f32 %v775_v20  ;;  %v3438_v24 = vadd.f32 %v830_v17, %v3258_v14  ;;  %vm804_vm15 = vmor %vm802_vm14, %vm803_vm13  ;;  %vm812_vm4 = vweird.f32 %v775_v20  ;;  %v2776_v17 = vld [vmem:[#allocation7 + $0x2] ss:$0 sm:$0xff] }
 0x37b   :  { %v795_v25 = vsel %vm794_vm12, %v2808_v61, %v791_v21  ;;  %v798_v11 = vmul.f32 %v2810_v15, %v797_v22 }
 0x37c   :  { %v817_v54 = vmul.f32 %v795_v25, %v3412_v16  ;;  %v844_v27 = vmax.f32 %v3438_v24, 0.0 }
 0x37d   :  { %v799_v28 = vmul.f32 0.5, %v798_v11 }
 0x37e   :  { %2662 = vmatmul.msk.f32.vlgmr.msra.gmra.mxu2 %vm287_vm1, %v844_v27  ;;  %v824_v29 = vmul.f32 %v2774_v42, %v817_v54  ;;  %v952_v44 = vrot.slane %v844_v27, 1 }
 0x37f   :  { %v800_v30 = vsub.f32 1.5, %v799_v28 }
 0x380   :  { %v2812_v31 = vpop.eup %2811  ;;  %v831_v32 = vadd.f32 %v2775_v5, %v824_v29 }
 0x381   :  { %v801_v34 = vmul.f32 %v2810_v15, %v800_v30  ;;  %v807_v35 = vmul.f32 %v2812_v31, %v775_v20  ;;  %vm813_vm0 = vweird.f32 %v2812_v31 }
 0x382   :  { %v3444_v14 = vadd.f32 %v831_v32, %v3244_v6  ;;  %vm814_vm5 = vmor %vm812_vm4, %vm813_vm0 }
 0x383   :  { %v805_v37 = vsel %vm804_vm15, %v2810_v15, %v801_v34  ;;  %v808_v38 = vmul.f32 %v2812_v31, %v807_v35 }
 0x384   :  { %v818_v16 = vmul.f32 %v805_v37, %v3418_v23  ;;  %v845_v40 = vmax.f32 %v3444_v14, 0.0 }
 0x385   :  { %v809_v41 = vmul.f32 0.5, %v808_v38 }
 0x386   :  { %2663 = vmatmul.msk.f32.gmra.mxu2 %vm287_vm1, %v845_v40  ;;  %v953_v43 = vrot.slane %v845_v40, 1  ;;  %v825_v36 = vmul.f32 %v2774_v42, %v818_v16 }
 0x387   :  { %v810_v45 = vsub.f32 1.5, %v809_v41 }
 0x388   :  { %v958_v47 = vsel %vm374_vm3, %v952_v44, %v953_v43  ;;  %v832_v49 = vadd.f32 %v2775_v5, %v825_v36 }
 0x389   :  { %v811_v6 = vmul.f32 %v2812_v31, %v810_v45  ;;  %2670 = vmatmul.msk.f32.vlgmr.msra.gmra.mxu0 %vm287_vm1, %v958_v47 }
 0x38a   :  { %v3453_v23 = vadd.f32 %v832_v49, %v3246_v7 }
 0x38b   :  { %v815_v50 = vsel %vm814_vm5, %v2812_v31, %v811_v6 }
 0x38c   :  { %v819_v51 = vmul.f32 %v815_v50, %v3424_v26  ;;  %v846_v53 = vmax.f32 %v3453_v23, 0.0  ;;  %v848_v26 = vrot.slane %v844_v27, 7 }
 0x38e   :  { %2664 = vmatmul.msk.f32.gmra.mxu2 %vm287_vm1, %v846_v53  ;;  %v954_v55 = vrot.slane %v846_v53, 1  ;;  %v826_v56 = vmul.f32 %v2774_v42, %v819_v51  ;;  %v850_v4 = vrot.slane %v846_v53, 7 }
 0x390   :  { %v957_v57 = vsel %vm374_vm3, %v953_v43, %v954_v55  ;;  %v833_v58 = vadd.f32 %v2775_v5, %v826_v56 }
 0x391   :  { %v961_v59 = vmul.f32 %v3293_v39, %v957_v57 }
 0x392   :  { %v3462_v60 = vadd.f32 %v833_v58, %v3266_v19  ;;  %v849_v19 = vrot.slane %v845_v40, 7 }
 0x393   :  { %2671 = vmatmul.msk.f32.gmra.mxu0 %vm287_vm1, %v961_v59 }
 0x394   :  { %v847_v7 = vmax.f32 %v3462_v60, 0.0  ;;  %v854_v5 = vsel %vm269_vm2, %v848_v26, %v849_v19  ;;  %v853_v8 = vsel %vm269_vm2, %v849_v19, %v850_v4 }
 0x395   :  { %v858_v9 = vmul.f32 %v3304_v46, %v853_v8  ;;  %v1152_v8 = vld [vmem:[#allocation5 + $0x148] sm:$0xff] }
 0x396   :  { %v851_v61 = vrot.slane %v847_v7, 7  ;;  %2665 = vmatmul.msk.f32.gmra.mxu2 %vm287_vm1, %v847_v7  ;;  %v955_v62 = vrot.slane %v847_v7, 1 }
 0x398   :  { %v855_v63 = vsel %vm269_vm2, %v851_v61, %v848_v26  ;;  %v956_v2 = vsel %vm374_vm3, %v954_v55, %v955_v62  ;;  %v959_v42 = vsel %vm374_vm3, %v955_v62, %v952_v44  ;;  %v852_v10 = vsel %vm269_vm2, %v850_v4, %v851_v61  ;;  %v1154_v4 = vld [vmem:[#allocation5 + $0x158] sm:$0xff] }
 0x399   :  { %v856_v0 = vmul.f32 %v3264_v18, %v855_v63  ;;  %v963_v3 = vmul.f32 %v3313_v52, %v959_v42  ;;  %1179 = vmatpush.msrb.mxu1 %v1154_v4 }
 0x39b   :  { %2666 = vmatmul.msk.f32.vlgmr.msra.gmra.mxu3 %vm287_vm1, %v856_v0  ;;  %2672 = vmatmul.msk.f32.gmra.mxu0 %vm287_vm1, %v956_v2 }
 0x3a3   :  { %2667 = vmatmul.msk.f32.gmra.mxu3 %vm287_vm1, %v854_v5  ;;  %2673 = vmatmul.msk.f32.gmra.mxu0 %vm287_vm1, %v963_v3  ;;  %v1153_v5 = vld [vmem:[#allocation5 + $0x150] sm:$0xff] }
 0x3a4   :  { %1180 = vmatpush.msrb.mxu1 %v1153_v5 }
 0x3a6   :  { %1181 = vmatpush.msrb.mxu1 %v1152_v8 }
 0x3ab   :  { %2668 = vmatmul.msk.f32.gmra.mxu3 %vm287_vm1, %v858_v9  ;;  %v1151_v9 = vld [vmem:[#allocation5 + $0x140] sm:$0xff] }
 0x3ac   :  { %1182 = vmatpush.msrb.mxu1 %v1151_v9 }
 0x3b3   :  { %2669 = vmatmul.msk.f32.gmra.mxu3 %vm287_vm1, %v852_v10 }
 0x401   :  { %v899_v12 = vpop.f32.mrf.mxu2 }
 0x406   :  { %v998_v13 = vpop.f32.mrf.mxu0 }
 0x409   :  { %v902_v21 = vpop.f32.mrf.mxu2 }
 0x410   :  { %v1001_v25 = vpop.f32.mrf.mxu0 }
 0x411   :  { %v905_v30 = vpop.f32.mrf.mxu2 }
 0x418   :  { %v1004_v32 = vpop.f32.mrf.mxu0 }
 0x419   :  { %v908_v40 = vpop.f32.mrf.mxu2 }
 0x41e   :  { %v940_v48 = vpop.f32.mrf.mxu3 }
 0x41f   :  { %v941_v15 = vadd.f32 %v940_v48, %v899_v12 }
 0x420   :  { %v1007_v44 = vpop.f32.mrf.mxu0 }
 0x421   :  { %v1010_v20 = vadd.f32 %v998_v13, %v941_v15  ;;  %v1253_v13 = vld [vmem:[#allocation5 + $0x178] sm:$0xff]  ;;  %v1252_v15 = vld [vmem:[#allocation5 + $0x170] sm:$0xff] }
 0x422   :  { %1278 = vmatpush.msrb.mxu3 %v1253_v13 }
 0x423   :  { %v1017_v22 = vadd.f32 %v2776_v17, %v1010_v20 }
 0x424   :  { %1279 = vmatpush.msrb.mxu3 %v1252_v15 }
 0x425   :  { %v1021_v11 = vsel %vm287_vm1, %v1017_v22, 0.0 }
 0x426   :  { %1022 = vadd.xlane.f32.xlu1 %v1021_v11  ;;  %v943_v54 = vpop.f32.mrf.mxu3 }
 0x427   :  { %v944_v27 = vadd.f32 %v943_v54, %v902_v21  ;;  %v1250_v21 = vld [vmem:[#allocation5 + $0x160] sm:$0xff] }
 0x429   :  { %v1011_v28 = vadd.f32 %v1001_v25, %v944_v27 }
 0x42b   :  { %v1018_v29 = vadd.f32 %v2776_v17, %v1011_v28  ;;  %v1149_v28 = vld [vmem:[#allocation5 + $0x138] sm:$0xff] }
 0x42c   :  { %1220 = vmatpush.msrb.mxu2 %v1149_v28 }
 0x42d   :  { %v1024_v31 = vsel %vm287_vm1, %v1018_v29, 0.0 }
 0x42e   :  { %1025 = vadd.xlane.f32.xlu0 %v1024_v31  ;;  %v946_v34 = vpop.f32.mrf.mxu3 }
 0x42f   :  { %v947_v35 = vadd.f32 %v946_v34, %v905_v30 }
 0x431   :  { %v1012_v37 = vadd.f32 %v1004_v32, %v947_v35  ;;  %v1147_v32 = vld [vmem:[#allocation5 + $0x128] sm:$0xff] }
 0x433   :  { %v1019_v38 = vadd.f32 %v2776_v17, %v1012_v37  ;;  %v1146_v37 = vld [vmem:[#allocation5 + $0x120] sm:$0xff] }
 0x435   :  { %v1027_v16 = vsel %vm287_vm1, %v1019_v38, 0.0 }
 0x436   :  { %1028 = vadd.xlane.f32.xlu1 %v1027_v16  ;;  %v949_v41 = vpop.f32.mrf.mxu3 }
 0x437   :  { %v950_v43 = vadd.f32 %v949_v41, %v908_v40 }
 0x439   :  { %v1013_v36 = vadd.f32 %v1007_v44, %v950_v43  ;;  %v2777_v43 = vld [vmem:[#allocation8 + $0x2] ss:$0 sm:$0xff] }
 0x43b   :  { %v1020_v45 = vadd.f32 %v2776_v17, %v1013_v36  ;;  %v1251_v17 = vld [vmem:[#allocation5 + $0x168] sm:$0xff] }
 0x43c   :  { %1280 = vmatpush.msrb.mxu3 %v1251_v17 }
 0x43d   :  { %v1030_v47 = vsel %vm287_vm1, %v1020_v45, 0.0 }
 0x43e   :  { %1031 = vadd.xlane.f32.xlu2 %v1030_v47  ;;  %1281 = vmatpush.msrb.mxu3 %v1250_v21  ;;  %v2778_v47 = vld [vmem:[%s3921_s4 + $0x2] ss:$0 sm:$0xff] }
 0x499   :  { %v1023_v49 = vpop.xlane.xlu1 %1022 }
 0x49a   :  { %v1033_v6 = vmul.f32 %v1023_v49, %v3326_v33 }
 0x49c   :  { %v3493_v50 = vsub.f32 %v1017_v22, %v1033_v6 }
 0x49e   :  { %v1041_v51 = vmul.f32 %v3493_v50, %v3493_v50 }
 0x4a0   :  { %v1045_v53 = vsel %vm287_vm1, %v1041_v51, 0.0 }
 0x4a1   :  { %v1026_v55 = vpop.xlane.xlu0 %1025  ;;  %1046 = vadd.xlane.f32.xlu2 %v1045_v53 }
 0x4a2   :  { %v1034_v56 = vmul.f32 %v1026_v55, %v3326_v33 }
 0x4a4   :  { %v3499_v57 = vsub.f32 %v1018_v29, %v1034_v56  ;;  %v1148_v29 = vld [vmem:[#allocation5 + $0x130] sm:$0xff] }
 0x4a5   :  { %1221 = vmatpush.msrb.mxu2 %v1148_v29 }
 0x4a6   :  { %v1042_v58 = vmul.f32 %v3499_v57, %v3499_v57 }
 0x4a7   :  { %1222 = vmatpush.msrb.mxu2 %v1147_v32 }
 0x4a8   :  { %v1048_v59 = vsel %vm287_vm1, %v1042_v58, 0.0 }
 0x4a9   :  { %1049 = vadd.xlane.f32.xlu1 %v1048_v59  ;;  %v1029_v7 = vpop.xlane.xlu1 %1028  ;;  %1223 = vmatpush.msrb.mxu2 %v1146_v37 }
 0x4aa   :  { %v1035_v26 = vmul.f32 %v1029_v7, %v3326_v33 }
 0x4ac   :  { %v3505_v61 = vsub.f32 %v1019_v38, %v1035_v26 }
 0x4ae   :  { %v1043_v62 = vmul.f32 %v3505_v61, %v3505_v61 }
 0x4b0   :  { %v1051_v63 = vsel %vm287_vm1, %v1043_v62, 0.0 }
 0x4b1   :  { %1052 = vadd.xlane.f32.xlu2 %v1051_v63  ;;  %v1032_v0 = vpop.xlane.xlu2 %1031 }
 0x4b2   :  { %v1036_v2 = vmul.f32 %v1032_v0, %v3326_v33 }
 0x4b4   :  { %v3511_v19 = vsub.f32 %v1020_v45, %v1036_v2 }
 0x4b6   :  { %v1044_v42 = vmul.f32 %v3511_v19, %v3511_v19 }
 0x4b8   :  { %v1054_v3 = vsel %vm287_vm1, %v1044_v42, 0.0 }
 0x4b9   :  { %1055 = vadd.xlane.f32.xlu0 %v1054_v3 }
 0x514   :  { %v1047_v10 = vpop.xlane.xlu2 %1046 }
 0x515   :  { %v1057_v12 = vmul.f32 %v1047_v10, %v3326_v33 }
 0x517   :  { %v1061_v48 = vadd.f32 1e-05, %v1057_v12 }
 0x519   :  { %2813 = vrsqrt.f32 %v1061_v48  ;;  %vm1071_vm7 = vweird.f32 %v1061_v48 }
 0x51c   :  { %v1050_v20 = vpop.xlane.xlu1 %1049 }
 0x51d   :  { %v1058_v22 = vmul.f32 %v1050_v20, %v3326_v33 }
 0x51f   :  { %v2814_v25 = vpop.eup %2813  ;;  %v1062_v11 = vadd.f32 1e-05, %v1058_v22 }
 0x520   :  { %v1066_v54 = vmul.f32 %v2814_v25, %v1061_v48  ;;  %vm1072_vm6 = vweird.f32 %v2814_v25 }
 0x521   :  { %2815 = vrsqrt.f32 %v1062_v11  ;;  %vm1073_vm8 = vmor %vm1071_vm7, %vm1072_vm6  ;;  %vm1081_vm10 = vweird.f32 %v1062_v11 }
 0x522   :  { %v1067_v27 = vmul.f32 %v2814_v25, %v1066_v54 }
 0x524   :  { %v1068_v30 = vmul.f32 0.5, %v1067_v27  ;;  %v1053_v31 = vpop.xlane.xlu2 %1052 }
 0x525   :  { %v1059_v34 = vmul.f32 %v1053_v31, %v3326_v33 }
 0x526   :  { %v1069_v35 = vsub.f32 1.5, %v1068_v30 }
 0x527   :  { %v2816_v38 = vpop.eup %2815  ;;  %v1063_v16 = vadd.f32 1e-05, %v1059_v34 }
 0x528   :  { %v1070_v40 = vmul.f32 %v2814_v25, %v1069_v35  ;;  %v1076_v41 = vmul.f32 %v2816_v38, %v1062_v11  ;;  %vm1082_vm9 = vweird.f32 %v2816_v38 }
 0x529   :  { %2817 = vrsqrt.f32 %v1063_v16  ;;  %vm1083_vm11 = vmor %vm1081_vm10, %vm1082_vm9  ;;  %vm1091_vm13 = vweird.f32 %v1063_v16 }
 0x52a   :  { %v1074_v44 = vsel %vm1073_vm8, %v2814_v25, %v1070_v40  ;;  %v1077_v36 = vmul.f32 %v2816_v38, %v1076_v41 }
 0x52b   :  { %v1105_v45 = vmul.f32 %v1074_v44, %v3493_v50 }
 0x52c   :  { %v1078_v49 = vmul.f32 0.5, %v1077_v36  ;;  %v1056_v6 = vpop.xlane.xlu0 %1055 }
 0x52d   :  { %v1112_v51 = vmul.f32 %v2777_v43, %v1105_v45  ;;  %v1060_v53 = vmul.f32 %v1056_v6, %v3326_v33 }
 0x52e   :  { %v1079_v55 = vsub.f32 1.5, %v1078_v49 }
 0x52f   :  { %v2818_v56 = vpop.eup %2817  ;;  %v1064_v58 = vadd.f32 1e-05, %v1060_v53  ;;  %v1119_v59 = vadd.f32 %v2778_v47, %v1112_v51 }
 0x530   :  { %v1080_v7 = vmul.f32 %v2816_v38, %v1079_v55  ;;  %v1086_v26 = vmul.f32 %v2818_v56, %v1063_v16  ;;  %vm1092_vm12 = vweird.f32 %v2818_v56 }
 0x531   :  { %2819 = vrsqrt.f32 %v1064_v58  ;;  %v1129_v50 = vmax.f32 %v1119_v59, 0.0  ;;  %vm1093_vm14 = vmor %vm1091_vm13, %vm1092_vm12  ;;  %vm1101_vm0 = vweird.f32 %v1064_v58 }
 0x532   :  { %v1084_v62 = vsel %vm1083_vm11, %v2816_v38, %v1080_v7  ;;  %v1087_v63 = vmul.f32 %v2818_v56, %v1086_v26 }
 0x533   :  { %2675 = vmatmul.msk.f32.vlgmr.msrb.gmra.mxu1 %vm287_vm1, %v1129_v50  ;;  %v1106_v0 = vmul.f32 %v1084_v62, %v3499_v57  ;;  %v1237_v15 = vrot.slane %v1129_v50, 1  ;;  %v1133_v35 = vrot.slane %v1129_v50, 7 }
 0x534   :  { %v1088_v2 = vmul.f32 0.5, %v1087_v63 }
 0x535   :  { %v1113_v42 = vmul.f32 %v2777_v43, %v1106_v0 }
 0x536   :  { %v1089_v3 = vsub.f32 1.5, %v1088_v2 }
 0x537   :  { %v2820_v4 = vpop.eup %2819  ;;  %v1120_v5 = vadd.f32 %v2778_v47, %v1113_v42 }
 0x538   :  { %v1090_v8 = vmul.f32 %v2818_v56, %v1089_v3  ;;  %v1096_v9 = vmul.f32 %v2820_v4, %v1064_v58  ;;  %vm1102_vm15 = vweird.f32 %v2820_v4  ;;  %v2779_v58 = vld [vmem:[#allocation7 + $0x3] ss:$0 sm:$0xff] }
 0x539   :  { %v1130_v10 = vmax.f32 %v1120_v5, 0.0  ;;  %vm1103_vm4 = vmor %vm1101_vm0, %vm1102_vm15 }
 0x53a   :  { %v1094_v12 = vsel %vm1093_vm14, %v2818_v56, %v1090_v8  ;;  %v1097_v13 = vmul.f32 %v2820_v4, %v1096_v9 }
 0x53b   :  { %2676 = vmatmul.msk.f32.gmra.mxu1 %vm287_vm1, %v1130_v10  ;;  %v1238_v48 = vrot.slane %v1130_v10, 1  ;;  %v1107_v17 = vmul.f32 %v1094_v12, %v3505_v61  ;;  %v1134_v41 = vrot.slane %v1130_v10, 7 }
 0x53c   :  { %v1098_v57 = vmul.f32 0.5, %v1097_v13 }
 0x53d   :  { %v1243_v20 = vsel %vm374_vm3, %v1237_v15, %v1238_v48  ;;  %v1114_v21 = vmul.f32 %v2777_v43, %v1107_v17  ;;  %v1139_v45 = vsel %vm269_vm2, %v1133_v35, %v1134_v41 }
 0x53e   :  { %v1099_v22 = vsub.f32 1.5, %v1098_v57  ;;  %2683 = vmatmul.msk.f32.vlgmr.msrb.gmra.mxu3 %vm287_vm1, %v1243_v20 }
 0x53f   :  { %v1121_v25 = vadd.f32 %v2778_v47, %v1114_v21 }
 0x540   :  { %v1100_v11 = vmul.f32 %v2820_v4, %v1099_v22 }
 0x541   :  { %v1131_v54 = vmax.f32 %v1121_v25, 0.0 }
 0x542   :  { %v1104_v27 = vsel %vm1103_vm4, %v2820_v4, %v1100_v11  ;;  %v1415_v11 = vld [vmem:[#allocation10 + $0x18] sm:$0xff] }
 0x543   :  { %2677 = vmatmul.msk.f32.gmra.mxu1 %vm287_vm1, %v1131_v54  ;;  %v1239_v28 = vrot.slane %v1131_v54, 1  ;;  %v1108_v61 = vmul.f32 %v1104_v27, %v3511_v19  ;;  %v1135_v36 = vrot.slane %v1131_v54, 7  ;;  %1444 = vmatpush.msrb.mxu0 %v1415_v11 }
 0x545   :  { %v1242_v29 = vsel %vm374_vm3, %v1238_v48, %v1239_v28  ;;  %v1115_v30 = vmul.f32 %v2777_v43, %v1108_v61 }
 0x546   :  { %v1246_v31 = vmul.f32 %v3293_v39, %v1242_v29 }
 0x547   :  { %v1122_v32 = vadd.f32 %v2778_v47, %v1115_v30  ;;  %v1138_v47 = vsel %vm269_vm2, %v1134_v41, %v1135_v36 }
 0x548   :  { %2684 = vmatmul.msk.f32.gmra.mxu3 %vm287_vm1, %v1246_v31  ;;  %v1143_v49 = vmul.f32 %v3304_v46, %v1138_v47  ;;  %v1413_v47 = vld [vmem:[#allocation10 + $0x8] sm:$0xff] }
 0x549   :  { %v1132_v34 = vmax.f32 %v1122_v32, 0.0 }
 0x54b   :  { %v1136_v37 = vrot.slane %v1132_v34, 7  ;;  %2678 = vmatmul.msk.f32.gmra.mxu1 %vm287_vm1, %v1132_v34  ;;  %v1240_v38 = vrot.slane %v1132_v34, 1 }
 0x54d   :  { %v1140_v16 = vsel %vm269_vm2, %v1136_v37, %v1133_v35  ;;  %v1241_v40 = vsel %vm374_vm3, %v1239_v28, %v1240_v38  ;;  %v1244_v43 = vsel %vm374_vm3, %v1240_v38, %v1237_v15  ;;  %v1137_v6 = vsel %vm269_vm2, %v1135_v36, %v1136_v37 }
 0x54e   :  { %v1141_v19 = vmul.f32 %v3264_v18, %v1140_v16  ;;  %v1248_v44 = vmul.f32 %v3313_v52, %v1244_v43 }
 0x550   :  { %2679 = vmatmul.msk.f32.vlgmr.msrb.gmra.mxu2 %vm287_vm1, %v1141_v19  ;;  %2685 = vmatmul.msk.f32.gmra.mxu3 %vm287_vm1, %v1241_v40 }
 0x558   :  { %2680 = vmatmul.msk.f32.gmra.mxu2 %vm287_vm1, %v1139_v45  ;;  %2686 = vmatmul.msk.f32.gmra.mxu3 %vm287_vm1, %v1248_v44  ;;  %v1414_v45 = vld [vmem:[#allocation10 + $0x10] sm:$0xff] }
 0x559   :  { %1445 = vmatpush.msrb.mxu0 %v1414_v45 }
 0x55b   :  { %1446 = vmatpush.msrb.mxu0 %v1413_v47 }
 0x560   :  { %2681 = vmatmul.msk.f32.gmra.mxu2 %vm287_vm1, %v1143_v49  ;;  %v1412_v49 = vld [vmem:[#allocation10] sm:$0xff] }
 0x561   :  { %1447 = vmatpush.msrb.mxu0 %v1412_v49 }
 0x568   :  { %2682 = vmatmul.msk.f32.gmra.mxu2 %vm287_vm1, %v1137_v6 }
 0x5b0   :  { %v1184_v51 = vpop.f32.mrf.mxu1 }
 0x5b8   :  { %v1187_v7 = vpop.f32.mrf.mxu1 }
 0x5c0   :  { %v1190_v3 = vpop.f32.mrf.mxu1 }
 0x5c1   :  { %v1283_v53 = vpop.f32.mrf.mxu3 }
 0x5c8   :  { %v1193_v48 = vpop.f32.mrf.mxu1 }
 0x5cb   :  { %v1286_v50 = vpop.f32.mrf.mxu3 }
 0x5d3   :  { %v1225_v55 = vpop.f32.mrf.mxu2  ;;  %v1289_v5 = vpop.f32.mrf.mxu3 }
 0x5d4   :  { %v1226_v56 = vadd.f32 %v1225_v55, %v1184_v51 }
 0x5d6   :  { %v1295_v59 = vadd.f32 %v1283_v53, %v1226_v56 }
 0x5d8   :  { %v1302_v26 = vadd.f32 %v2779_v58, %v1295_v59 }
 0x5da   :  { %v1306_v62 = vsel %vm287_vm1, %v1302_v26, 0.0 }
 0x5db   :  { %1307 = vadd.xlane.f32.xlu0 %v1306_v62  ;;  %v1228_v63 = vpop.f32.mrf.mxu2  ;;  %v1292_v57 = vpop.f32.mrf.mxu3 }
 0x5dc   :  { %v1229_v0 = vadd.f32 %v1228_v63, %v1187_v7 }
 0x5de   :  { %v1296_v2 = vadd.f32 %v1286_v50, %v1229_v0 }
 0x5e0   :  { %v1303_v42 = vadd.f32 %v2779_v58, %v1296_v2 }
 0x5e2   :  { %v1309_v4 = vsel %vm287_vm1, %v1303_v42, 0.0 }
 0x5e3   :  { %1310 = vadd.xlane.f32.xlu1 %v1309_v4  ;;  %v1231_v8 = vpop.f32.mrf.mxu2 }
 0x5e4   :  { %v1232_v9 = vadd.f32 %v1231_v8, %v1190_v3 }
 0x5e6   :  { %v1297_v10 = vadd.f32 %v1289_v5, %v1232_v9  ;;  %v2780_v5 = vld [vmem:[#allocation8 + $0x3] ss:$0 sm:$0xff] }
 0x5e8   :  { %v1304_v12 = vadd.f32 %v2779_v58, %v1297_v10  ;;  %v2781_v10 = vld [vmem:[%s3921_s4 + $0x3] ss:$0 sm:$0xff] }
 0x5ea   :  { %v1312_v13 = vsel %vm287_vm1, %v1304_v12, 0.0 }
 0x5eb   :  { %1313 = vadd.xlane.f32.xlu2 %v1312_v13  ;;  %v1234_v15 = vpop.f32.mrf.mxu2  ;;  %v1488_v13 = vld [vmem:[#allocation13 + $0x38] sm:$0xff] }
 0x5ec   :  { %v1235_v17 = vadd.f32 %v1234_v15, %v1193_v48  ;;  %1513 = vmatpush.msra.mxu1 %v1488_v13 }
 0x5ee   :  { %v1298_v20 = vadd.f32 %v1292_v57, %v1235_v17 }
 0x5f0   :  { %v1305_v21 = vadd.f32 %v2779_v58, %v1298_v20 }
 0x5f2   :  { %v1315_v22 = vsel %vm287_vm1, %v1305_v21, 0.0 }
 0x5f3   :  { %1316 = vadd.xlane.f32.xlu0 %v1315_v22 }
 0x64e   :  { %v1308_v25 = vpop.xlane.xlu0 %1307 }
 0x64f   :  { %v1318_v54 = vmul.f32 %v1308_v25, %v3326_v33 }
 0x651   :  { %v1322_v27 = vsub.f32 %v1302_v26, %v1318_v54 }
 0x653   :  { %v1326_v28 = vmul.f32 %v1322_v27, %v1322_v27 }
 0x655   :  { %v1330_v61 = vsel %vm287_vm1, %v1326_v28, 0.0 }
 0x656   :  { %1331 = vadd.xlane.f32.xlu1 %v1330_v61  ;;  %v1311_v29 = vpop.xlane.xlu1 %1310 }
 0x657   :  { %v1319_v30 = vmul.f32 %v1311_v29, %v3326_v33 }
 0x659   :  { %v3566_v31 = vsub.f32 %v1303_v42, %v1319_v30 }
 0x65b   :  { %v1327_v32 = vmul.f32 %v3566_v31, %v3566_v31 }
 0x65d   :  { %v1333_v34 = vsel %vm287_vm1, %v1327_v32, 0.0 }
 0x65e   :  { %1334 = vadd.xlane.f32.xlu2 %v1333_v34  ;;  %v1314_v35 = vpop.xlane.xlu2 %1313 }
 0x65f   :  { %v1320_v37 = vmul.f32 %v1314_v35, %v3326_v33 }
 0x661   :  { %v3572_v38 = vsub.f32 %v1304_v12, %v1320_v37 }
 0x663   :  { %v1328_v16 = vmul.f32 %v3572_v38, %v3572_v38 }
 0x665   :  { %v1336_v19 = vsel %vm287_vm1, %v1328_v16, 0.0 }
 0x666   :  { %1337 = vadd.xlane.f32.xlu0 %v1336_v19  ;;  %v1317_v40 = vpop.xlane.xlu0 %1316 }
 0x667   :  { %v1321_v41 = vmul.f32 %v1317_v40, %v3326_v33 }
 0x669   :  { %v3578_v43 = vsub.f32 %v1305_v21, %v1321_v41 }
 0x66b   :  { %v1329_v44 = vmul.f32 %v3578_v43, %v3578_v43 }
 0x66d   :  { %v1339_v36 = vsel %vm287_vm1, %v1329_v44, 0.0 }
 0x66e   :  { %1340 = vadd.xlane.f32.xlu1 %v1339_v36 }
 0x6c9   :  { %v1332_v6 = vpop.xlane.xlu1 %1331 }
 0x6ca   :  { %v1342_v51 = vmul.f32 %v1332_v6, %v3326_v33 }
 0x6cc   :  { %v1346_v53 = vadd.f32 1e-05, %v1342_v51 }
 0x6ce   :  { %2821 = vrsqrt.f32 %v1346_v53  ;;  %vm1356_vm6 = vweird.f32 %v1346_v53 }
 0x6d1   :  { %v1335_v55 = vpop.xlane.xlu2 %1334 }
 0x6d2   :  { %v1343_v56 = vmul.f32 %v1335_v55, %v3326_v33 }
 0x6d4   :  { %v2822_v58 = vpop.eup %2821  ;;  %v1347_v59 = vadd.f32 1e-05, %v1343_v56  ;;  %v1487_v56 = vld [vmem:[#allocation13 + $0x30] sm:$0xff] }
 0x6d5   :  { %v1351_v7 = vmul.f32 %v2822_v58, %v1346_v53  ;;  %vm1357_vm5 = vweird.f32 %v2822_v58  ;;  %1514 = vmatpush.msra.mxu1 %v1487_v56 }
 0x6d6   :  { %2823 = vrsqrt.f32 %v1347_v59  ;;  %vm1358_vm7 = vmor %vm1356_vm6, %vm1357_vm5  ;;  %vm1366_vm9 = vweird.f32 %v1347_v59 }
 0x6d7   :  { %v1352_v26 = vmul.f32 %v2822_v58, %v1351_v7  ;;  %v1483_v7 = vld [vmem:[#allocation13 + $0x18] sm:$0xff] }
 0x6d8   :  { %1554 = vmatpush.msra.mxu2 %v1483_v7 }
 0x6d9   :  { %v1353_v50 = vmul.f32 0.5, %v1352_v26  ;;  %v1338_v62 = vpop.xlane.xlu0 %1337  ;;  %v1587_v26 = vld [vmem:[#allocation13 + $0x58] sm:$0xff] }
 0x6da   :  { %v1344_v63 = vmul.f32 %v1338_v62, %v3326_v33  ;;  %1612 = vmatpush.msra.mxu3 %v1587_v26  ;;  %v1584_v62 = vld [vmem:[#allocation13 + $0x40] sm:$0xff] }
 0x6db   :  { %v1354_v0 = vsub.f32 1.5, %v1353_v50  ;;  %v1482_v50 = vld [vmem:[#allocation13 + $0x10] sm:$0xff] }
 0x6dc   :  { %v2824_v2 = vpop.eup %2823  ;;  %v1348_v42 = vadd.f32 1e-05, %v1344_v63  ;;  %1555 = vmatpush.msra.mxu2 %v1482_v50  ;;  %v2782_v63 = vld [vmem:[#allocation11] ss:$0 sm:$0xff] }
 0x6dd   :  { %v1355_v3 = vmul.f32 %v2822_v58, %v1354_v0  ;;  %v1361_v4 = vmul.f32 %v2824_v2, %v1347_v59  ;;  %vm1367_vm8 = vweird.f32 %v2824_v2  ;;  %v1485_v59 = vld [vmem:[#allocation13 + $0x20] sm:$0xff] }
 0x6de   :  { %2825 = vrsqrt.f32 %v1348_v42  ;;  %vm1368_vm10 = vmor %vm1366_vm9, %vm1367_vm8  ;;  %vm1376_vm12 = vweird.f32 %v1348_v42  ;;  %v1480_v0 = vld [vmem:[#allocation13] sm:$0xff] }
 0x6df   :  { %v1359_v8 = vsel %vm1358_vm7, %v2822_v58, %v1355_v3  ;;  %v1362_v9 = vmul.f32 %v2824_v2, %v1361_v4  ;;  %v1486_v58 = vld [vmem:[#allocation13 + $0x28] sm:$0xff] }
 0x6e0   :  { %v1390_v12 = vmul.f32 %v1359_v8, %v1322_v27  ;;  %1515 = vmatpush.msra.mxu1 %v1486_v58 }
 0x6e1   :  { %v1363_v48 = vmul.f32 0.5, %v1362_v9  ;;  %v1341_v15 = vpop.xlane.xlu1 %1340 }
 0x6e2   :  { %v1397_v17 = vmul.f32 %v2780_v5, %v1390_v12  ;;  %v1345_v57 = vmul.f32 %v1341_v15, %v3326_v33  ;;  %1516 = vmatpush.msra.mxu1 %v1485_v59 }
 0x6e3   :  { %v1364_v20 = vsub.f32 1.5, %v1363_v48 }
 0x6e4   :  { %v2826_v21 = vpop.eup %2825  ;;  %v1404_v22 = vadd.f32 %v2781_v10, %v1397_v17  ;;  %v1349_v25 = vadd.f32 1e-05, %v1345_v57 }
 0x6e5   :  { %v1365_v11 = vmul.f32 %v2824_v2, %v1364_v20  ;;  %v1371_v54 = vmul.f32 %v2826_v21, %v1348_v42  ;;  %vm1377_vm11 = vweird.f32 %v2826_v21 }
 0x6e6   :  { %2827 = vrsqrt.f32 %v1349_v25  ;;  %v1408_v28 = vadd.f32 %v1404_v22, %v3438_v24  ;;  %vm1378_vm13 = vmor %vm1376_vm12, %vm1377_vm11  ;;  %vm1386_vm15 = vweird.f32 %v1349_v25 }
 0x6e7   :  { %v1369_v27 = vsel %vm1368_vm10, %v2824_v2, %v1365_v11  ;;  %v1372_v61 = vmul.f32 %v2826_v21, %v1371_v54 }
 0x6e8   :  { %v1391_v29 = vmul.f32 %v1369_v27, %v3566_v31  ;;  %2687 = vmatmul.msk.f32.vlgmr.msrb.gmra.mxu0 %vm287_vm1, %v1408_v28 }
 0x6e9   :  { %v1373_v30 = vmul.f32 0.5, %v1372_v61 }
 0x6ea   :  { %v1398_v32 = vmul.f32 %v2780_v5, %v1391_v29 }
 0x6eb   :  { %v1374_v34 = vsub.f32 1.5, %v1373_v30 }
 0x6ec   :  { %v2828_v35 = vpop.eup %2827  ;;  %v1405_v37 = vadd.f32 %v2781_v10, %v1398_v32 }
 0x6ed   :  { %v1375_v16 = vmul.f32 %v2826_v21, %v1374_v34  ;;  %v1381_v19 = vmul.f32 %v2828_v35, %v1349_v25  ;;  %vm1387_vm14 = vweird.f32 %v2828_v35 }
 0x6ee   :  { %v1409_v40 = vadd.f32 %v1405_v37, %v3444_v14  ;;  %vm1388_vm0 = vmor %vm1386_vm15, %vm1387_vm14 }
 0x6ef   :  { %v1379_v41 = vsel %vm1378_vm13, %v2826_v21, %v1375_v16  ;;  %v1382_v24 = vmul.f32 %v2828_v35, %v1381_v19 }
 0x6f0   :  { %v1392_v44 = vmul.f32 %v1379_v41, %v3572_v38  ;;  %2688 = vmatmul.msk.f32.gmra.mxu0 %vm287_vm1, %v1409_v40 }
 0x6f1   :  { %v1383_v31 = vmul.f32 0.5, %v1382_v24 }
 0x6f2   :  { %v1399_v36 = vmul.f32 %v2780_v5, %v1392_v44 }
 0x6f3   :  { %v1384_v45 = vsub.f32 1.5, %v1383_v31 }
 0x6f4   :  { %v1406_v47 = vadd.f32 %v2781_v10, %v1399_v36  ;;  %v2783_v36 = vld [vmem:[%s3925_s8] ss:$0 sm:$0xff] }
 0x6f5   :  { %v1385_v49 = vmul.f32 %v2828_v35, %v1384_v45 }
 0x6f6   :  { %v1410_v6 = vadd.f32 %v1406_v47, %v3453_v23  ;;  %v1586_v23 = vld [vmem:[#allocation13 + $0x50] sm:$0xff] }
 0x6f7   :  { %v1389_v51 = vsel %vm1388_vm0, %v2828_v35, %v1385_v49  ;;  %1613 = vmatpush.msra.mxu3 %v1586_v23 }
 0x6f8   :  { %v1393_v53 = vmul.f32 %v1389_v51, %v3578_v43  ;;  %2689 = vmatmul.msk.f32.gmra.mxu0 %vm287_vm1, %v1410_v6  ;;  %v1585_v43 = vld [vmem:[#allocation13 + $0x48] sm:$0xff] }
 0x6f9   :  { %1614 = vmatpush.msra.mxu3 %v1585_v43 }
 0x6fa   :  { %v1400_v14 = vmul.f32 %v2780_v5, %v1393_v53 }
 0x6fb   :  { %1615 = vmatpush.msra.mxu3 %v1584_v62 }
 0x6fc   :  { %v1407_v55 = vadd.f32 %v2781_v10, %v1400_v14 }
 0x6fe   :  { %v1411_v38 = vadd.f32 %v1407_v55, %v3462_v60  ;;  %v1481_v60 = vld [vmem:[#allocation13 + $0x8] sm:$0xff] }
 0x6ff   :  { %1556 = vmatpush.msra.mxu2 %v1481_v60 }
 0x700   :  { %2690 = vmatmul.msk.f32.gmra.mxu0 %vm287_vm1, %v1411_v38 }
 0x701   :  { %1557 = vmatpush.msra.mxu2 %v1480_v0 }
 0x765   :  { %v1449_v2 = vpop.f32.mrf.mxu0 }
 0x766   :  { %v3601_v42 = vadd.f32 %v2782_v63, %v1449_v2 }
 0x768   :  { %v1464_v3 = vmax.f32 %v3601_v42, 0.0 }
 0x76a   :  { %2691 = vmatmul.msk.f32.vlgmr.msra.gmra.mxu1 %vm287_vm1, %v1464_v3  ;;  %v1571_v9 = vrot.slane %v1464_v3, 1  ;;  %v1468_v11 = vrot.slane %v1464_v3, 7 }
 0x76d   :  { %v1452_v4 = vpop.f32.mrf.mxu0 }
 0x76e   :  { %v3605_v5 = vadd.f32 %v2782_v63, %v1452_v4 }
 0x770   :  { %v1465_v8 = vmax.f32 %v3605_v5, 0.0 }
 0x772   :  { %v1572_v10 = vrot.slane %v1465_v8, 1  ;;  %2692 = vmatmul.msk.f32.gmra.mxu1 %vm287_vm1, %v1465_v8  ;;  %v1469_v30 = vrot.slane %v1465_v8, 7 }
 0x774   :  { %v1577_v12 = vsel %vm374_vm3, %v1571_v9, %v1572_v10  ;;  %v1474_v37 = vsel %vm269_vm2, %v1468_v11, %v1469_v30 }
 0x775   :  { %v1455_v13 = vpop.f32.mrf.mxu0  ;;  %2699 = vmatmul.msk.f32.vlgmr.msra.gmra.mxu3 %vm287_vm1, %v1577_v12 }
 0x776   :  { %v3612_v48 = vadd.f32 %v2782_v63, %v1455_v13 }
 0x778   :  { %v1466_v15 = vmax.f32 %v3612_v48, 0.0 }
 0x77a   :  { %v1573_v17 = vrot.slane %v1466_v15, 1  ;;  %2693 = vmatmul.msk.f32.gmra.mxu1 %vm287_vm1, %v1466_v15  ;;  %v1470_v35 = vrot.slane %v1466_v15, 7 }
 0x77c   :  { %v1576_v57 = vsel %vm374_vm3, %v1572_v10, %v1573_v17  ;;  %v1473_v16 = vsel %vm269_vm2, %v1469_v30, %v1470_v35 }
 0x77d   :  { %v1458_v20 = vpop.f32.mrf.mxu0  ;;  %v1580_v21 = vmul.f32 %v3293_v39, %v1576_v57  ;;  %v1478_v19 = vmul.f32 %v3304_v46, %v1473_v16  ;;  %v1771_v16 = vld [vmem:[#allocation13 + $0x88] sm:$0xff] }
 0x77e   :  { %v3619_v22 = vadd.f32 %v2782_v63, %v1458_v20 }
 0x77f   :  { %2700 = vmatmul.msk.f32.gmra.mxu3 %vm287_vm1, %v1580_v21 }
 0x780   :  { %v1467_v25 = vmax.f32 %v3619_v22, 0.0 }
 0x782   :  { %v1471_v54 = vrot.slane %v1467_v25, 7  ;;  %2694 = vmatmul.msk.f32.gmra.mxu1 %vm287_vm1, %v1467_v25  ;;  %v1574_v28 = vrot.slane %v1467_v25, 1 }
 0x784   :  { %v1475_v27 = vsel %vm269_vm2, %v1471_v54, %v1468_v11  ;;  %v1575_v29 = vsel %vm374_vm3, %v1573_v17, %v1574_v28  ;;  %v1578_v32 = vsel %vm374_vm3, %v1574_v28, %v1571_v9  ;;  %v1472_v40 = vsel %vm269_vm2, %v1470_v35, %v1471_v54  ;;  %v1773_v35 = vld [vmem:[#allocation13 + $0x98] sm:$0xff] }
 0x785   :  { %v1476_v61 = vmul.f32 %v3264_v18, %v1475_v27  ;;  %v1582_v34 = vmul.f32 %v3313_v52, %v1578_v32  ;;  %1798 = vmatpush.msra.mxu0 %v1773_v35 }
 0x787   :  { %2695 = vmatmul.msk.f32.vlgmr.msra.gmra.mxu2 %vm287_vm1, %v1476_v61  ;;  %2701 = vmatmul.msk.f32.gmra.mxu3 %vm287_vm1, %v1575_v29 }
 0x78f   :  { %2696 = vmatmul.msk.f32.gmra.mxu2 %vm287_vm1, %v1474_v37  ;;  %2702 = vmatmul.msk.f32.gmra.mxu3 %vm287_vm1, %v1582_v34  ;;  %v1772_v37 = vld [vmem:[#allocation13 + $0x90] sm:$0xff] }
 0x790   :  { %1799 = vmatpush.msra.mxu0 %v1772_v37 }
 0x792   :  { %1800 = vmatpush.msra.mxu0 %v1771_v16 }
 0x797   :  { %2697 = vmatmul.msk.f32.gmra.mxu2 %vm287_vm1, %v1478_v19  ;;  %v1770_v19 = vld [vmem:[#allocation13 + $0x80] sm:$0xff] }
 0x798   :  { %1801 = vmatpush.msra.mxu0 %v1770_v19 }
 0x79f   :  { %2698 = vmatmul.msk.f32.gmra.mxu2 %vm287_vm1, %v1472_v40 }
 0x7e7   :  { %v1518_v41 = vpop.f32.mrf.mxu1 }
 0x7ef   :  { %v1521_v47 = vpop.f32.mrf.mxu1 }
 0x7f7   :  { %v1524_v56 = vpop.f32.mrf.mxu1 }
 0x7f8   :  { %v1617_v24 = vpop.f32.mrf.mxu3 }
 0x7ff   :  { %v1527_v62 = vpop.f32.mrf.mxu1 }
 0x802   :  { %v1620_v6 = vpop.f32.mrf.mxu3 }
 0x80a   :  { %v1559_v44 = vpop.f32.mrf.mxu2  ;;  %v1623_v59 = vpop.f32.mrf.mxu3 }
 0x80b   :  { %v1560_v31 = vadd.f32 %v1559_v44, %v1518_v41 }
 0x80d   :  { %v1629_v45 = vadd.f32 %v1617_v24, %v1560_v31  ;;  %v1872_v24 = vld [vmem:[#allocation13 + $0xb8] sm:$0xff]  ;;  %v1871_v31 = vld [vmem:[#allocation13 + $0xb0] sm:$0xff] }
 0x80e   :  { %1897 = vmatpush.msrb.mxu2 %v1872_v24 }
 0x80f   :  { %v1636_v49 = vadd.f32 %v2783_v36, %v1629_v45 }
 0x810   :  { %1898 = vmatpush.msrb.mxu2 %v1871_v31 }
 0x811   :  { %v1640_v51 = vsel %vm287_vm1, %v1636_v49, 0.0 }
 0x812   :  { %v1562_v53 = vpop.f32.mrf.mxu2  ;;  %1641 = vadd.xlane.f32.xlu2 %v1640_v51  ;;  %v1626_v0 = vpop.f32.mrf.mxu3 }
 0x813   :  { %v1563_v14 = vadd.f32 %v1562_v53, %v1521_v47  ;;  %v1869_v47 = vld [vmem:[#allocation13 + $0xa0] sm:$0xff] }
 0x815   :  { %v1630_v55 = vadd.f32 %v1620_v6, %v1563_v14 }
 0x817   :  { %v1637_v38 = vadd.f32 %v2783_v36, %v1630_v55  ;;  %v1768_v55 = vld [vmem:[#allocation13 + $0x78] sm:$0xff] }
 0x818   :  { %1839 = vmatpush.msrb.mxu1 %v1768_v55 }
 0x819   :  { %v1643_v58 = vsel %vm287_vm1, %v1637_v38, 0.0 }
 0x81a   :  { %1644 = vadd.xlane.f32.xlu0 %v1643_v58  ;;  %v1565_v7 = vpop.f32.mrf.mxu2 }
 0x81b   :  { %v1566_v26 = vadd.f32 %v1565_v7, %v1524_v56 }
 0x81d   :  { %v1631_v23 = vadd.f32 %v1623_v59, %v1566_v26  ;;  %v1766_v59 = vld [vmem:[#allocation13 + $0x68] sm:$0xff] }
 0x81f   :  { %v1638_v43 = vadd.f32 %v2783_v36, %v1631_v23  ;;  %v1765_v23 = vld [vmem:[#allocation13 + $0x60] sm:$0xff] }
 0x821   :  { %v1646_v50 = vsel %vm287_vm1, %v1638_v43, 0.0 }
 0x822   :  { %1647 = vadd.xlane.f32.xlu2 %v1646_v50  ;;  %v1568_v60 = vpop.f32.mrf.mxu2 }
 0x823   :  { %v1569_v63 = vadd.f32 %v1568_v60, %v1527_v62 }
 0x825   :  { %v1632_v2 = vadd.f32 %v1626_v0, %v1569_v63  ;;  %v2784_v63 = vld [vmem:[#allocation14] ss:$0 sm:$0xff] }
 0x827   :  { %v1639_v3 = vadd.f32 %v2783_v36, %v1632_v2  ;;  %v1870_v36 = vld [vmem:[#allocation13 + $0xa8] sm:$0xff] }
 0x828   :  { %1899 = vmatpush.msrb.mxu2 %v1870_v36 }
 0x829   :  { %v1649_v4 = vsel %vm287_vm1, %v1639_v3, 0.0 }
 0x82a   :  { %1650 = vadd.xlane.f32.xlu1 %v1649_v4  ;;  %1900 = vmatpush.msrb.mxu2 %v1869_v47  ;;  %v2785_v4 = vld [vmem:[#allocation16] ss:$0 sm:$0xff] }
 0x885   :  { %v1642_v8 = vpop.xlane.xlu2 %1641 }
 0x886   :  { %v1652_v9 = vmul.f32 %v1642_v8, %v3326_v33 }
 0x888   :  { %v3653_v10 = vsub.f32 %v1636_v49, %v1652_v9 }
 0x88a   :  { %v1660_v12 = vmul.f32 %v3653_v10, %v3653_v10 }
 0x88c   :  { %v1664_v13 = vsel %vm287_vm1, %v1660_v12, 0.0 }
 0x88d   :  { %1665 = vadd.xlane.f32.xlu0 %v1664_v13  ;;  %v1645_v15 = vpop.xlane.xlu0 %1644 }
 0x88e   :  { %v1653_v17 = vmul.f32 %v1645_v15, %v3326_v33 }
 0x890   :  { %v3659_v57 = vsub.f32 %v1637_v38, %v1653_v17  ;;  %v1767_v38 = vld [vmem:[#allocation13 + $0x70] sm:$0xff] }
 0x891   :  { %1840 = vmatpush.msrb.mxu1 %v1767_v38 }
 0x892   :  { %v1661_v20 = vmul.f32 %v3659_v57, %v3659_v57 }
 0x893   :  { %1841 = vmatpush.msrb.mxu1 %v1766_v59 }
 0x894   :  { %v1667_v21 = vsel %vm287_vm1, %v1661_v20, 0.0 }
 0x895   :  { %v1648_v25 = vpop.xlane.xlu2 %1647  ;;  %1668 = vadd.xlane.f32.xlu1 %v1667_v21  ;;  %1842 = vmatpush.msrb.mxu1 %v1765_v23 }
 0x896   :  { %v1654_v11 = vmul.f32 %v1648_v25, %v3326_v33 }
 0x898   :  { %v3665_v54 = vsub.f32 %v1638_v43, %v1654_v11 }
 0x89a   :  { %v1662_v28 = vmul.f32 %v3665_v54, %v3665_v54 }
 0x89c   :  { %v1670_v27 = vsel %vm287_vm1, %v1662_v28, 0.0 }
 0x89d   :  { %1671 = vadd.xlane.f32.xlu0 %v1670_v27  ;;  %v1651_v61 = vpop.xlane.xlu1 %1650 }
 0x89e   :  { %v1655_v29 = vmul.f32 %v1651_v61, %v3326_v33 }
 0x8a0   :  { %v3671_v30 = vsub.f32 %v1639_v3, %v1655_v29 }
 0x8a2   :  { %v1663_v32 = vmul.f32 %v3671_v30, %v3671_v30 }
 0x8a4   :  { %v1673_v34 = vsel %vm287_vm1, %v1663_v32, 0.0 }
 0x8a5   :  { %1674 = vadd.xlane.f32.xlu2 %v1673_v34 }
 0x900   :  { %v1666_v40 = vpop.xlane.xlu0 %1665 }
 0x901   :  { %v1676_v41 = vmul.f32 %v1666_v40, %v3326_v33 }
 0x903   :  { %v1680_v44 = vadd.f32 1e-05, %v1676_v41 }
 0x905   :  { %2829 = vrsqrt.f32 %v1680_v44  ;;  %vm1690_vm5 = vweird.f32 %v1680_v44 }
 0x908   :  { %v1669_v45 = vpop.xlane.xlu1 %1668 }
 0x909   :  { %v1677_v49 = vmul.f32 %v1669_v45, %v3326_v33 }
 0x90b   :  { %v2830_v6 = vpop.eup %2829  ;;  %v1681_v51 = vadd.f32 1e-05, %v1677_v49 }
 0x90c   :  { %v1685_v53 = vmul.f32 %v2830_v6, %v1680_v44  ;;  %vm1691_vm4 = vweird.f32 %v2830_v6 }
 0x90d   :  { %2831 = vrsqrt.f32 %v1681_v51  ;;  %vm1692_vm6 = vmor %vm1690_vm5, %vm1691_vm4  ;;  %vm1700_vm8 = vweird.f32 %v1681_v51 }
 0x90e   :  { %v1686_v14 = vmul.f32 %v2830_v6, %v1685_v53 }
 0x910   :  { %v1687_v56 = vmul.f32 0.5, %v1686_v14  ;;  %v1672_v58 = vpop.xlane.xlu0 %1671 }
 0x911   :  { %v1678_v7 = vmul.f32 %v1672_v58, %v3326_v33 }
 0x912   :  { %v1688_v26 = vsub.f32 1.5, %v1687_v56 }
 0x913   :  { %v2832_v43 = vpop.eup %2831  ;;  %v1682_v50 = vadd.f32 1e-05, %v1678_v7 }
 0x914   :  { %v1689_v62 = vmul.f32 %v2830_v6, %v1688_v26  ;;  %v1695_v60 = vmul.f32 %v2832_v43, %v1681_v51  ;;  %vm1701_vm7 = vweird.f32 %v2832_v43 }
 0x915   :  { %2833 = vrsqrt.f32 %v1682_v50  ;;  %vm1702_vm9 = vmor %vm1700_vm8, %vm1701_vm7  ;;  %vm1710_vm11 = vweird.f32 %v1682_v50 }
 0x916   :  { %v1693_v0 = vsel %vm1692_vm6, %v2830_v6, %v1689_v62  ;;  %v1696_v2 = vmul.f32 %v2832_v43, %v1695_v60 }
 0x917   :  { %v1724_v3 = vmul.f32 %v1693_v0, %v3653_v10 }
 0x918   :  { %v1697_v8 = vmul.f32 0.5, %v1696_v2  ;;  %v1675_v9 = vpop.xlane.xlu2 %1674 }
 0x919   :  { %v1731_v12 = vmul.f32 %v2784_v63, %v1724_v3  ;;  %v1679_v13 = vmul.f32 %v1675_v9, %v3326_v33 }
 0x91a   :  { %v1698_v15 = vsub.f32 1.5, %v1697_v8 }
 0x91b   :  { %v2834_v17 = vpop.eup %2833  ;;  %v1683_v20 = vadd.f32 1e-05, %v1679_v13  ;;  %v1738_v21 = vadd.f32 %v2785_v4, %v1731_v12 }
 0x91c   :  { %v1699_v25 = vmul.f32 %v2832_v43, %v1698_v15  ;;  %v1705_v11 = vmul.f32 %v2834_v17, %v1682_v50  ;;  %vm1711_vm10 = vweird.f32 %v2834_v17 }
 0x91d   :  { %2835 = vrsqrt.f32 %v1683_v20  ;;  %v1748_v28 = vmax.f32 %v1738_v21, 0.0  ;;  %vm1712_vm12 = vmor %vm1710_vm11, %vm1711_vm10  ;;  %vm1720_vm14 = vweird.f32 %v1683_v20 }
 0x91e   :  { %v1703_v27 = vsel %vm1702_vm9, %v2832_v43, %v1699_v25  ;;  %v1706_v61 = vmul.f32 %v2834_v17, %v1705_v11 }
 0x91f   :  { %2704 = vmatmul.msk.f32.vlgmr.msra.gmra.mxu0 %vm287_vm1, %v1748_v28  ;;  %v1725_v10 = vmul.f32 %v1703_v27, %v3659_v57  ;;  %v1856_v31 = vrot.slane %v1748_v28, 1  ;;  %v1752_v26 = vrot.slane %v1748_v28, 7 }
 0x920   :  { %v1707_v29 = vmul.f32 0.5, %v1706_v61 }
 0x921   :  { %v1732_v32 = vmul.f32 %v2784_v63, %v1725_v10 }
 0x922   :  { %v1708_v34 = vsub.f32 1.5, %v1707_v29 }
 0x923   :  { %v2836_v35 = vpop.eup %2835  ;;  %v1739_v37 = vadd.f32 %v2785_v4, %v1732_v32 }
 0x924   :  { %v1709_v16 = vmul.f32 %v2834_v17, %v1708_v34  ;;  %v1715_v19 = vmul.f32 %v2836_v35, %v1683_v20  ;;  %vm1721_vm13 = vweird.f32 %v2836_v35  ;;  %v2786_v20 = vld [vmem:[%s3925_s8 + $0x1] ss:$0 sm:$0xff] }
 0x925   :  { %v1749_v40 = vmax.f32 %v1739_v37, 0.0  ;;  %vm1722_vm15 = vmor %vm1720_vm14, %vm1721_vm13 }
 0x926   :  { %v1713_v41 = vsel %vm1712_vm12, %v2834_v17, %v1709_v16  ;;  %v1716_v24 = vmul.f32 %v2836_v35, %v1715_v19 }
 0x927   :  { %2705 = vmatmul.msk.f32.gmra.mxu0 %vm287_vm1, %v1749_v40  ;;  %v1857_v44 = vrot.slane %v1749_v40, 1  ;;  %v1726_v36 = vmul.f32 %v1713_v41, %v3665_v54  ;;  %v1753_v60 = vrot.slane %v1749_v40, 7 }
 0x928   :  { %v1717_v57 = vmul.f32 0.5, %v1716_v24 }
 0x929   :  { %v1862_v45 = vsel %vm374_vm3, %v1856_v31, %v1857_v44  ;;  %v1733_v47 = vmul.f32 %v2784_v63, %v1726_v36  ;;  %v1758_v3 = vsel %vm269_vm2, %v1752_v26, %v1753_v60 }
 0x92a   :  { %v1718_v49 = vsub.f32 1.5, %v1717_v57  ;;  %2712 = vmatmul.msk.f32.vlgmr.msrb.gmra.mxu2 %vm287_vm1, %v1862_v45 }
 0x92b   :  { %v1740_v6 = vadd.f32 %v2785_v4, %v1733_v47 }
 0x92c   :  { %v1719_v51 = vmul.f32 %v2836_v35, %v1718_v49 }
 0x92d   :  { %v1750_v53 = vmax.f32 %v1740_v6, 0.0 }
 0x92e   :  { %v1723_v14 = vsel %vm1722_vm15, %v2836_v35, %v1719_v51 }
 0x92f   :  { %2706 = vmatmul.msk.f32.gmra.mxu0 %vm287_vm1, %v1750_v53  ;;  %v1858_v55 = vrot.slane %v1750_v53, 1  ;;  %v1727_v54 = vmul.f32 %v1723_v14, %v3671_v30  ;;  %v1754_v2 = vrot.slane %v1750_v53, 7 }
 0x931   :  { %v1861_v38 = vsel %vm374_vm3, %v1857_v44, %v1858_v55  ;;  %v1734_v56 = vmul.f32 %v2784_v63, %v1727_v54 }
 0x932   :  { %v1865_v58 = vmul.f32 %v3293_v39, %v1861_v38 }
 0x933   :  { %v1741_v59 = vadd.f32 %v2785_v4, %v1734_v56  ;;  %v1757_v4 = vsel %vm269_vm2, %v1753_v60, %v1754_v2 }
 0x934   :  { %2713 = vmatmul.msk.f32.gmra.mxu2 %vm287_vm1, %v1865_v58  ;;  %v1762_v8 = vmul.f32 %v3304_v46, %v1757_v4  ;;  %v2060_v4 = vld [vmem:[#allocation13 + $0xe8] sm:$0xff] }
 0x935   :  { %v1751_v7 = vmax.f32 %v1741_v59, 0.0 }
 0x937   :  { %v1755_v23 = vrot.slane %v1751_v7, 7  ;;  %2707 = vmatmul.msk.f32.gmra.mxu0 %vm287_vm1, %v1751_v7  ;;  %v1859_v43 = vrot.slane %v1751_v7, 1 }
 0x939   :  { %v1759_v50 = vsel %vm269_vm2, %v1755_v23, %v1752_v26  ;;  %v1860_v62 = vsel %vm374_vm3, %v1858_v55, %v1859_v43  ;;  %v1863_v63 = vsel %vm374_vm3, %v1859_v43, %v1856_v31  ;;  %v1756_v9 = vsel %vm269_vm2, %v1754_v2, %v1755_v23  ;;  %v2062_v2 = vld [vmem:[#allocation13 + $0xf8] sm:$0xff] }
 0x93a   :  { %v1760_v30 = vmul.f32 %v3264_v18, %v1759_v50  ;;  %v1867_v0 = vmul.f32 %v3313_v52, %v1863_v63  ;;  %2087 = vmatpush.msrb.mxu3 %v2062_v2 }
 0x93c   :  { %2708 = vmatmul.msk.f32.vlgmr.msrb.gmra.mxu1 %vm287_vm1, %v1760_v30  ;;  %2714 = vmatmul.msk.f32.gmra.mxu2 %vm287_vm1, %v1860_v62 }
 0x944   :  { %2709 = vmatmul.msk.f32.gmra.mxu1 %vm287_vm1, %v1758_v3  ;;  %2715 = vmatmul.msk.f32.gmra.mxu2 %vm287_vm1, %v1867_v0  ;;  %v2061_v3 = vld [vmem:[#allocation13 + $0xf0] sm:$0xff] }
 0x945   :  { %2088 = vmatpush.msrb.mxu3 %v2061_v3 }
 0x947   :  { %2089 = vmatpush.msrb.mxu3 %v2060_v4 }
 0x94c   :  { %2710 = vmatmul.msk.f32.gmra.mxu1 %vm287_vm1, %v1762_v8  ;;  %v2059_v8 = vld [vmem:[#allocation13 + $0xe0] sm:$0xff] }
 0x94d   :  { %2090 = vmatpush.msrb.mxu3 %v2059_v8 }
 0x954   :  { %2711 = vmatmul.msk.f32.gmra.mxu1 %vm287_vm1, %v1756_v9 }
 0x99c   :  { %v1803_v12 = vpop.f32.mrf.mxu0 }
 0x9a4   :  { %v1806_v25 = vpop.f32.mrf.mxu0 }
 0x9ac   :  { %v1809_v34 = vpop.f32.mrf.mxu0 }
 0x9ad   :  { %v1902_v13 = vpop.f32.mrf.mxu2 }
 0x9b4   :  { %v1812_v44 = vpop.f32.mrf.mxu0 }
 0x9b7   :  { %v1905_v28 = vpop.f32.mrf.mxu2 }
 0x9b9   :  { %v1844_v15 = vpop.f32.mrf.mxu1 }
 0x9ba   :  { %v1845_v17 = vadd.f32 %v1844_v15, %v1803_v12  ;;  %v2161_v15 = vld [vmem:[#allocation13 + $0x118] sm:$0xff] }
 0x9bb   :  { %2186 = vmatpush.msra.mxu1 %v2161_v15 }
 0x9bc   :  { %v1914_v21 = vadd.f32 %v1902_v13, %v1845_v17  ;;  %v2160_v17 = vld [vmem:[#allocation13 + $0x110] sm:$0xff] }
 0x9bd   :  { %2187 = vmatpush.msra.mxu1 %v2160_v17 }
 0x9be   :  { %v1921_v11 = vadd.f32 %v2786_v20, %v1914_v21  ;;  %v2159_v21 = vld [vmem:[#allocation13 + $0x108] sm:$0xff] }
 0x9bf   :  { %v1908_v37 = vpop.f32.mrf.mxu2  ;;  %2188 = vmatpush.msra.mxu1 %v2159_v21 }
 0x9c0   :  { %v1925_v27 = vsel %vm287_vm1, %v1921_v11, 0.0 }
 0x9c1   :  { %1926 = vadd.xlane.f32.xlu1 %v1925_v27  ;;  %v1847_v61 = vpop.f32.mrf.mxu1 }
 0x9c2   :  { %v1848_v10 = vadd.f32 %v1847_v61, %v1806_v25 }
 0x9c4   :  { %v1915_v29 = vadd.f32 %v1905_v28, %v1848_v10 }
 0x9c6   :  { %v1922_v32 = vadd.f32 %v2786_v20, %v1915_v29  ;;  %v2057_v29 = vld [vmem:[#allocation13 + $0xd8] sm:$0xff] }
 0x9c7   :  { %v1911_v57 = vpop.f32.mrf.mxu2  ;;  %2128 = vmatpush.msrb.mxu0 %v2057_v29 }
 0x9c8   :  { %v1928_v35 = vsel %vm287_vm1, %v1922_v32, 0.0 }
 0x9c9   :  { %1929 = vadd.xlane.f32.xlu0 %v1928_v35  ;;  %v1850_v16 = vpop.f32.mrf.mxu1 }
 0x9ca   :  { %v1851_v19 = vadd.f32 %v1850_v16, %v1809_v34  ;;  %v2055_v16 = vld [vmem:[#allocation13 + $0xc8] sm:$0xff] }
 0x9cc   :  { %v1916_v40 = vadd.f32 %v1908_v37, %v1851_v19 }
 0x9ce   :  { %v1923_v41 = vadd.f32 %v2786_v20, %v1916_v40 }
 0x9d0   :  { %v1931_v24 = vsel %vm287_vm1, %v1923_v41, 0.0 }
 0x9d1   :  { %v1853_v31 = vpop.f32.mrf.mxu1  ;;  %1932 = vadd.xlane.f32.xlu1 %v1931_v24  ;;  %v2054_v24 = vld [vmem:[#allocation13 + $0xc0] sm:$0xff] }
 0x9d2   :  { %v1854_v36 = vadd.f32 %v1853_v31, %v1812_v44 }
 0x9d4   :  { %v1917_v45 = vadd.f32 %v1911_v57, %v1854_v36  ;;  %v2787_v36 = vld [vmem:[#allocation14 + $0x1] ss:$0 sm:$0xff] }
 0x9d6   :  { %v1924_v47 = vadd.f32 %v2786_v20, %v1917_v45 }
 0x9d8   :  { %v1934_v49 = vsel %vm287_vm1, %v1924_v47, 0.0 }
 0x9d9   :  { %1935 = vadd.xlane.f32.xlu2 %v1934_v49 }
 0xa34   :  { %v1927_v6 = vpop.xlane.xlu1 %1926 }
 0xa35   :  { %v1937_v51 = vmul.f32 %v1927_v6, %v3326_v33 }
 0xa37   :  { %v3724_v53 = vsub.f32 %v1921_v11, %v1937_v51  ;;  %v2158_v11 = vld [vmem:[#allocation13 + $0x100] sm:$0xff] }
 0xa38   :  { %2189 = vmatpush.msra.mxu1 %v2158_v11 }
 0xa39   :  { %v1945_v14 = vmul.f32 %v3724_v53, %v3724_v53 }
 0xa3b   :  { %v1949_v55 = vsel %vm287_vm1, %v1945_v14, 0.0 }
 0xa3c   :  { %v1930_v54 = vpop.xlane.xlu0 %1929  ;;  %1950 = vadd.xlane.f32.xlu2 %v1949_v55 }
 0xa3d   :  { %v1938_v38 = vmul.f32 %v1930_v54, %v3326_v33 }
 0xa3f   :  { %v3730_v56 = vsub.f32 %v1922_v32, %v1938_v38  ;;  %v2056_v32 = vld [vmem:[#allocation13 + $0xd0] sm:$0xff] }
 0xa40   :  { %2129 = vmatpush.msrb.mxu0 %v2056_v32 }
 0xa41   :  { %v1946_v58 = vmul.f32 %v3730_v56, %v3730_v56 }
 0xa42   :  { %2130 = vmatpush.msrb.mxu0 %v2055_v16 }
 0xa43   :  { %v1952_v59 = vsel %vm287_vm1, %v1946_v58, 0.0 }
 0xa44   :  { %1953 = vadd.xlane.f32.xlu1 %v1952_v59  ;;  %v1933_v7 = vpop.xlane.xlu1 %1932  ;;  %2131 = vmatpush.msrb.mxu0 %v2054_v24 }
 0xa45   :  { %v1939_v26 = vmul.f32 %v1933_v7, %v3326_v33 }
 0xa47   :  { %v3736_v23 = vsub.f32 %v1923_v41, %v1939_v26 }
 0xa49   :  { %v1947_v43 = vmul.f32 %v3736_v23, %v3736_v23 }
 0xa4b   :  { %v1955_v50 = vsel %vm287_vm1, %v1947_v43, 0.0 }
 0xa4c   :  { %v1936_v30 = vpop.xlane.xlu2 %1935  ;;  %1956 = vadd.xlane.f32.xlu2 %v1955_v50 }
 0xa4d   :  { %v1940_v62 = vmul.f32 %v1936_v30, %v3326_v33 }
 0xa4f   :  { %v3742_v60 = vsub.f32 %v1924_v47, %v1940_v62  ;;  %v2788_v47 = vld [vmem:[#allocation16 + $0x1] ss:$0 sm:$0xff] }
 0xa51   :  { %v1948_v63 = vmul.f32 %v3742_v60, %v3742_v60 }
 0xa53   :  { %v1958_v0 = vsel %vm287_vm1, %v1948_v63, 0.0 }
 0xa54   :  { %1959 = vadd.xlane.f32.xlu0 %v1958_v0 }
 0xaaf   :  { %v1951_v9 = vpop.xlane.xlu2 %1950 }
 0xab0   :  { %v1961_v12 = vmul.f32 %v1951_v9, %v3326_v33 }
 0xab2   :  { %v1965_v13 = vadd.f32 1e-05, %v1961_v12 }
 0xab4   :  { %2837 = vrsqrt.f32 %v1965_v13  ;;  %vm1975_vm4 = vweird.f32 %v1965_v13 }
 0xab7   :  { %v1954_v20 = vpop.xlane.xlu1 %1953 }
 0xab8   :  { %v1962_v25 = vmul.f32 %v1954_v20, %v3326_v33 }
 0xaba   :  { %v2838_v28 = vpop.eup %2837  ;;  %v1966_v27 = vadd.f32 1e-05, %v1962_v25 }
 0xabb   :  { %v1970_v61 = vmul.f32 %v2838_v28, %v1965_v13  ;;  %vm1976_vm0 = vweird.f32 %v2838_v28 }
 0xabc   :  { %2839 = vrsqrt.f32 %v1966_v27  ;;  %vm1977_vm5 = vmor %vm1975_vm4, %vm1976_vm0  ;;  %vm1985_vm7 = vweird.f32 %v1966_v27 }
 0xabd   :  { %v1971_v10 = vmul.f32 %v2838_v28, %v1970_v61 }
 0xabf   :  { %v1972_v34 = vmul.f32 0.5, %v1971_v10  ;;  %v1957_v35 = vpop.xlane.xlu2 %1956 }
 0xac0   :  { %v1963_v37 = vmul.f32 %v1957_v35, %v3326_v33 }
 0xac1   :  { %v1973_v19 = vsub.f32 1.5, %v1972_v34 }
 0xac2   :  { %v2840_v40 = vpop.eup %2839  ;;  %v1967_v41 = vadd.f32 1e-05, %v1963_v37 }
 0xac3   :  { %v1974_v44 = vmul.f32 %v2838_v28, %v1973_v19  ;;  %v1980_v31 = vmul.f32 %v2840_v40, %v1966_v27  ;;  %vm1986_vm6 = vweird.f32 %v2840_v40 }
 0xac4   :  { %2841 = vrsqrt.f32 %v1967_v41  ;;  %vm1987_vm8 = vmor %vm1985_vm7, %vm1986_vm6  ;;  %vm1995_vm10 = vweird.f32 %v1967_v41 }
 0xac5   :  { %v1978_v57 = vsel %vm1977_vm5, %v2838_v28, %v1974_v44  ;;  %v1981_v45 = vmul.f32 %v2840_v40, %v1980_v31 }
 0xac6   :  { %v2009_v49 = vmul.f32 %v1978_v57, %v3724_v53 }
 0xac7   :  { %v1982_v6 = vmul.f32 0.5, %v1981_v45  ;;  %v1960_v51 = vpop.xlane.xlu0 %1959 }
 0xac8   :  { %v2016_v14 = vmul.f32 %v2787_v36, %v2009_v49  ;;  %v1964_v55 = vmul.f32 %v1960_v51, %v3326_v33 }
 0xac9   :  { %v1983_v54 = vsub.f32 1.5, %v1982_v6 }
 0xaca   :  { %v2842_v38 = vpop.eup %2841  ;;  %v2023_v58 = vadd.f32 %v2788_v47, %v2016_v14  ;;  %v1968_v59 = vadd.f32 1e-05, %v1964_v55 }
 0xacb   :  { %v1984_v7 = vmul.f32 %v2840_v40, %v1983_v54  ;;  %v1990_v26 = vmul.f32 %v2842_v38, %v1967_v41  ;;  %vm1996_vm9 = vweird.f32 %v2842_v38 }
 0xacc   :  { %2843 = vrsqrt.f32 %v1968_v59  ;;  %v3753_v43 = vadd.f32 %v2023_v58, %v3601_v42  ;;  %vm1997_vm11 = vmor %vm1995_vm10, %vm1996_vm9  ;;  %vm2005_vm13 = vweird.f32 %v1968_v59  ;;  %v2789_v58 = vld [vmem:[%s3925_s8 + $0x2] ss:$0 sm:$0xff] }
 0xacd   :  { %v1988_v50 = vsel %vm1987_vm8, %v2840_v40, %v1984_v7  ;;  %v1991_v53 = vmul.f32 %v2842_v38, %v1990_v26 }
 0xace   :  { %v2010_v30 = vmul.f32 %v1988_v50, %v3730_v56  ;;  %v2037_v62 = vmax.f32 %v3753_v43, 0.0 }
 0xacf   :  { %v1992_v63 = vmul.f32 0.5, %v1991_v53 }
 0xad0   :  { %2717 = vmatmul.msk.f32.vlgmr.msrb.gmra.mxu3 %vm287_vm1, %v2037_v62  ;;  %v2017_v0 = vmul.f32 %v2787_v36, %v2010_v30  ;;  %v2145_v21 = vrot.slane %v2037_v62, 1 }
 0xad1   :  { %v1993_v2 = vsub.f32 1.5, %v1992_v63 }
 0xad2   :  { %v2844_v3 = vpop.eup %2843  ;;  %v2024_v4 = vadd.f32 %v2788_v47, %v2017_v0 }
 0xad3   :  { %v1994_v8 = vmul.f32 %v2842_v38, %v1993_v2  ;;  %v2000_v9 = vmul.f32 %v2844_v3, %v1968_v59  ;;  %vm2006_vm12 = vweird.f32 %v2844_v3 }
 0xad4   :  { %v3759_v42 = vadd.f32 %v2024_v4, %v3605_v5  ;;  %vm2007_vm14 = vmor %vm2005_vm13, %vm2006_vm12 }
 0xad5   :  { %v1998_v12 = vsel %vm1997_vm11, %v2842_v38, %v1994_v8  ;;  %v2001_v13 = vmul.f32 %v2844_v3, %v2000_v9 }
 0xad6   :  { %v2011_v56 = vmul.f32 %v1998_v12, %v3736_v23  ;;  %v2038_v15 = vmax.f32 %v3759_v42, 0.0 }
 0xad7   :  { %v2002_v17 = vmul.f32 0.5, %v2001_v13 }
 0xad8   :  { %2718 = vmatmul.msk.f32.gmra.mxu3 %vm287_vm1, %v2038_v15  ;;  %v2146_v20 = vrot.slane %v2038_v15, 1  ;;  %v2018_v25 = vmul.f32 %v2787_v36, %v2011_v56 }
 0xad9   :  { %v2003_v11 = vsub.f32 1.5, %v2002_v17 }
 0xada   :  { %v2151_v28 = vsel %vm374_vm3, %v2145_v21, %v2146_v20  ;;  %v2025_v27 = vadd.f32 %v2788_v47, %v2018_v25 }
 0xadb   :  { %v2004_v5 = vmul.f32 %v2844_v3, %v2003_v11  ;;  %2725 = vmatmul.msk.f32.vlgmr.msra.gmra.mxu1 %vm287_vm1, %v2151_v28 }
 0xadc   :  { %v3768_v23 = vadd.f32 %v2025_v27, %v3612_v48 }
 0xadd   :  { %v2008_v61 = vsel %vm2007_vm14, %v2844_v3, %v2004_v5 }
 0xade   :  { %v2012_v10 = vmul.f32 %v2008_v61, %v3742_v60  ;;  %v2039_v29 = vmax.f32 %v3768_v23, 0.0  ;;  %v2041_v60 = vrot.slane %v2037_v62, 7 }
 0xae0   :  { %2719 = vmatmul.msk.f32.gmra.mxu3 %vm287_vm1, %v2039_v29  ;;  %v2147_v32 = vrot.slane %v2039_v29, 1  ;;  %v2019_v34 = vmul.f32 %v2787_v36, %v2012_v10  ;;  %v2043_v45 = vrot.slane %v2039_v29, 7 }
 0xae2   :  { %v2150_v35 = vsel %vm374_vm3, %v2146_v20, %v2147_v32  ;;  %v2026_v37 = vadd.f32 %v2788_v47, %v2019_v34 }
 0xae3   :  { %v2154_v16 = vmul.f32 %v3293_v39, %v2150_v35 }
 0xae4   :  { %v3777_v19 = vadd.f32 %v2026_v37, %v3619_v22  ;;  %v2042_v22 = vrot.slane %v2038_v15, 7 }
 0xae5   :  { %2726 = vmatmul.msk.f32.gmra.mxu1 %vm287_vm1, %v2154_v16 }
 0xae6   :  { %v2040_v48 = vmax.f32 %v3777_v19, 0.0  ;;  %v2047_v47 = vsel %vm269_vm2, %v2041_v60, %v2042_v22  ;;  %v2046_v49 = vsel %vm269_vm2, %v2042_v22, %v2043_v45 }
 0xae7   :  { %v2051_v6 = vmul.f32 %v3304_v46, %v2046_v49  ;;  %v2345_v49 = vld [vmem:[#allocation13 + $0x148] sm:$0xff] }
 0xae8   :  { %v2044_v40 = vrot.slane %v2040_v48, 7  ;;  %2720 = vmatmul.msk.f32.gmra.mxu3 %vm287_vm1, %v2040_v48  ;;  %v2148_v41 = vrot.slane %v2040_v48, 1 }
 0xaea   :  { %v2048_v24 = vsel %vm269_vm2, %v2044_v40, %v2041_v60  ;;  %v2149_v31 = vsel %vm374_vm3, %v2147_v32, %v2148_v41  ;;  %v2152_v36 = vsel %vm374_vm3, %v2148_v41, %v2145_v21  ;;  %v2045_v51 = vsel %vm269_vm2, %v2043_v45, %v2044_v40  ;;  %v2347_v45 = vld [vmem:[#allocation13 + $0x158] sm:$0xff] }
 0xaeb   :  { %v2049_v44 = vmul.f32 %v3264_v18, %v2048_v24  ;;  %v2156_v57 = vmul.f32 %v3313_v52, %v2152_v36  ;;  %2372 = vmatpush.msra.mxu2 %v2347_v45 }
 0xaed   :  { %2721 = vmatmul.msk.f32.vlgmr.msrb.gmra.mxu0 %vm287_vm1, %v2049_v44  ;;  %2727 = vmatmul.msk.f32.gmra.mxu1 %vm287_vm1, %v2149_v31 }
 0xaf5   :  { %2722 = vmatmul.msk.f32.gmra.mxu0 %vm287_vm1, %v2047_v47  ;;  %2728 = vmatmul.msk.f32.gmra.mxu1 %vm287_vm1, %v2156_v57  ;;  %v2346_v47 = vld [vmem:[#allocation13 + $0x150] sm:$0xff] }
 0xaf6   :  { %2373 = vmatpush.msra.mxu2 %v2346_v47 }
 0xaf8   :  { %2374 = vmatpush.msra.mxu2 %v2345_v49 }
 0xafd   :  { %2723 = vmatmul.msk.f32.gmra.mxu0 %vm287_vm1, %v2051_v6  ;;  %v2344_v6 = vld [vmem:[#allocation13 + $0x140] sm:$0xff] }
 0xafe   :  { %2375 = vmatpush.msra.mxu2 %v2344_v6 }
 0xb05   :  { %2724 = vmatmul.msk.f32.gmra.mxu0 %vm287_vm1, %v2045_v51 }
 0xb53   :  { %v2092_v14 = vpop.f32.mrf.mxu3 }
 0xb58   :  { %v2191_v55 = vpop.f32.mrf.mxu1 }
 0xb5b   :  { %v2095_v7 = vpop.f32.mrf.mxu3 }
 0xb62   :  { %v2194_v50 = vpop.f32.mrf.mxu1 }
 0xb63   :  { %v2098_v2 = vpop.f32.mrf.mxu3 }
 0xb6a   :  { %v2133_v54 = vpop.f32.mrf.mxu0  ;;  %v2197_v4 = vpop.f32.mrf.mxu1 }
 0xb6b   :  { %v2134_v38 = vadd.f32 %v2133_v54, %v2092_v14  ;;  %v2101_v15 = vpop.f32.mrf.mxu3 }
 0xb6d   :  { %v2203_v59 = vadd.f32 %v2191_v55, %v2134_v38  ;;  %v2446_v55 = vld [vmem:[#allocation13 + $0x178] sm:$0xff]  ;;  %v2445_v38 = vld [vmem:[#allocation13 + $0x170] sm:$0xff] }
 0xb6e   :  { %2471 = vmatpush.msra.mxu0 %v2446_v55 }
 0xb6f   :  { %v2210_v26 = vadd.f32 %v2789_v58, %v2203_v59 }
 0xb70   :  { %2472 = vmatpush.msra.mxu0 %v2445_v38 }
 0xb71   :  { %v2214_v53 = vsel %vm287_vm1, %v2210_v26, 0.0 }
 0xb72   :  { %2215 = vadd.xlane.f32.xlu0 %v2214_v53  ;;  %v2136_v30 = vpop.f32.mrf.mxu0  ;;  %v2200_v21 = vpop.f32.mrf.mxu1 }
 0xb73   :  { %v2137_v62 = vadd.f32 %v2136_v30, %v2095_v7  ;;  %v2443_v7 = vld [vmem:[#allocation13 + $0x160] sm:$0xff] }
 0xb75   :  { %v2204_v63 = vadd.f32 %v2194_v50, %v2137_v62 }
 0xb77   :  { %v2211_v0 = vadd.f32 %v2789_v58, %v2204_v63  ;;  %v2342_v63 = vld [vmem:[#allocation13 + $0x138] sm:$0xff] }
 0xb78   :  { %2413 = vmatpush.msra.mxu3 %v2342_v63 }
 0xb79   :  { %v2217_v3 = vsel %vm287_vm1, %v2211_v0, 0.0 }
 0xb7a   :  { %2218 = vadd.xlane.f32.xlu2 %v2217_v3  ;;  %v2139_v8 = vpop.f32.mrf.mxu0 }
 0xb7b   :  { %v2140_v9 = vadd.f32 %v2139_v8, %v2098_v2  ;;  %v2340_v8 = vld [vmem:[#allocation13 + $0x128] sm:$0xff] }
 0xb7d   :  { %v2205_v12 = vadd.f32 %v2197_v4, %v2140_v9 }
 0xb7f   :  { %v2212_v13 = vadd.f32 %v2789_v58, %v2205_v12 }
 0xb81   :  { %v2220_v56 = vsel %vm287_vm1, %v2212_v13, 0.0 }
 0xb82   :  { %v2142_v17 = vpop.f32.mrf.mxu0  ;;  %2221 = vadd.xlane.f32.xlu0 %v2220_v56  ;;  %v2339_v56 = vld [vmem:[#allocation13 + $0x120] sm:$0xff] }
 0xb83   :  { %v2143_v20 = vadd.f32 %v2142_v17, %v2101_v15 }
 0xb85   :  { %v2206_v25 = vadd.f32 %v2200_v21, %v2143_v20  ;;  %v2790_v20 = vld [vmem:[#allocation14 + $0x2] ss:$0 sm:$0xff] }
 0xb87   :  { %v2213_v11 = vadd.f32 %v2789_v58, %v2206_v25  ;;  %v2444_v58 = vld [vmem:[#allocation13 + $0x168] sm:$0xff] }
 0xb88   :  { %2473 = vmatpush.msra.mxu0 %v2444_v58 }
 0xb89   :  { %v2223_v28 = vsel %vm287_vm1, %v2213_v11, 0.0 }
 0xb8a   :  { %2224 = vadd.xlane.f32.xlu1 %v2223_v28  ;;  %2474 = vmatpush.msra.mxu0 %v2443_v7  ;;  %v2791_v28 = vld [vmem:[#allocation16 + $0x2] ss:$0 sm:$0xff] }
 0xbe5   :  { %v2216_v27 = vpop.xlane.xlu0 %2215 }
 0xbe6   :  { %v2226_v5 = vmul.f32 %v2216_v27, %v3326_v33 }
 0xbe8   :  { %v3811_v61 = vsub.f32 %v2210_v26, %v2226_v5 }
 0xbea   :  { %v2234_v10 = vmul.f32 %v3811_v61, %v3811_v61 }
 0xbec   :  { %v2238_v29 = vsel %vm287_vm1, %v2234_v10, 0.0 }
 0xbed   :  { %v2219_v32 = vpop.xlane.xlu2 %2218  ;;  %2239 = vadd.xlane.f32.xlu1 %v2238_v29 }
 0xbee   :  { %v2227_v34 = vmul.f32 %v2219_v32, %v3326_v33 }
 0xbf0   :  { %v3817_v35 = vsub.f32 %v2211_v0, %v2227_v34  ;;  %v2341_v0 = vld [vmem:[#allocation13 + $0x130] sm:$0xff] }
 0xbf1   :  { %2414 = vmatpush.msra.mxu3 %v2341_v0 }
 0xbf2   :  { %v2235_v37 = vmul.f32 %v3817_v35, %v3817_v35 }
 0xbf3   :  { %2415 = vmatpush.msra.mxu3 %v2340_v8 }
 0xbf4   :  { %v2241_v16 = vsel %vm287_vm1, %v2235_v37, 0.0 }
 0xbf5   :  { %2242 = vadd.xlane.f32.xlu0 %v2241_v16  ;;  %v2222_v48 = vpop.xlane.xlu0 %2221  ;;  %2416 = vmatpush.msra.mxu3 %v2339_v56 }
 0xbf6   :  { %v2228_v60 = vmul.f32 %v2222_v48, %v3326_v33 }
 0xbf8   :  { %v3823_v40 = vsub.f32 %v2212_v13, %v2228_v60 }
 0xbfa   :  { %v2236_v41 = vmul.f32 %v3823_v40, %v3823_v40 }
 0xbfc   :  { %v2244_v24 = vsel %vm287_vm1, %v2236_v41, 0.0 }
 0xbfd   :  { %v2225_v44 = vpop.xlane.xlu1 %2224  ;;  %2245 = vadd.xlane.f32.xlu1 %v2244_v24 }
 0xbfe   :  { %v2229_v31 = vmul.f32 %v2225_v44, %v3326_v33 }
 0xc00   :  { %v3829_v22 = vsub.f32 %v2213_v11, %v2229_v31 }
 0xc02   :  { %v2237_v36 = vmul.f32 %v3829_v22, %v3829_v22 }
 0xc04   :  { %v2247_v57 = vsel %vm287_vm1, %v2237_v36, 0.0 }
 0xc05   :  { %2248 = vadd.xlane.f32.xlu2 %v2247_v57 }
 0xc60   :  { %v2240_v51 = vpop.xlane.xlu1 %2239 }
 0xc61   :  { %v2250_v14 = vmul.f32 %v2240_v51, %v3326_v33 }
 0xc63   :  { %v2254_v54 = vadd.f32 1e-05, %v2250_v14 }
 0xc65   :  { %2845 = vrsqrt.f32 %v2254_v54  ;;  %vm2264_vm0 = vweird.f32 %v2254_v54 }
 0xc68   :  { %v2243_v59 = vpop.xlane.xlu0 %2242 }
 0xc69   :  { %v2251_v26 = vmul.f32 %v2243_v59, %v3326_v33 }
 0xc6b   :  { %v2846_v50 = vpop.eup %2845  ;;  %v2255_v53 = vadd.f32 1e-05, %v2251_v26 }
 0xc6c   :  { %v2259_v30 = vmul.f32 %v2846_v50, %v2254_v54  ;;  %vm2265_vm15 = vweird.f32 %v2846_v50 }
 0xc6d   :  { %2847 = vrsqrt.f32 %v2255_v53  ;;  %vm2266_vm4 = vmor %vm2264_vm0, %vm2265_vm15  ;;  %vm2274_vm6 = vweird.f32 %v2255_v53 }
 0xc6e   :  { %v2260_v62 = vmul.f32 %v2846_v50, %v2259_v30 }
 0xc70   :  { %v2261_v2 = vmul.f32 0.5, %v2260_v62  ;;  %v2246_v3 = vpop.xlane.xlu1 %2245 }
 0xc71   :  { %v2252_v4 = vmul.f32 %v2246_v3, %v3326_v33 }
 0xc72   :  { %v2262_v9 = vsub.f32 1.5, %v2261_v2 }
 0xc73   :  { %v2848_v12 = vpop.eup %2847  ;;  %v2256_v13 = vadd.f32 1e-05, %v2252_v4 }
 0xc74   :  { %v2263_v15 = vmul.f32 %v2846_v50, %v2262_v9  ;;  %v2269_v17 = vmul.f32 %v2848_v12, %v2255_v53  ;;  %vm2275_vm5 = vweird.f32 %v2848_v12 }
 0xc75   :  { %2849 = vrsqrt.f32 %v2256_v13  ;;  %vm2276_vm7 = vmor %vm2274_vm6, %vm2275_vm5  ;;  %vm2284_vm9 = vweird.f32 %v2256_v13 }
 0xc76   :  { %v2267_v21 = vsel %vm2266_vm4, %v2846_v50, %v2263_v15  ;;  %v2270_v25 = vmul.f32 %v2848_v12, %v2269_v17 }
 0xc77   :  { %v2298_v11 = vmul.f32 %v2267_v21, %v3811_v61 }
 0xc78   :  { %v2271_v27 = vmul.f32 0.5, %v2270_v25  ;;  %v2249_v5 = vpop.xlane.xlu2 %2248 }
 0xc79   :  { %v2305_v10 = vmul.f32 %v2790_v20, %v2298_v11  ;;  %v2253_v29 = vmul.f32 %v2249_v5, %v3326_v33 }
 0xc7a   :  { %v2272_v32 = vsub.f32 1.5, %v2271_v27 }
 0xc7b   :  { %v2850_v34 = vpop.eup %2849  ;;  %v2257_v37 = vadd.f32 1e-05, %v2253_v29  ;;  %v2312_v16 = vadd.f32 %v2791_v28, %v2305_v10  ;;  %v2792_v29 = vld [vmem:[%s3925_s8 + $0x3] ss:$0 sm:$0xff]  ;;  %s3128_s8 = smov [#allocation17]  }
 0xc7c   :  { %v2273_v48 = vmul.f32 %v2848_v12, %v2272_v32  ;;  %v2279_v60 = vmul.f32 %v2850_v34, %v2256_v13  ;;  %vm2285_vm8 = vweird.f32 %v2850_v34  ;;  %s2613_s14 = sshll.u32 %s3128_s8, 4  ;;  %s2614_s14 = int_to_ptr.vmem [resolvable:$true] %s2613_s14 }
 0xc7d   :  { %2851 = vrsqrt.f32 %v2257_v37  ;;  %v2322_v41 = vmax.f32 %v2312_v16, 0.0  ;;  %vm2286_vm10 = vmor %vm2284_vm9, %vm2285_vm8  ;;  %vm2294_vm12 = vweird.f32 %v2257_v37 }
 0xc7e   :  { %v2277_v24 = vsel %vm2276_vm7, %v2848_v12, %v2273_v48  ;;  %v2280_v44 = vmul.f32 %v2850_v34, %v2279_v60 }
 0xc7f   :  { %2730 = vmatmul.msk.f32.vlgmr.msra.gmra.mxu2 %vm287_vm1, %v2322_v41  ;;  %v2299_v61 = vmul.f32 %v2277_v24, %v3817_v35  ;;  %v2430_v38 = vrot.slane %v2322_v41, 1  ;;  %v2326_v9 = vrot.slane %v2322_v41, 7 }
 0xc80   :  { %v2281_v31 = vmul.f32 0.5, %v2280_v44 }
 0xc81   :  { %v2306_v36 = vmul.f32 %v2790_v20, %v2299_v61 }
 0xc82   :  { %v2282_v57 = vsub.f32 1.5, %v2281_v31 }
 0xc83   :  { %v2852_v45 = vpop.eup %2851  ;;  %v2313_v47 = vadd.f32 %v2791_v28, %v2306_v36 }
 0xc84   :  { %v2283_v49 = vmul.f32 %v2850_v34, %v2282_v57  ;;  %v2289_v6 = vmul.f32 %v2852_v45, %v2257_v37  ;;  %vm2295_vm11 = vweird.f32 %v2852_v45 }
 0xc85   :  { %v2323_v51 = vmax.f32 %v2313_v47, 0.0  ;;  %vm2296_vm13 = vmor %vm2294_vm12, %vm2295_vm11 }
 0xc86   :  { %v2287_v14 = vsel %vm2286_vm10, %v2850_v34, %v2283_v49  ;;  %v2290_v55 = vmul.f32 %v2852_v45, %v2289_v6 }
 0xc87   :  { %2731 = vmatmul.msk.f32.gmra.mxu2 %vm287_vm1, %v2323_v51  ;;  %v2431_v54 = vrot.slane %v2323_v51, 1  ;;  %v2300_v58 = vmul.f32 %v2287_v14, %v3823_v40 }
 0xc88   :  { %v2291_v35 = vmul.f32 0.5, %v2290_v55 }
 0xc89   :  { %v2436_v59 = vsel %vm374_vm3, %v2430_v38, %v2431_v54  ;;  %v2307_v7 = vmul.f32 %v2790_v20, %v2300_v58 }
 0xc8a   :  { %v2292_v26 = vsub.f32 1.5, %v2291_v35  ;;  %2738 = vmatmul.msk.f32.vlgmr.msra.gmra.mxu0 %vm287_vm1, %v2436_v59 }
 0xc8b   :  { %v2314_v50 = vadd.f32 %v2791_v28, %v2307_v7 }
 0xc8c   :  { %v2293_v53 = vmul.f32 %v2852_v45, %v2292_v26 }
 0xc8d   :  { %v2324_v30 = vmax.f32 %v2314_v50, 0.0 }
 0xc8e   :  { %v2297_v62 = vsel %vm2296_vm13, %v2852_v45, %v2293_v53 }
 0xc8f   :  { %v2301_v63 = vmul.f32 %v2297_v62, %v3829_v22  ;;  %2732 = vmatmul.msk.f32.gmra.mxu2 %vm287_vm1, %v2324_v30  ;;  %v2432_v40 = vrot.slane %v2324_v30, 1  ;;  %v2328_v21 = vrot.slane %v2324_v30, 7 }
 0xc91   :  { %v2435_v0 = vsel %vm374_vm3, %v2431_v54, %v2432_v40  ;;  %v2308_v2 = vmul.f32 %v2790_v20, %v2301_v63 }
 0xc92   :  { %v2439_v3 = vmul.f32 %v3293_v39, %v2435_v0  ;;  %v2327_v39 = vrot.slane %v2323_v51, 7 }
 0xc93   :  { %v2315_v4 = vadd.f32 %v2791_v28, %v2308_v2 }
 0xc94   :  { %2739 = vmatmul.msk.f32.gmra.mxu0 %vm287_vm1, %v2439_v3  ;;  %v2332_v25 = vsel %vm269_vm2, %v2326_v9, %v2327_v39 }
 0xc95   :  { %v2325_v8 = vmax.f32 %v2315_v4, 0.0 }
 0xc97   :  { %v2329_v12 = vrot.slane %v2325_v8, 7  ;;  %2733 = vmatmul.msk.f32.gmra.mxu2 %vm287_vm1, %v2325_v8  ;;  %v2433_v13 = vrot.slane %v2325_v8, 1 }
 0xc99   :  { %v2333_v22 = vsel %vm269_vm2, %v2329_v12, %v2326_v9  ;;  %v2434_v15 = vsel %vm374_vm3, %v2432_v40, %v2433_v13  ;;  %v2437_v17 = vsel %vm374_vm3, %v2433_v13, %v2430_v38  ;;  %v2330_v28 = vsel %vm269_vm2, %v2328_v21, %v2329_v12 }
 0xc9a   :  { %v2334_v56 = vmul.f32 %v3264_v18, %v2333_v22  ;;  %v2441_v20 = vmul.f32 %v3313_v52, %v2437_v17  ;;  %v2331_v18 = vsel %vm269_vm2, %v2327_v39, %v2328_v21 }
 0xc9b   :  { %v2336_v11 = vmul.f32 %v3304_v46, %v2331_v18 }
 0xc9c   :  { %2734 = vmatmul.msk.f32.vlgmr.msra.gmra.mxu3 %vm287_vm1, %v2334_v56  ;;  %2740 = vmatmul.msk.f32.gmra.mxu0 %vm287_vm1, %v2434_v15 }
 0xca4   :  { %2735 = vmatmul.msk.f32.gmra.mxu3 %vm287_vm1, %v2332_v25  ;;  %2741 = vmatmul.msk.f32.gmra.mxu0 %vm287_vm1, %v2441_v20 }
 0xcac   :  { %2736 = vmatmul.msk.f32.gmra.mxu3 %vm287_vm1, %v2336_v11 }
 0xcb4   :  { %2737 = vmatmul.msk.f32.gmra.mxu3 %vm287_vm1, %v2330_v28 }
 0xd02   :  { %v2377_v52 = vpop.f32.mrf.mxu2 }
 0xd07   :  { %v2476_v27 = vpop.f32.mrf.mxu0 }
 0xd0a   :  { %v2380_v34 = vpop.f32.mrf.mxu2 }
 0xd11   :  { %v2479_v16 = vpop.f32.mrf.mxu0 }
 0xd12   :  { %v2383_v24 = vpop.f32.mrf.mxu2 }
 0xd19   :  { %v2482_v61 = vpop.f32.mrf.mxu0 }
 0xd1a   :  { %v2386_v49 = vpop.f32.mrf.mxu2 }
 0xd1f   :  { %v2418_v5 = vpop.f32.mrf.mxu3 }
 0xd20   :  { %v2419_v10 = vadd.f32 %v2418_v5, %v2377_v52 }
 0xd21   :  { %v2485_v14 = vpop.f32.mrf.mxu0 }
 0xd22   :  { %v2488_v32 = vadd.f32 %v2476_v27, %v2419_v10 }
 0xd24   :  { %v2495_v37 = vadd.f32 %v2792_v29, %v2488_v32 }
 0xd26   :  { %v2499_v46 = vsel %vm287_vm1, %v2495_v37, 0.0 }
 0xd27   :  { %2500 = vadd.xlane.f32.xlu2 %v2499_v46  ;;  %v2421_v48 = vpop.f32.mrf.mxu3 }
 0xd28   :  { %v2422_v1 = vadd.f32 %v2421_v48, %v2380_v34  ;;  %v2794_v48 = vld [vmem:[#allocation16 + $0x3] ss:$0 sm:$0xff] }
 0xd2a   :  { %v2489_v60 = vadd.f32 %v2479_v16, %v2422_v1 }
 0xd2c   :  { %v2496_v41 = vadd.f32 %v2792_v29, %v2489_v60 }
 0xd2e   :  { %v2502_v44 = vsel %vm287_vm1, %v2496_v41, 0.0 }
 0xd2f   :  { %2503 = vadd.xlane.f32.xlu0 %v2502_v44  ;;  %v2424_v31 = vpop.f32.mrf.mxu3 }
 0xd30   :  { %v2425_v36 = vadd.f32 %v2424_v31, %v2383_v24 }
 0xd32   :  { %v2490_v57 = vadd.f32 %v2482_v61, %v2425_v36 }
 0xd34   :  { %v2497_v45 = vadd.f32 %v2792_v29, %v2490_v57 }
 0xd36   :  { %v2505_v47 = vsel %vm287_vm1, %v2497_v45, 0.0 }
 0xd37   :  { %v2427_v6 = vpop.f32.mrf.mxu3  ;;  %2506 = vadd.xlane.f32.xlu1 %v2505_v47 }
 0xd38   :  { %v2428_v51 = vadd.f32 %v2427_v6, %v2386_v49 }
 0xd3a   :  { %v2491_v55 = vadd.f32 %v2485_v14, %v2428_v51 }
 0xd3c   :  { %v2498_v54 = vadd.f32 %v2792_v29, %v2491_v55 }
 0xd3e   :  { %v2508_v38 = vsel %vm287_vm1, %v2498_v54, 0.0 }
 0xd3f   :  { %2509 = vadd.xlane.f32.xlu2 %v2508_v38 }
 0xd9a   :  { %v2501_v58 = vpop.xlane.xlu2 %2500 }
 0xd9b   :  { %v2511_v35 = vmul.f32 %v2501_v58, %v3326_v33 }
 0xd9d   :  { %v2515_v59 = vsub.f32 %v2495_v37, %v2511_v35  ;;  %v2793_v37 = vld [vmem:[#allocation14 + $0x3] ss:$0 sm:$0xff] }
 0xd9f   :  { %v2519_v7 = vmul.f32 %v2515_v59, %v2515_v59 }
 0xda1   :  { %v2523_v26 = vsel %vm287_vm1, %v2519_v7, 0.0 }
 0xda2   :  { %2524 = vadd.xlane.f32.xlu0 %v2523_v26  ;;  %v2504_v50 = vpop.xlane.xlu0 %2503 }
 0xda3   :  { %v2512_v53 = vmul.f32 %v2504_v50, %v3326_v33 }
 0xda5   :  { %v2516_v30 = vsub.f32 %v2496_v41, %v2512_v53 }
 0xda7   :  { %v2520_v62 = vmul.f32 %v2516_v30, %v2516_v30 }
 0xda9   :  { %v2526_v63 = vsel %vm287_vm1, %v2520_v62, 0.0 }
 0xdaa   :  { %2527 = vadd.xlane.f32.xlu1 %v2526_v63  ;;  %v2507_v40 = vpop.xlane.xlu1 %2506 }
 0xdab   :  { %v2513_v0 = vmul.f32 %v2507_v40, %v3326_v33 }
 0xdad   :  { %v3886_v2 = vsub.f32 %v2497_v45, %v2513_v0 }
 0xdaf   :  { %v2521_v3 = vmul.f32 %v3886_v2, %v3886_v2 }
 0xdb1   :  { %v2529_v4 = vsel %vm287_vm1, %v2521_v3, 0.0 }
 0xdb2   :  { %v2510_v8 = vpop.xlane.xlu2 %2509  ;;  %2530 = vadd.xlane.f32.xlu2 %v2529_v4 }
 0xdb3   :  { %v2514_v9 = vmul.f32 %v2510_v8, %v3326_v33 }
 0xdb5   :  { %v3892_v12 = vsub.f32 %v2498_v54, %v2514_v9 }
 0xdb7   :  { %v2522_v13 = vmul.f32 %v3892_v12, %v3892_v12 }
 0xdb9   :  { %v2532_v22 = vsel %vm287_vm1, %v2522_v13, 0.0 }
 0xdba   :  { %2533 = vadd.xlane.f32.xlu0 %v2532_v22 }
 0xe15   :  { %v2525_v56 = vpop.xlane.xlu0 %2524 }
 0xe16   :  { %v2535_v15 = vmul.f32 %v2525_v56, %v3326_v33 }
 0xe18   :  { %v2539_v39 = vadd.f32 1e-05, %v2535_v15 }
 0xe1a   :  { %2853 = vrsqrt.f32 %v2539_v39  ;;  %vm2549_vm3 = vweird.f32 %v2539_v39 }
 0xe1d   :  { %v2528_v17 = vpop.xlane.xlu1 %2527 }
 0xe1e   :  { %v2536_v20 = vmul.f32 %v2528_v17, %v3326_v33 }
 0xe20   :  { %v2854_v21 = vpop.eup %2853  ;;  %v2540_v25 = vadd.f32 1e-05, %v2536_v20 }
 0xe21   :  { %v2544_v18 = vmul.f32 %v2854_v21, %v2539_v39  ;;  %vm2550_vm2 = vweird.f32 %v2854_v21 }
 0xe22   :  { %2855 = vrsqrt.f32 %v2540_v25  ;;  %vm2551_vm14 = vmor %vm2549_vm3, %vm2550_vm2  ;;  %vm2559_vm0 = vweird.f32 %v2540_v25 }
 0xe23   :  { %v2545_v11 = vmul.f32 %v2854_v21, %v2544_v18 }
 0xe25   :  { %v2546_v28 = vmul.f32 0.5, %v2545_v11  ;;  %v2531_v52 = vpop.xlane.xlu2 %2530 }
 0xe26   :  { %v2537_v27 = vmul.f32 %v2531_v52, %v3326_v33 }
 0xe27   :  { %v2547_v5 = vsub.f32 1.5, %v2546_v28 }
 0xe28   :  { %v2856_v10 = vpop.eup %2855  ;;  %v2541_v29 = vadd.f32 1e-05, %v2537_v27 }
 0xe29   :  { %v2548_v32 = vmul.f32 %v2854_v21, %v2547_v5  ;;  %v2554_v34 = vmul.f32 %v2856_v10, %v2540_v25  ;;  %vm2560_vm15 = vweird.f32 %v2856_v10 }
 0xe2a   :  { %2857 = vrsqrt.f32 %v2541_v29  ;;  %vm2561_vm4 = vmor %vm2559_vm0, %vm2560_vm15  ;;  %vm2569_vm6 = vweird.f32 %v2541_v29 }
 0xe2b   :  { %v2552_v16 = vsel %vm2551_vm14, %v2854_v21, %v2548_v32  ;;  %v2555_v46 = vmul.f32 %v2856_v10, %v2554_v34 }
 0xe2c   :  { %v2583_v1 = vmul.f32 %v2552_v16, %v2515_v59 }
 0xe2d   :  { %v2556_v60 = vmul.f32 0.5, %v2555_v46  ;;  %v2534_v41 = vpop.xlane.xlu0 %2533 }
 0xe2e   :  { %v2590_v24 = vmul.f32 %v2793_v37, %v2583_v1  ;;  %v2538_v44 = vmul.f32 %v2534_v41, %v3326_v33 }
 0xe2f   :  { %v2557_v61 = vsub.f32 1.5, %v2556_v60 }
 0xe30   :  { %v2858_v31 = vpop.eup %2857  ;;  %v2597_v36 = vadd.f32 %v2794_v48, %v2590_v24  ;;  %v2542_v57 = vadd.f32 1e-05, %v2538_v44 }
 0xe31   :  { %v2558_v45 = vmul.f32 %v2856_v10, %v2557_v61  ;;  %v2564_v47 = vmul.f32 %v2858_v31, %v2541_v29  ;;  %vm2570_vm5 = vweird.f32 %v2858_v31 }
 0xe32   :  { %v2601_v49 = vadd.f32 %v2597_v36, %v3753_v43  ;;  %2859 = vrsqrt.f32 %v2542_v57  ;;  %vm2571_vm7 = vmor %vm2569_vm6, %vm2570_vm5  ;;  %vm2579_vm9 = vweird.f32 %v2542_v57 }
 0xe33   :  { %v2562_v6 = vsel %vm2561_vm4, %v2856_v10, %v2558_v45  ;;  %v2565_v51 = vmul.f32 %v2858_v31, %v2564_v47 }
 0xe34   :  { %2605 = vst.msk [vmem:[#allocation17] sm:$0xff] %vm287_vm1, %v2601_v49  ;;  %v2584_v14 = vmul.f32 %v2562_v6, %v2516_v30 }
 0xe35   :  { %v2566_v55 = vmul.f32 0.5, %v2565_v51 }
 0xe36   :  { %v2591_v54 = vmul.f32 %v2793_v37, %v2584_v14 }
 0xe37   :  { %v2567_v33 = vsub.f32 1.5, %v2566_v55 }
 0xe38   :  { %v2860_v38 = vpop.eup %2859  ;;  %v2598_v58 = vadd.f32 %v2794_v48, %v2591_v54 }
 0xe39   :  { %v2568_v35 = vmul.f32 %v2858_v31, %v2567_v33  ;;  %v2574_v59 = vmul.f32 %v2860_v38, %v2542_v57  ;;  %vm2580_vm8 = vweird.f32 %v2860_v38 }
 0xe3a   :  { %v2602_v7 = vadd.f32 %v2598_v58, %v3759_v42  ;;  %vm2581_vm10 = vmor %vm2579_vm9, %vm2580_vm8 }
 0xe3b   :  { %v2572_v43 = vsel %vm2571_vm7, %v2858_v31, %v2568_v35  ;;  %v2575_v26 = vmul.f32 %v2860_v38, %v2574_v59 }
 0xe3c   :  { %2606 = vst.msk [vmem:[#allocation17 + $0x8] sm:$0xff] %vm287_vm1, %v2602_v7  ;;  %v2585_v50 = vmul.f32 %v2572_v43, %v3886_v2 }
 0xe3d   :  { %v2576_v53 = vmul.f32 0.5, %v2575_v26 }
 0xe3e   :  { %v2592_v30 = vmul.f32 %v2793_v37, %v2585_v50 }
 0xe3f   :  { %v2577_v62 = vsub.f32 1.5, %v2576_v53 }
 0xe40   :  { %v2599_v63 = vadd.f32 %v2794_v48, %v2592_v30 }
 0xe41   :  { %v2578_v40 = vmul.f32 %v2860_v38, %v2577_v62 }
 0xe42   :  { %v2603_v0 = vadd.f32 %v2599_v63, %v3768_v23 }
 0xe43   :  { %v2582_v3 = vsel %vm2581_vm10, %v2860_v38, %v2578_v40 }
 0xe44   :  { %2607 = vst.msk [vmem:[#allocation17 + $0x10] sm:$0xff] %vm287_vm1, %v2603_v0  ;;  %v2586_v42 = vmul.f32 %v2582_v3, %v3892_v12 }
 0xe46   :  { %v2593_v4 = vmul.f32 %v2793_v37, %v2586_v42 }
 0xe48   :  { %v2600_v2 = vadd.f32 %v2794_v48, %v2593_v4 }
 0xe4a   :  { %v2604_v8 = vadd.f32 %v2600_v2, %v3777_v19 }
 0xe4c   :  { %2608 = vst.msk [vmem:[#allocation17 + $0x18] sm:$0xff] %vm287_vm1, %v2604_v8 }
 0xe4d   :  { %2621 = dma.vmem_to_hbm [thread:$0]  %s2614_s14, 512, %s2616_s3, [#allocation4], %s3114_s22, %s3114_s22, %s3115_s23  }
 0xe4e   :  { %3111 = dma.done.wait [#allocation4], 512  }
 0xe4f   :  { %3112 = vsyncadd [#allocation4], 4294966784 }
 0xe50   :  { %2626 = vsyncpa [#allocation3], 1 }
 0xe51   :  { %2627 = vsyncpa [#allocation6], 1 }
 0xe52   :  { %2628 = vsyncpa [#allocation9], 1 }
 0xe53   :  { %2629 = vsyncpa [#allocation12], 1 }
 0xe54   :  { %2630 = vsyncpa [#allocation15], 1 }
 0xe55   :  { %2631 = vsyncpa [#allocation4], 1 }

</bundles_post_ra>
